<compile_context>
chip_gen: v6e
topology: v6e:2x2x1
jax: 0.10.0
libtpu: 0.0.40
codegen_flags: <defaults>
</compile_context>

<pallas_src>
import functools
import math

import jax
import jax.numpy as jnp
from jax.experimental import pallas as pl
from jax.experimental.pallas import tpu as pltpu

_LANE = 128


# ----------------------------- Pallas kernel -------------------------------
def _fused_stack_kernel(x_in_ref, mem_ref,
                        sa_qkv_w_ref, sa_qkv_b_ref, sa_o_w_ref, sa_o_b_ref,
                        ca_q_w_ref, ca_q_b_ref, ca_kv_w_ref, ca_kv_b_ref,
                        ca_o_w_ref, ca_o_b_ref,
                        w1_ref, b1_ref, w2_ref, b2_ref,
                        ln_g_ref, ln_b_ref,
                        out_ref, x_scr,
                        *, nhead, d_real, B, Lt, Lm, eps=1e-5):
    """Grid axis = layer index ("arbitrary"); x carried in VMEM scratch."""
    layer = pl.program_id(0)

    @pl.when(layer == 0)
    def _():
        x_scr[...] = x_in_ref[...]          # load residual stream once

    x = x_scr[...]                          # [B*Lt, Dp] f32
    Dp = x.shape[-1]
    Dh = d_real // nhead
    scale = 1.0 / math.sqrt(Dh)

    # lane mask for the zero-padded feature lanes (LayerNorm statistics)
    lane = jax.lax.broadcasted_iota(jnp.int32, (1, Dp), 1)
    lane_mask = (lane < d_real).astype(jnp.float32)

    ln_g = ln_g_ref[0]                      # [3, Dp]
    ln_b = ln_b_ref[0]

    def mm(a, w):                           # bf16 x bf16 -> f32 accumulation (MXU)
        return jnp.dot(a.astype(jnp.bfloat16), w,
                       preferred_element_type=jnp.float32)

    def layer_norm(y, idx):
        mu = jnp.sum(y, axis=-1, keepdims=True) * (1.0 / d_real)
        diff = (y - mu) * lane_mask         # padded lanes excluded from stats
        var = jnp.sum(diff * diff, axis=-1, keepdims=True) * (1.0 / d_real)
        return (diff * jax.lax.rsqrt(var + eps) * ln_g[idx:idx + 1, :]
                + ln_b[idx:idx + 1, :])

    def attention(q, k, v, o_w, o_b, Lkv):
        # q: [B*Lt, Dp]; k, v: [B*Lkv, Dp]; heads live in lanes [0, d_real)
        rows = []
        for b in range(B):                  # tiny static loop (no batch grid)
            qb = q[b * Lt:(b + 1) * Lt, :]
            kb = k[b * Lkv:(b + 1) * Lkv, :]
            vb = v[b * Lkv:(b + 1) * Lkv, :]
            acc = jnp.zeros((Lt, Dp), jnp.float32)
            for h in range(nhead):          # per-head accumulation, no concat
                lo, hi = h * Dh, (h + 1) * Dh
                s = jax.lax.dot_general(qb[:, lo:hi], kb[:, lo:hi],
                                        (((1,), (1,)), ((), ())),
                                        preferred_element_type=jnp.float32) * scale
                s = s - jnp.max(s, axis=-1, keepdims=True)
                p = jnp.exp(s)
                p = p * pl.reciprocal(jnp.sum(p, axis=-1, keepdims=True),
                                      approx=True)
                ctx = jnp.dot(p, vb[:, lo:hi], preferred_element_type=jnp.float32)
                acc = acc + mm(ctx, o_w[lo:hi, :])
            rows.append(acc)
        return jnp.concatenate(rows, axis=0) + o_b

    # ---- self-attention block (post-norm), fused QKV projection ----
    qkv = mm(x, sa_qkv_w_ref[0]) + sa_qkv_b_ref[0]          # [B*Lt, 3*Dp]
    x = layer_norm(
        x + attention(qkv[:, :Dp], qkv[:, Dp:2 * Dp], qkv[:, 2 * Dp:],
                      sa_o_w_ref[0], sa_o_b_ref[0], Lt), 0)

    # ---- cross-attention block (queries=x, keys/values=memory), fused KV ----
    cq = mm(x, ca_q_w_ref[0]) + ca_q_b_ref[0]                # [B*Lt, Dp]
    ckv = mm(mem_ref[...], ca_kv_w_ref[0]) + ca_kv_b_ref[0]  # [B*Lm, 2*Dp]
    x = layer_norm(
        x + attention(cq, ckv[:, :Dp], ckv[:, Dp:],
                      ca_o_w_ref[0], ca_o_b_ref[0], Lm), 1)

    # ---- feed-forward block (relu) ----
    h1 = jnp.maximum(mm(x, w1_ref[0]) + b1_ref[0], 0.0)
    x = layer_norm(x + mm(h1, w2_ref[0]) + b2_ref[0], 2)

    x_scr[...] = x                          # carry residual to next layer

    @pl.when(layer == pl.num_programs(0) - 1)
    def _():
        out_ref[...] = x.astype(out_ref.dtype)


# ----------------------------- parameter packing ----------------------------
def _pack_params(layer_params, D, Dff, Dp, Dffp):
    """Zero-pad to lane-dense widths, fuse QKV/KV, stack over layers, bf16 weights."""
    def padw(w, r, c):
        return jnp.pad(w, ((0, r - w.shape[0]), (0, c - w.shape[1])))

    def padb(b, c):
        return jnp.pad(b, ((0, c - b.shape[0]),))[None, :]

    keys = ["sa_qkv_w", "sa_qkv_b", "sa_o_w", "sa_o_b",
            "ca_q_w", "ca_q_b", "ca_kv_w", "ca_kv_b", "ca_o_w", "ca_o_b",
            "w1", "b1", "w2", "b2", "ln_g", "ln_b"]
    acc = {k: [] for k in keys}
    for p in layer_params:
        sw, sb = p["sa_w"], p["sa_b"]
        cw, cb = p["ca_w"], p["ca_b"]
        acc["sa_qkv_w"].append(
            jnp.concatenate([padw(sw[i], Dp, Dp) for i in range(3)], axis=1))
        acc["sa_qkv_b"].append(
            jnp.concatenate([padb(sb[i], Dp) for i in range(3)], axis=1))
        acc["sa_o_w"].append(padw(sw[3], Dp, Dp))
        acc["sa_o_b"].append(padb(sb[3], Dp))
        acc["ca_q_w"].append(padw(cw[0], Dp, Dp))
        acc["ca_q_b"].append(padb(cb[0], Dp))
        acc["ca_kv_w"].append(
            jnp.concatenate([padw(cw[i], Dp, Dp) for i in (1, 2)], axis=1))
        acc["ca_kv_b"].append(
            jnp.concatenate([padb(cb[i], Dp) for i in (1, 2)], axis=1))
        acc["ca_o_w"].append(padw(cw[3], Dp, Dp))
        acc["ca_o_b"].append(padb(cb[3], Dp))
        acc["w1"].append(padw(p["w1"], Dp, Dffp))
        acc["b1"].append(padb(p["b1"][0], Dffp))
        acc["w2"].append(padw(p["w2"], Dffp, Dp))
        acc["b2"].append(padb(p["b2"][0], Dp))
        acc["ln_g"].append(jnp.pad(p["ln_g"], ((0, 0), (0, Dp - D))))
        acc["ln_b"].append(jnp.pad(p["ln_b"], ((0, 0), (0, Dp - D))))
    stacked = {k: jnp.stack(v, axis=0) for k, v in acc.items()}
    for k in ["sa_qkv_w", "sa_o_w", "ca_q_w", "ca_kv_w", "ca_o_w", "w1", "w2"]:
        stacked[k] = stacked[k].astype(jnp.bfloat16)   # halve weight DMA bytes
    return stacked


# ----------------------------- wrapper --------------------------------------
def cross_transformer_stack(tgt, memory, layer_params, nhead):
    B, Lt, D = tgt.shape
    Bm, Lm, Dm = memory.shape
    assert Bm == B and Dm == D
    assert D % nhead == 0, "d_model must be divisible by nhead"
    L = len(layer_params)
    Dff = layer_params[0]["w1"].shape[1]
    Dp = ((D + _LANE - 1) // _LANE) * _LANE        # lane-dense feature dim
    Dffp = ((Dff + _LANE - 1) // _LANE) * _LANE

    pk = _pack_params(layer_params, D, Dff, Dp, Dffp)

    # Flatten batch and zero-pad features (host-side layout plumbing).
    x2 = jnp.pad(tgt.reshape(B * Lt, D), ((0, 0), (0, Dp - D)))
    m2 = jnp.pad(memory.reshape(B * Lm, D),
                 ((0, 0), (0, Dp - D))).astype(jnp.bfloat16)

    def const_spec(arr):
        return pl.BlockSpec(arr.shape, lambda l: (0,) * arr.ndim)

    def layer_spec(arr):
        blk = (1,) + arr.shape[1:]
        return pl.BlockSpec(blk, lambda l: (l,) + (0,) * (len(blk) - 1))

    kernel = functools.partial(_fused_stack_kernel, nhead=nhead, d_real=D,
                               B=B, Lt=Lt, Lm=Lm)

    out2 = pl.pallas_call(
        kernel,
        out_shape=jax.ShapeDtypeStruct((B * Lt, Dp), jnp.float32),
        grid=(L,),
        in_specs=[
            const_spec(x2), const_spec(m2),
            layer_spec(pk["sa_qkv_w"]), layer_spec(pk["sa_qkv_b"]),
            layer_spec(pk["sa_o_w"]), layer_spec(pk["sa_o_b"]),
            layer_spec(pk["ca_q_w"]), layer_spec(pk["ca_q_b"]),
            layer_spec(pk["ca_kv_w"]), layer_spec(pk["ca_kv_b"]),
            layer_spec(pk["ca_o_w"]), layer_spec(pk["ca_o_b"]),
            layer_spec(pk["w1"]), layer_spec(pk["b1"]),
            layer_spec(pk["w2"]), layer_spec(pk["b2"]),
            layer_spec(pk["ln_g"]), layer_spec(pk["ln_b"]),
        ],
        out_specs=pl.BlockSpec((B * Lt, Dp), lambda l: (0, 0)),
        scratch_shapes=[pltpu.VMEM((B * Lt, Dp), jnp.float32)],
        compiler_params=pltpu.CompilerParams(
            dimension_semantics=("arbitrary",)),
    )(x2, m2,
      pk["sa_qkv_w"], pk["sa_qkv_b"], pk["sa_o_w"], pk["sa_o_b"],
      pk["ca_q_w"], pk["ca_q_b"], pk["ca_kv_w"], pk["ca_kv_b"],
      pk["ca_o_w"], pk["ca_o_b"],
      pk["w1"], pk["b1"], pk["w2"], pk["b2"],
      pk["ln_g"], pk["ln_b"])

    return out2[:, :D].reshape(B, Lt, D)


# ------------------------ pure-JAX reference (same math) --------------------
def _ref_layer(x, mem, p, nhead, eps=1e-5):
    D = x.shape[-1]
    Dh = D // nhead
    scale = 1.0 / math.sqrt(Dh)
    bf = jnp.bfloat16

    def mm(a, w):   # same bf16-operand / f32-accumulate math as the kernel
        return jnp.einsum("...ld,de->...le", a.astype(bf), w.astype(bf),
                          preferred_element_type=jnp.float32)

    def mha(q_in, kv_in, w, b):
        q = mm(q_in, w[0]) + b[0]
        k = mm(kv_in, w[1]) + b[1]
        v = mm(kv_in, w[2]) + b[2]
        out = 0.0
        for h in range(nhead):
            sl = slice(h * Dh, (h + 1) * Dh)
            s = jnp.einsum("bqd,bkd->bqk", q[..., sl], k[..., sl]) * scale
            s = s - jnp.max(s, axis=-1, keepdims=True)
            pm = jnp.exp(s)
            pm = pm / jnp.sum(pm, axis=-1, keepdims=True)
            ctx = jnp.einsum("bqk,bkd->bqd", pm, v[..., sl])
            out = out + mm(ctx, w[3][sl, :])
        return out + b[3]

    def ln(y, idx):
        mu = jnp.mean(y, axis=-1, keepdims=True)
        var = jnp.mean((y - mu) ** 2, axis=-1, keepdims=True)
        return (y - mu) * jax.lax.rsqrt(var + eps) * p["ln_g"][idx] + p["ln_b"][idx]

    x = ln(x + mha(x, x, p["sa_w"], p["sa_b"]), 0)
    x = ln(x + mha(x, mem, p["ca_w"], p["ca_b"]), 1)
    h = mm(jnp.maximum(mm(x, p["w1"]) + p["b1"], 0.0), p["w2"]) + p["b2"]
    return ln(x + h, 2)


def _ref_stack(tgt, memory, layer_params, nhead):
    x = tgt
    for p in layer_params:
        x = _ref_layer(x, memory, p, nhead)
    return x


# ----------------------------- parameter init -------------------------------
def init_params(key, d_model, nhead, dim_ff, num_layers):
    layers = []
    s = 1.0 / math.sqrt(d_model)
    sf = 1.0 / math.sqrt(dim_ff)
    for _ in range(num_layers):
        key, *ks = jax.random.split(key, 10)
        layers.append(dict(
            sa_w=jax.random.normal(ks[0], (4, d_model, d_model), jnp.float32) * s,
            sa_b=jax.random.normal(ks[1], (4, d_model), jnp.float32) * 0.1,
            ca_w=jax.random.normal(ks[2], (4, d_model, d_model), jnp.float32) * s,
            ca_b=jax.random.normal(ks[3], (4, d_model), jnp.float32) * 0.1,
            w1=jax.random.normal(ks[4], (d_model, dim_ff), jnp.float32) * s,
            b1=jax.random.normal(ks[5], (1, dim_ff), jnp.float32) * 0.1,
            w2=jax.random.normal(ks[6], (dim_ff, d_model), jnp.float32) * sf,
            b2=jax.random.normal(ks[7], (1, d_model), jnp.float32) * 0.1,
            ln_g=jnp.ones((3, d_model), jnp.float32),
            ln_b=jnp.zeros((3, d_model), jnp.float32),
        ))
    return layers


# ----------------------------------- main ------------------------------------
if __name__ == "__main__":
    # Small shapes consistent with the module (scaled-down d_model/nhead/ffn).
    d_model, nhead, dim_ff, num_layers = 32, 4, 64, 2
    B, Lt, Lm = 2, 8, 16     # batch, query length, memory length

    key = jax.random.PRNGKey(0)
    k_tgt, k_mem, k_par = jax.random.split(key, 3)
    tgt = jax.random.normal(k_tgt, (B, Lt, d_model), jnp.float32)
    memory = jax.random.normal(k_mem, (B, Lm, d_model), jnp.float32)
    params = init_params(k_par, d_model, nhead, dim_ff, num_layers)

    out = cross_transformer_stack(tgt, memory, params, nhead)
    out = jax.block_until_ready(out)

    ref = _ref_stack(tgt, memory, params, nhead)
    assert out.shape == (B, Lt, d_model)
    # Tolerance covers bf16 matmul operands + EUP approx-reciprocal in softmax.
    err = float(jnp.max(jnp.abs(out - ref)))
    assert jnp.allclose(out, ref, atol=1e-2, rtol=1e-2), \
        f"mismatch vs reference (max abs err {err})"
    print("KERNEL_OK")
</pallas_src>

<mosaic_0001>
module attributes {stable_mosaic.version = 11 : i64} {
  func.func @_fused_stack_kernel(%arg0: i32, %arg1: memref<16x128xf32, #tpu.memory_space<vmem>>, %arg2: memref<32x128xbf16, #tpu.memory_space<vmem>>, %arg3: memref<1x128x384xbf16, #tpu.memory_space<vmem>>, %arg4: memref<1x1x384xf32, #tpu.memory_space<vmem>>, %arg5: memref<1x128x128xbf16, #tpu.memory_space<vmem>>, %arg6: memref<1x1x128xf32, #tpu.memory_space<vmem>>, %arg7: memref<1x128x128xbf16, #tpu.memory_space<vmem>>, %arg8: memref<1x1x128xf32, #tpu.memory_space<vmem>>, %arg9: memref<1x128x256xbf16, #tpu.memory_space<vmem>>, %arg10: memref<1x1x256xf32, #tpu.memory_space<vmem>>, %arg11: memref<1x128x128xbf16, #tpu.memory_space<vmem>>, %arg12: memref<1x1x128xf32, #tpu.memory_space<vmem>>, %arg13: memref<1x128x128xbf16, #tpu.memory_space<vmem>>, %arg14: memref<1x1x128xf32, #tpu.memory_space<vmem>>, %arg15: memref<1x128x128xbf16, #tpu.memory_space<vmem>>, %arg16: memref<1x1x128xf32, #tpu.memory_space<vmem>>, %arg17: memref<1x3x128xf32, #tpu.memory_space<vmem>>, %arg18: memref<1x3x128xf32, #tpu.memory_space<vmem>>, %arg19: memref<16x128xf32, #tpu.memory_space<vmem>>, %arg20: memref<16x128xf32, #tpu.memory_space<vmem>>) attributes {dimension_semantics = [#tpu.dimension_semantics<arbitrary>], iteration_bounds = array<i64: 2>, scalar_prefetch = 0 : i64, scratch_operands = 1 : i64, tpu.core_type = #tpu.core_type<tc>, window_params = [{pipeline_mode = #tpu.pipeline_mode<synchronous>, transform_indices = @transform_0, window_bounds = array<i64: 16, 128>}, {pipeline_mode = #tpu.pipeline_mode<synchronous>, transform_indices = @transform_1, window_bounds = array<i64: 32, 128>}, {transform_indices = @transform_2, window_bounds = array<i64: 1, 128, 384>}, {transform_indices = @transform_3, window_bounds = array<i64: 1, 1, 384>}, {transform_indices = @transform_4, window_bounds = array<i64: 1, 128, 128>}, {transform_indices = @transform_5, window_bounds = array<i64: 1, 1, 128>}, {transform_indices = @transform_6, window_bounds = array<i64: 1, 128, 128>}, {transform_indices = @transform_7, window_bounds = array<i64: 1, 1, 128>}, {transform_indices = @transform_8, window_bounds = array<i64: 1, 128, 256>}, {transform_indices = @transform_9, window_bounds = array<i64: 1, 1, 256>}, {transform_indices = @transform_10, window_bounds = array<i64: 1, 128, 128>}, {transform_indices = @transform_11, window_bounds = array<i64: 1, 1, 128>}, {transform_indices = @transform_12, window_bounds = array<i64: 1, 128, 128>}, {transform_indices = @transform_13, window_bounds = array<i64: 1, 1, 128>}, {transform_indices = @transform_14, window_bounds = array<i64: 1, 128, 128>}, {transform_indices = @transform_15, window_bounds = array<i64: 1, 1, 128>}, {transform_indices = @transform_16, window_bounds = array<i64: 1, 3, 128>}, {transform_indices = @transform_17, window_bounds = array<i64: 1, 3, 128>}, {pipeline_mode = #tpu.pipeline_mode<synchronous>, transform_indices = @transform_18, window_bounds = array<i64: 16, 128>}]} {
    %c0_i32 = arith.constant 0 : i32
    %0 = arith.cmpi eq, %arg0, %c0_i32 : i32
    %1 = arith.extui %0 : i1 to i32
    %c0_i32_0 = arith.constant 0 : i32
    %2 = arith.cmpi ne, %1, %c0_i32_0 : i32
    scf.if %2 {
      %c0_175 = arith.constant 0 : index
      %c0_176 = arith.constant 0 : index
      %505 = vector.load %arg1[%c0_175, %c0_176] : memref<16x128xf32, #tpu.memory_space<vmem>>, vector<16x128xf32>
      %c0_177 = arith.constant 0 : index
      %c0_178 = arith.constant 0 : index
      %506 = vector.load %arg20[%c0_177, %c0_178] : memref<16x128xf32, #tpu.memory_space<vmem>>, vector<16x128xf32>
      tpu.vector_store %arg20[%c0_177, %c0_178], %505 {strides = array<i32>} : memref<16x128xf32, #tpu.memory_space<vmem>>, vector<16x128xf32>,
    } else {
    }
    %c0 = arith.constant 0 : index
    %c0_1 = arith.constant 0 : index
    %3 = vector.load %arg20[%c0, %c0_1] : memref<16x128xf32, #tpu.memory_space<vmem>>, vector<16x128xf32>
    %4 = tpu.iota {dimensions = array<i32: 1>} : vector<1x128xi32>
    %c32_i32 = arith.constant 32 : i32
    %5 = vector.broadcast %c32_i32 : i32 to vector<1x128xi32>
    %6 = arith.cmpi slt, %4, %5 : vector<1x128xi32>
    %7 = arith.extui %6 : vector<1x128xi1> to vector<1x128xi32>
    %8 = arith.sitofp %7 : vector<1x128xi32> to vector<1x128xf32>
    %c0_2 = arith.constant 0 : index
    %c0_3 = arith.constant 0 : index
    %c0_4 = arith.constant 0 : index
    %9 = vector.load %arg17[%c0_2, %c0_3, %c0_4] : memref<1x3x128xf32, #tpu.memory_space<vmem>>, vector<1x3x128xf32>
    %10 = vector.shape_cast %9 : vector<1x3x128xf32> to vector<3x128xf32>
    %c0_5 = arith.constant 0 : index
    %c0_6 = arith.constant 0 : index
    %c0_7 = arith.constant 0 : index
    %11 = vector.load %arg18[%c0_5, %c0_6, %c0_7] : memref<1x3x128xf32, #tpu.memory_space<vmem>>, vector<1x3x128xf32>
    %12 = vector.shape_cast %11 : vector<1x3x128xf32> to vector<3x128xf32>
    %c0_8 = arith.constant 0 : index
    %c0_9 = arith.constant 0 : index
    %c0_10 = arith.constant 0 : index
    %13 = vector.load %arg3[%c0_8, %c0_9, %c0_10] : memref<1x128x384xbf16, #tpu.memory_space<vmem>>, vector<1x128x384xbf16>
    %14 = vector.shape_cast %13 : vector<1x128x384xbf16> to vector<128x384xbf16>
    %15 = arith.truncf %3 : vector<16x128xf32> to vector<16x128xbf16>
    %cst = arith.constant dense<0.000000e+00> : vector<16x384xf32>
    %16 = tpu.matmul %15, %14, %cst {dimension_numbers = #tpu.dot_dimension_numbers<[1], [0], [0], [1], [0, 0, 1, 1], [], []>} : vector<16x128xbf16>, vector<128x384xbf16>, vector<16x384xf32> -> vector<16x384xf32>
    %c0_11 = arith.constant 0 : index
    %c0_12 = arith.constant 0 : index
    %c0_13 = arith.constant 0 : index
    %17 = vector.load %arg4[%c0_11, %c0_12, %c0_13] : memref<1x1x384xf32, #tpu.memory_space<vmem>>, vector<1x1x384xf32>
    %18 = vector.shape_cast %17 : vector<1x1x384xf32> to vector<1x384xf32>
    %19 = vector.broadcast %18 : vector<1x384xf32> to vector<16x384xf32>
    %20 = arith.addf %16, %19 : vector<16x384xf32>
    %21 = vector.extract_strided_slice %20 {offsets = [0, 0], sizes = [16, 128], strides = [1, 1]} : vector<16x384xf32> to vector<16x128xf32>
    %22 = vector.extract_strided_slice %20 {offsets = [0, 128], sizes = [16, 128], strides = [1, 1]} : vector<16x384xf32> to vector<16x128xf32>
    %23 = vector.extract_strided_slice %20 {offsets = [0, 256], sizes = [16, 128], strides = [1, 1]} : vector<16x384xf32> to vector<16x128xf32>
    %c0_14 = arith.constant 0 : index
    %c0_15 = arith.constant 0 : index
    %c0_16 = arith.constant 0 : index
    %24 = vector.load %arg5[%c0_14, %c0_15, %c0_16] : memref<1x128x128xbf16, #tpu.memory_space<vmem>>, vector<1x128x128xbf16>
    %25 = vector.shape_cast %24 : vector<1x128x128xbf16> to vector<128x128xbf16>
    %c0_17 = arith.constant 0 : index
    %c0_18 = arith.constant 0 : index
    %c0_19 = arith.constant 0 : index
    %26 = vector.load %arg6[%c0_17, %c0_18, %c0_19] : memref<1x1x128xf32, #tpu.memory_space<vmem>>, vector<1x1x128xf32>
    %27 = vector.shape_cast %26 : vector<1x1x128xf32> to vector<1x128xf32>
    %28 = vector.extract_strided_slice %21 {offsets = [0, 0], sizes = [8, 128], strides = [1, 1]} : vector<16x128xf32> to vector<8x128xf32>
    %29 = vector.extract_strided_slice %22 {offsets = [0, 0], sizes = [8, 128], strides = [1, 1]} : vector<16x128xf32> to vector<8x128xf32>
    %30 = vector.extract_strided_slice %23 {offsets = [0, 0], sizes = [8, 128], strides = [1, 1]} : vector<16x128xf32> to vector<8x128xf32>
    %cst_20 = arith.constant 0.000000e+00 : f32
    %31 = vector.broadcast %cst_20 : f32 to vector<8x128xf32>
    %32 = vector.extract_strided_slice %28 {offsets = [0, 0], sizes = [8, 8], strides = [1, 1]} : vector<8x128xf32> to vector<8x8xf32>
    %33 = vector.extract_strided_slice %29 {offsets = [0, 0], sizes = [8, 8], strides = [1, 1]} : vector<8x128xf32> to vector<8x8xf32>
    %cst_21 = arith.constant dense<0.000000e+00> : vector<8x8xf32>
    %34 = tpu.matmul %32, %33, %cst_21 {dimension_numbers = #tpu.dot_dimension_numbers<[1], [1], [0], [0], [0, 0, 1, 0], [], []>} : vector<8x8xf32>, vector<8x8xf32>, vector<8x8xf32> -> vector<8x8xf32>
    %cst_22 = arith.constant 0.353553385 : f32
    %35 = vector.broadcast %cst_22 : f32 to vector<8x8xf32>
    %36 = arith.mulf %34, %35 : vector<8x8xf32>
    %cst_23 = arith.constant dense<0xFF800000> : vector<8xf32>
    %37 = vector.multi_reduction <maximumf>, %36, %cst_23 [1] : vector<8x8xf32> to vector<8xf32>
    %38 = vector.shape_cast %37 : vector<8xf32> to vector<8x1xf32>
    %39 = vector.broadcast %38 : vector<8x1xf32> to vector<8x8xf32>
    %40 = arith.subf %36, %39 : vector<8x8xf32>
    %41 = math.exp %40 : vector<8x8xf32>
    %cst_24 = arith.constant dense<0.000000e+00> : vector<8xf32>
    %42 = vector.multi_reduction <add>, %41, %cst_24 [1] : vector<8x8xf32> to vector<8xf32>
    %43 = vector.shape_cast %42 : vector<8xf32> to vector<8x1xf32>
    %44 = tpu.reciprocal %43 {approx = true} : vector<8x1xf32> -> vector<8x1xf32>
    %45 = vector.broadcast %44 : vector<8x1xf32> to vector<8x8xf32>
    %46 = arith.mulf %41, %45 : vector<8x8xf32>
    %47 = vector.extract_strided_slice %30 {offsets = [0, 0], sizes = [8, 8], strides = [1, 1]} : vector<8x128xf32> to vector<8x8xf32>
    %cst_25 = arith.constant dense<0.000000e+00> : vector<8x8xf32>
    %48 = tpu.matmul %46, %47, %cst_25 {dimension_numbers = #tpu.dot_dimension_numbers<[1], [0], [0], [1], [0, 0, 1, 1], [], []>} : vector<8x8xf32>, vector<8x8xf32>, vector<8x8xf32> -> vector<8x8xf32>
    %49 = vector.extract_strided_slice %25 {offsets = [0, 0], sizes = [8, 128], strides = [1, 1]} : vector<128x128xbf16> to vector<8x128xbf16>
    %50 = arith.truncf %48 : vector<8x8xf32> to vector<8x8xbf16>
    %cst_26 = arith.constant dense<0.000000e+00> : vector<8x128xf32>
    %51 = tpu.matmul %50, %49, %cst_26 {dimension_numbers = #tpu.dot_dimension_numbers<[1], [0], [0], [1], [0, 0, 1, 1], [], []>} : vector<8x8xbf16>, vector<8x128xbf16>, vector<8x128xf32> -> vector<8x128xf32>
    %52 = arith.addf %31, %51 : vector<8x128xf32>
    %53 = vector.extract_strided_slice %28 {offsets = [0, 8], sizes = [8, 8], strides = [1, 1]} : vector<8x128xf32> to vector<8x8xf32>
    %54 = vector.extract_strided_slice %29 {offsets = [0, 8], sizes = [8, 8], strides = [1, 1]} : vector<8x128xf32> to vector<8x8xf32>
    %cst_27 = arith.constant dense<0.000000e+00> : vector<8x8xf32>
    %55 = tpu.matmul %53, %54, %cst_27 {dimension_numbers = #tpu.dot_dimension_numbers<[1], [1], [0], [0], [0, 0, 1, 0], [], []>} : vector<8x8xf32>, vector<8x8xf32>, vector<8x8xf32> -> vector<8x8xf32>
    %cst_28 = arith.constant 0.353553385 : f32
    %56 = vector.broadcast %cst_28 : f32 to vector<8x8xf32>
    %57 = arith.mulf %55, %56 : vector<8x8xf32>
    %cst_29 = arith.constant dense<0xFF800000> : vector<8xf32>
    %58 = vector.multi_reduction <maximumf>, %57, %cst_29 [1] : vector<8x8xf32> to vector<8xf32>
    %59 = vector.shape_cast %58 : vector<8xf32> to vector<8x1xf32>
    %60 = vector.broadcast %59 : vector<8x1xf32> to vector<8x8xf32>
    %61 = arith.subf %57, %60 : vector<8x8xf32>
    %62 = math.exp %61 : vector<8x8xf32>
    %cst_30 = arith.constant dense<0.000000e+00> : vector<8xf32>
    %63 = vector.multi_reduction <add>, %62, %cst_30 [1] : vector<8x8xf32> to vector<8xf32>
    %64 = vector.shape_cast %63 : vector<8xf32> to vector<8x1xf32>
    %65 = tpu.reciprocal %64 {approx = true} : vector<8x1xf32> -> vector<8x1xf32>
    %66 = vector.broadcast %65 : vector<8x1xf32> to vector<8x8xf32>
    %67 = arith.mulf %62, %66 : vector<8x8xf32>
    %68 = vector.extract_strided_slice %30 {offsets = [0, 8], sizes = [8, 8], strides = [1, 1]} : vector<8x128xf32> to vector<8x8xf32>
    %cst_31 = arith.constant dense<0.000000e+00> : vector<8x8xf32>
    %69 = tpu.matmul %67, %68, %cst_31 {dimension_numbers = #tpu.dot_dimension_numbers<[1], [0], [0], [1], [0, 0, 1, 1], [], []>} : vector<8x8xf32>, vector<8x8xf32>, vector<8x8xf32> -> vector<8x8xf32>
    %70 = vector.extract_strided_slice %25 {offsets = [8, 0], sizes = [8, 128], strides = [1, 1]} : vector<128x128xbf16> to vector<8x128xbf16>
    %71 = arith.truncf %69 : vector<8x8xf32> to vector<8x8xbf16>
    %cst_32 = arith.constant dense<0.000000e+00> : vector<8x128xf32>
    %72 = tpu.matmul %71, %70, %cst_32 {dimension_numbers = #tpu.dot_dimension_numbers<[1], [0], [0], [1], [0, 0, 1, 1], [], []>} : vector<8x8xbf16>, vector<8x128xbf16>, vector<8x128xf32> -> vector<8x128xf32>
    %73 = arith.addf %52, %72 : vector<8x128xf32>
    %74 = vector.extract_strided_slice %28 {offsets = [0, 16], sizes = [8, 8], strides = [1, 1]} : vector<8x128xf32> to vector<8x8xf32>
    %75 = vector.extract_strided_slice %29 {offsets = [0, 16], sizes = [8, 8], strides = [1, 1]} : vector<8x128xf32> to vector<8x8xf32>
    %cst_33 = arith.constant dense<0.000000e+00> : vector<8x8xf32>
    %76 = tpu.matmul %74, %75, %cst_33 {dimension_numbers = #tpu.dot_dimension_numbers<[1], [1], [0], [0], [0, 0, 1, 0], [], []>} : vector<8x8xf32>, vector<8x8xf32>, vector<8x8xf32> -> vector<8x8xf32>
    %cst_34 = arith.constant 0.353553385 : f32
    %77 = vector.broadcast %cst_34 : f32 to vector<8x8xf32>
    %78 = arith.mulf %76, %77 : vector<8x8xf32>
    %cst_35 = arith.constant dense<0xFF800000> : vector<8xf32>
    %79 = vector.multi_reduction <maximumf>, %78, %cst_35 [1] : vector<8x8xf32> to vector<8xf32>
    %80 = vector.shape_cast %79 : vector<8xf32> to vector<8x1xf32>
    %81 = vector.broadcast %80 : vector<8x1xf32> to vector<8x8xf32>
    %82 = arith.subf %78, %81 : vector<8x8xf32>
    %83 = math.exp %82 : vector<8x8xf32>
    %cst_36 = arith.constant dense<0.000000e+00> : vector<8xf32>
    %84 = vector.multi_reduction <add>, %83, %cst_36 [1] : vector<8x8xf32> to vector<8xf32>
    %85 = vector.shape_cast %84 : vector<8xf32> to vector<8x1xf32>
    %86 = tpu.reciprocal %85 {approx = true} : vector<8x1xf32> -> vector<8x1xf32>
    %87 = vector.broadcast %86 : vector<8x1xf32> to vector<8x8xf32>
    %88 = arith.mulf %83, %87 : vector<8x8xf32>
    %89 = vector.extract_strided_slice %30 {offsets = [0, 16], sizes = [8, 8], strides = [1, 1]} : vector<8x128xf32> to vector<8x8xf32>
    %cst_37 = arith.constant dense<0.000000e+00> : vector<8x8xf32>
    %90 = tpu.matmul %88, %89, %cst_37 {dimension_numbers = #tpu.dot_dimension_numbers<[1], [0], [0], [1], [0, 0, 1, 1], [], []>} : vector<8x8xf32>, vector<8x8xf32>, vector<8x8xf32> -> vector<8x8xf32>
    %91 = vector.extract_strided_slice %25 {offsets = [16, 0], sizes = [8, 128], strides = [1, 1]} : vector<128x128xbf16> to vector<8x128xbf16>
    %92 = arith.truncf %90 : vector<8x8xf32> to vector<8x8xbf16>
    %cst_38 = arith.constant dense<0.000000e+00> : vector<8x128xf32>
    %93 = tpu.matmul %92, %91, %cst_38 {dimension_numbers = #tpu.dot_dimension_numbers<[1], [0], [0], [1], [0, 0, 1, 1], [], []>} : vector<8x8xbf16>, vector<8x128xbf16>, vector<8x128xf32> -> vector<8x128xf32>
    %94 = arith.addf %73, %93 : vector<8x128xf32>
    %95 = vector.extract_strided_slice %28 {offsets = [0, 24], sizes = [8, 8], strides = [1, 1]} : vector<8x128xf32> to vector<8x8xf32>
    %96 = vector.extract_strided_slice %29 {offsets = [0, 24], sizes = [8, 8], strides = [1, 1]} : vector<8x128xf32> to vector<8x8xf32>
    %cst_39 = arith.constant dense<0.000000e+00> : vector<8x8xf32>
    %97 = tpu.matmul %95, %96, %cst_39 {dimension_numbers = #tpu.dot_dimension_numbers<[1], [1], [0], [0], [0, 0, 1, 0], [], []>} : vector<8x8xf32>, vector<8x8xf32>, vector<8x8xf32> -> vector<8x8xf32>
    %cst_40 = arith.constant 0.353553385 : f32
    %98 = vector.broadcast %cst_40 : f32 to vector<8x8xf32>
    %99 = arith.mulf %97, %98 : vector<8x8xf32>
    %cst_41 = arith.constant dense<0xFF800000> : vector<8xf32>
    %100 = vector.multi_reduction <maximumf>, %99, %cst_41 [1] : vector<8x8xf32> to vector<8xf32>
    %101 = vector.shape_cast %100 : vector<8xf32> to vector<8x1xf32>
    %102 = vector.broadcast %101 : vector<8x1xf32> to vector<8x8xf32>
    %103 = arith.subf %99, %102 : vector<8x8xf32>
    %104 = math.exp %103 : vector<8x8xf32>
    %cst_42 = arith.constant dense<0.000000e+00> : vector<8xf32>
    %105 = vector.multi_reduction <add>, %104, %cst_42 [1] : vector<8x8xf32> to vector<8xf32>
    %106 = vector.shape_cast %105 : vector<8xf32> to vector<8x1xf32>
    %107 = tpu.reciprocal %106 {approx = true} : vector<8x1xf32> -> vector<8x1xf32>
    %108 = vector.broadcast %107 : vector<8x1xf32> to vector<8x8xf32>
    %109 = arith.mulf %104, %108 : vector<8x8xf32>
    %110 = vector.extract_strided_slice %30 {offsets = [0, 24], sizes = [8, 8], strides = [1, 1]} : vector<8x128xf32> to vector<8x8xf32>
    %cst_43 = arith.constant dense<0.000000e+00> : vector<8x8xf32>
    %111 = tpu.matmul %109, %110, %cst_43 {dimension_numbers = #tpu.dot_dimension_numbers<[1], [0], [0], [1], [0, 0, 1, 1], [], []>} : vector<8x8xf32>, vector<8x8xf32>, vector<8x8xf32> -> vector<8x8xf32>
    %112 = vector.extract_strided_slice %25 {offsets = [24, 0], sizes = [8, 128], strides = [1, 1]} : vector<128x128xbf16> to vector<8x128xbf16>
    %113 = arith.truncf %111 : vector<8x8xf32> to vector<8x8xbf16>
    %cst_44 = arith.constant dense<0.000000e+00> : vector<8x128xf32>
    %114 = tpu.matmul %113, %112, %cst_44 {dimension_numbers = #tpu.dot_dimension_numbers<[1], [0], [0], [1], [0, 0, 1, 1], [], []>} : vector<8x8xbf16>, vector<8x128xbf16>, vector<8x128xf32> -> vector<8x128xf32>
    %115 = arith.addf %94, %114 : vector<8x128xf32>
    %116 = vector.extract_strided_slice %21 {offsets = [8, 0], sizes = [8, 128], strides = [1, 1]} : vector<16x128xf32> to vector<8x128xf32>
    %117 = vector.extract_strided_slice %22 {offsets = [8, 0], sizes = [8, 128], strides = [1, 1]} : vector<16x128xf32> to vector<8x128xf32>
    %118 = vector.extract_strided_slice %23 {offsets = [8, 0], sizes = [8, 128], strides = [1, 1]} : vector<16x128xf32> to vector<8x128xf32>
    %cst_45 = arith.constant 0.000000e+00 : f32
    %119 = vector.broadcast %cst_45 : f32 to vector<8x128xf32>
    %120 = vector.extract_strided_slice %116 {offsets = [0, 0], sizes = [8, 8], strides = [1, 1]} : vector<8x128xf32> to vector<8x8xf32>
    %121 = vector.extract_strided_slice %117 {offsets = [0, 0], sizes = [8, 8], strides = [1, 1]} : vector<8x128xf32> to vector<8x8xf32>
    %cst_46 = arith.constant dense<0.000000e+00> : vector<8x8xf32>
    %122 = tpu.matmul %120, %121, %cst_46 {dimension_numbers = #tpu.dot_dimension_numbers<[1], [1], [0], [0], [0, 0, 1, 0], [], []>} : vector<8x8xf32>, vector<8x8xf32>, vector<8x8xf32> -> vector<8x8xf32>
    %cst_47 = arith.constant 0.353553385 : f32
    %123 = vector.broadcast %cst_47 : f32 to vector<8x8xf32>
    %124 = arith.mulf %122, %123 : vector<8x8xf32>
    %cst_48 = arith.constant dense<0xFF800000> : vector<8xf32>
    %125 = vector.multi_reduction <maximumf>, %124, %cst_48 [1] : vector<8x8xf32> to vector<8xf32>
    %126 = vector.shape_cast %125 : vector<8xf32> to vector<8x1xf32>
    %127 = vector.broadcast %126 : vector<8x1xf32> to vector<8x8xf32>
    %128 = arith.subf %124, %127 : vector<8x8xf32>
    %129 = math.exp %128 : vector<8x8xf32>
    %cst_49 = arith.constant dense<0.000000e+00> : vector<8xf32>
    %130 = vector.multi_reduction <add>, %129, %cst_49 [1] : vector<8x8xf32> to vector<8xf32>
    %131 = vector.shape_cast %130 : vector<8xf32> to vector<8x1xf32>
    %132 = tpu.reciprocal %131 {approx = true} : vector<8x1xf32> -> vector<8x1xf32>
    %133 = vector.broadcast %132 : vector<8x1xf32> to vector<8x8xf32>
    %134 = arith.mulf %129, %133 : vector<8x8xf32>
    %135 = vector.extract_strided_slice %118 {offsets = [0, 0], sizes = [8, 8], strides = [1, 1]} : vector<8x128xf32> to vector<8x8xf32>
    %cst_50 = arith.constant dense<0.000000e+00> : vector<8x8xf32>
    %136 = tpu.matmul %134, %135, %cst_50 {dimension_numbers = #tpu.dot_dimension_numbers<[1], [0], [0], [1], [0, 0, 1, 1], [], []>} : vector<8x8xf32>, vector<8x8xf32>, vector<8x8xf32> -> vector<8x8xf32>
    %137 = vector.extract_strided_slice %25 {offsets = [0, 0], sizes = [8, 128], strides = [1, 1]} : vector<128x128xbf16> to vector<8x128xbf16>
    %138 = arith.truncf %136 : vector<8x8xf32> to vector<8x8xbf16>
    %cst_51 = arith.constant dense<0.000000e+00> : vector<8x128xf32>
    %139 = tpu.matmul %138, %137, %cst_51 {dimension_numbers = #tpu.dot_dimension_numbers<[1], [0], [0], [1], [0, 0, 1, 1], [], []>} : vector<8x8xbf16>, vector<8x128xbf16>, vector<8x128xf32> -> vector<8x128xf32>
    %140 = arith.addf %119, %139 : vector<8x128xf32>
    %141 = vector.extract_strided_slice %116 {offsets = [0, 8], sizes = [8, 8], strides = [1, 1]} : vector<8x128xf32> to vector<8x8xf32>
    %142 = vector.extract_strided_slice %117 {offsets = [0, 8], sizes = [8, 8], strides = [1, 1]} : vector<8x128xf32> to vector<8x8xf32>
    %cst_52 = arith.constant dense<0.000000e+00> : vector<8x8xf32>
    %143 = tpu.matmul %141, %142, %cst_52 {dimension_numbers = #tpu.dot_dimension_numbers<[1], [1], [0], [0], [0, 0, 1, 0], [], []>} : vector<8x8xf32>, vector<8x8xf32>, vector<8x8xf32> -> vector<8x8xf32>
    %cst_53 = arith.constant 0.353553385 : f32
    %144 = vector.broadcast %cst_53 : f32 to vector<8x8xf32>
    %145 = arith.mulf %143, %144 : vector<8x8xf32>
    %cst_54 = arith.constant dense<0xFF800000> : vector<8xf32>
    %146 = vector.multi_reduction <maximumf>, %145, %cst_54 [1] : vector<8x8xf32> to vector<8xf32>
    %147 = vector.shape_cast %146 : vector<8xf32> to vector<8x1xf32>
    %148 = vector.broadcast %147 : vector<8x1xf32> to vector<8x8xf32>
    %149 = arith.subf %145, %148 : vector<8x8xf32>
    %150 = math.exp %149 : vector<8x8xf32>
    %cst_55 = arith.constant dense<0.000000e+00> : vector<8xf32>
    %151 = vector.multi_reduction <add>, %150, %cst_55 [1] : vector<8x8xf32> to vector<8xf32>
    %152 = vector.shape_cast %151 : vector<8xf32> to vector<8x1xf32>
    %153 = tpu.reciprocal %152 {approx = true} : vector<8x1xf32> -> vector<8x1xf32>
    %154 = vector.broadcast %153 : vector<8x1xf32> to vector<8x8xf32>
    %155 = arith.mulf %150, %154 : vector<8x8xf32>
    %156 = vector.extract_strided_slice %118 {offsets = [0, 8], sizes = [8, 8], strides = [1, 1]} : vector<8x128xf32> to vector<8x8xf32>
    %cst_56 = arith.constant dense<0.000000e+00> : vector<8x8xf32>
    %157 = tpu.matmul %155, %156, %cst_56 {dimension_numbers = #tpu.dot_dimension_numbers<[1], [0], [0], [1], [0, 0, 1, 1], [], []>} : vector<8x8xf32>, vector<8x8xf32>, vector<8x8xf32> -> vector<8x8xf32>
    %158 = vector.extract_strided_slice %25 {offsets = [8, 0], sizes = [8, 128], strides = [1, 1]} : vector<128x128xbf16> to vector<8x128xbf16>
    %159 = arith.truncf %157 : vector<8x8xf32> to vector<8x8xbf16>
    %cst_57 = arith.constant dense<0.000000e+00> : vector<8x128xf32>
    %160 = tpu.matmul %159, %158, %cst_57 {dimension_numbers = #tpu.dot_dimension_numbers<[1], [0], [0], [1], [0, 0, 1, 1], [], []>} : vector<8x8xbf16>, vector<8x128xbf16>, vector<8x128xf32> -> vector<8x128xf32>
    %161 = arith.addf %140, %160 : vector<8x128xf32>
    %162 = vector.extract_strided_slice %116 {offsets = [0, 16], sizes = [8, 8], strides = [1, 1]} : vector<8x128xf32> to vector<8x8xf32>
    %163 = vector.extract_strided_slice %117 {offsets = [0, 16], sizes = [8, 8], strides = [1, 1]} : vector<8x128xf32> to vector<8x8xf32>
    %cst_58 = arith.constant dense<0.000000e+00> : vector<8x8xf32>
    %164 = tpu.matmul %162, %163, %cst_58 {dimension_numbers = #tpu.dot_dimension_numbers<[1], [1], [0], [0], [0, 0, 1, 0], [], []>} : vector<8x8xf32>, vector<8x8xf32>, vector<8x8xf32> -> vector<8x8xf32>
    %cst_59 = arith.constant 0.353553385 : f32
    %165 = vector.broadcast %cst_59 : f32 to vector<8x8xf32>
    %166 = arith.mulf %164, %165 : vector<8x8xf32>
    %cst_60 = arith.constant dense<0xFF800000> : vector<8xf32>
    %167 = vector.multi_reduction <maximumf>, %166, %cst_60 [1] : vector<8x8xf32> to vector<8xf32>
    %168 = vector.shape_cast %167 : vector<8xf32> to vector<8x1xf32>
    %169 = vector.broadcast %168 : vector<8x1xf32> to vector<8x8xf32>
    %170 = arith.subf %166, %169 : vector<8x8xf32>
    %171 = math.exp %170 : vector<8x8xf32>
    %cst_61 = arith.constant dense<0.000000e+00> : vector<8xf32>
    %172 = vector.multi_reduction <add>, %171, %cst_61 [1] : vector<8x8xf32> to vector<8xf32>
    %173 = vector.shape_cast %172 : vector<8xf32> to vector<8x1xf32>
    %174 = tpu.reciprocal %173 {approx = true} : vector<8x1xf32> -> vector<8x1xf32>
    %175 = vector.broadcast %174 : vector<8x1xf32> to vector<8x8xf32>
    %176 = arith.mulf %171, %175 : vector<8x8xf32>
    %177 = vector.extract_strided_slice %118 {offsets = [0, 16], sizes = [8, 8], strides = [1, 1]} : vector<8x128xf32> to vector<8x8xf32>
    %cst_62 = arith.constant dense<0.000000e+00> : vector<8x8xf32>
    %178 = tpu.matmul %176, %177, %cst_62 {dimension_numbers = #tpu.dot_dimension_numbers<[1], [0], [0], [1], [0, 0, 1, 1], [], []>} : vector<8x8xf32>, vector<8x8xf32>, vector<8x8xf32> -> vector<8x8xf32>
    %179 = vector.extract_strided_slice %25 {offsets = [16, 0], sizes = [8, 128], strides = [1, 1]} : vector<128x128xbf16> to vector<8x128xbf16>
    %180 = arith.truncf %178 : vector<8x8xf32> to vector<8x8xbf16>
    %cst_63 = arith.constant dense<0.000000e+00> : vector<8x128xf32>
    %181 = tpu.matmul %180, %179, %cst_63 {dimension_numbers = #tpu.dot_dimension_numbers<[1], [0], [0], [1], [0, 0, 1, 1], [], []>} : vector<8x8xbf16>, vector<8x128xbf16>, vector<8x128xf32> -> vector<8x128xf32>
    %182 = arith.addf %161, %181 : vector<8x128xf32>
    %183 = vector.extract_strided_slice %116 {offsets = [0, 24], sizes = [8, 8], strides = [1, 1]} : vector<8x128xf32> to vector<8x8xf32>
    %184 = vector.extract_strided_slice %117 {offsets = [0, 24], sizes = [8, 8], strides = [1, 1]} : vector<8x128xf32> to vector<8x8xf32>
    %cst_64 = arith.constant dense<0.000000e+00> : vector<8x8xf32>
    %185 = tpu.matmul %183, %184, %cst_64 {dimension_numbers = #tpu.dot_dimension_numbers<[1], [1], [0], [0], [0, 0, 1, 0], [], []>} : vector<8x8xf32>, vector<8x8xf32>, vector<8x8xf32> -> vector<8x8xf32>
    %cst_65 = arith.constant 0.353553385 : f32
    %186 = vector.broadcast %cst_65 : f32 to vector<8x8xf32>
    %187 = arith.mulf %185, %186 : vector<8x8xf32>
    %cst_66 = arith.constant dense<0xFF800000> : vector<8xf32>
    %188 = vector.multi_reduction <maximumf>, %187, %cst_66 [1] : vector<8x8xf32> to vector<8xf32>
    %189 = vector.shape_cast %188 : vector<8xf32> to vector<8x1xf32>
    %190 = vector.broadcast %189 : vector<8x1xf32> to vector<8x8xf32>
    %191 = arith.subf %187, %190 : vector<8x8xf32>
    %192 = math.exp %191 : vector<8x8xf32>
    %cst_67 = arith.constant dense<0.000000e+00> : vector<8xf32>
    %193 = vector.multi_reduction <add>, %192, %cst_67 [1] : vector<8x8xf32> to vector<8xf32>
    %194 = vector.shape_cast %193 : vector<8xf32> to vector<8x1xf32>
    %195 = tpu.reciprocal %194 {approx = true} : vector<8x1xf32> -> vector<8x1xf32>
    %196 = vector.broadcast %195 : vector<8x1xf32> to vector<8x8xf32>
    %197 = arith.mulf %192, %196 : vector<8x8xf32>
    %198 = vector.extract_strided_slice %118 {offsets = [0, 24], sizes = [8, 8], strides = [1, 1]} : vector<8x128xf32> to vector<8x8xf32>
    %cst_68 = arith.constant dense<0.000000e+00> : vector<8x8xf32>
    %199 = tpu.matmul %197, %198, %cst_68 {dimension_numbers = #tpu.dot_dimension_numbers<[1], [0], [0], [1], [0, 0, 1, 1], [], []>} : vector<8x8xf32>, vector<8x8xf32>, vector<8x8xf32> -> vector<8x8xf32>
    %200 = vector.extract_strided_slice %25 {offsets = [24, 0], sizes = [8, 128], strides = [1, 1]} : vector<128x128xbf16> to vector<8x128xbf16>
    %201 = arith.truncf %199 : vector<8x8xf32> to vector<8x8xbf16>
    %cst_69 = arith.constant dense<0.000000e+00> : vector<8x128xf32>
    %202 = tpu.matmul %201, %200, %cst_69 {dimension_numbers = #tpu.dot_dimension_numbers<[1], [0], [0], [1], [0, 0, 1, 1], [], []>} : vector<8x8xbf16>, vector<8x128xbf16>, vector<8x128xf32> -> vector<8x128xf32>
    %203 = arith.addf %182, %202 : vector<8x128xf32>
    %204 = tpu.concatenate %115, %203 in 0 : vector<8x128xf32>, vector<8x128xf32> -> vector<16x128xf32>
    %205 = vector.broadcast %27 : vector<1x128xf32> to vector<16x128xf32>
    %206 = arith.addf %204, %205 : vector<16x128xf32>
    %207 = arith.addf %3, %206 : vector<16x128xf32>
    %cst_70 = arith.constant dense<0.000000e+00> : vector<16xf32>
    %208 = vector.multi_reduction <add>, %207, %cst_70 [1] : vector<16x128xf32> to vector<16xf32>
    %209 = vector.shape_cast %208 : vector<16xf32> to vector<16x1xf32>
    %cst_71 = arith.constant 3.125000e-02 : f32
    %210 = vector.broadcast %cst_71 : f32 to vector<16x1xf32>
    %211 = arith.mulf %209, %210 : vector<16x1xf32>
    %212 = vector.broadcast %211 : vector<16x1xf32> to vector<16x128xf32>
    %213 = arith.subf %207, %212 : vector<16x128xf32>
    %214 = vector.broadcast %8 : vector<1x128xf32> to vector<16x128xf32>
    %215 = arith.mulf %213, %214 : vector<16x128xf32>
    %216 = arith.mulf %215, %215 : vector<16x128xf32>
    %cst_72 = arith.constant dense<0.000000e+00> : vector<16xf32>
    %217 = vector.multi_reduction <add>, %216, %cst_72 [1] : vector<16x128xf32> to vector<16xf32>
    %218 = vector.shape_cast %217 : vector<16xf32> to vector<16x1xf32>
    %cst_73 = arith.constant 3.125000e-02 : f32
    %219 = vector.broadcast %cst_73 : f32 to vector<16x1xf32>
    %220 = arith.mulf %218, %219 : vector<16x1xf32>
    %cst_74 = arith.constant 9.99999974E-6 : f32
    %221 = vector.broadcast %cst_74 : f32 to vector<16x1xf32>
    %222 = arith.addf %220, %221 : vector<16x1xf32>
    %223 = math.rsqrt %222 : vector<16x1xf32>
    %224 = vector.broadcast %223 : vector<16x1xf32> to vector<16x128xf32>
    %225 = arith.mulf %215, %224 : vector<16x128xf32>
    %226 = vector.extract_strided_slice %10 {offsets = [0, 0], sizes = [1, 128], strides = [1, 1]} : vector<3x128xf32> to vector<1x128xf32>
    %227 = vector.broadcast %226 : vector<1x128xf32> to vector<16x128xf32>
    %228 = arith.mulf %225, %227 : vector<16x128xf32>
    %229 = vector.extract_strided_slice %12 {offsets = [0, 0], sizes = [1, 128], strides = [1, 1]} : vector<3x128xf32> to vector<1x128xf32>
    %230 = vector.broadcast %229 : vector<1x128xf32> to vector<16x128xf32>
    %231 = arith.addf %228, %230 : vector<16x128xf32>
    %c0_75 = arith.constant 0 : index
    %c0_76 = arith.constant 0 : index
    %c0_77 = arith.constant 0 : index
    %232 = vector.load %arg7[%c0_75, %c0_76, %c0_77] : memref<1x128x128xbf16, #tpu.memory_space<vmem>>, vector<1x128x128xbf16>
    %233 = vector.shape_cast %232 : vector<1x128x128xbf16> to vector<128x128xbf16>
    %234 = arith.truncf %231 : vector<16x128xf32> to vector<16x128xbf16>
    %cst_78 = arith.constant dense<0.000000e+00> : vector<16x128xf32>
    %235 = tpu.matmul %234, %233, %cst_78 {dimension_numbers = #tpu.dot_dimension_numbers<[1], [0], [0], [1], [0, 0, 1, 1], [], []>} : vector<16x128xbf16>, vector<128x128xbf16>, vector<16x128xf32> -> vector<16x128xf32>
    %c0_79 = arith.constant 0 : index
    %c0_80 = arith.constant 0 : index
    %c0_81 = arith.constant 0 : index
    %236 = vector.load %arg8[%c0_79, %c0_80, %c0_81] : memref<1x1x128xf32, #tpu.memory_space<vmem>>, vector<1x1x128xf32>
    %237 = vector.shape_cast %236 : vector<1x1x128xf32> to vector<1x128xf32>
    %238 = vector.broadcast %237 : vector<1x128xf32> to vector<16x128xf32>
    %239 = arith.addf %235, %238 : vector<16x128xf32>
    %c0_82 = arith.constant 0 : index
    %c0_83 = arith.constant 0 : index
    %240 = vector.load %arg2[%c0_82, %c0_83] : memref<32x128xbf16, #tpu.memory_space<vmem>>, vector<32x128xbf16>
    %c0_84 = arith.constant 0 : index
    %c0_85 = arith.constant 0 : index
    %c0_86 = arith.constant 0 : index
    %241 = vector.load %arg9[%c0_84, %c0_85, %c0_86] : memref<1x128x256xbf16, #tpu.memory_space<vmem>>, vector<1x128x256xbf16>
    %242 = vector.shape_cast %241 : vector<1x128x256xbf16> to vector<128x256xbf16>
    %cst_87 = arith.constant dense<0.000000e+00> : vector<32x256xf32>
    %243 = tpu.matmul %240, %242, %cst_87 {dimension_numbers = #tpu.dot_dimension_numbers<[1], [0], [0], [1], [0, 0, 1, 1], [], []>} : vector<32x128xbf16>, vector<128x256xbf16>, vector<32x256xf32> -> vector<32x256xf32>
    %c0_88 = arith.constant 0 : index
    %c0_89 = arith.constant 0 : index
    %c0_90 = arith.constant 0 : index
    %244 = vector.load %arg10[%c0_88, %c0_89, %c0_90] : memref<1x1x256xf32, #tpu.memory_space<vmem>>, vector<1x1x256xf32>
    %245 = vector.shape_cast %244 : vector<1x1x256xf32> to vector<1x256xf32>
    %246 = vector.broadcast %245 : vector<1x256xf32> to vector<32x256xf32>
    %247 = arith.addf %243, %246 : vector<32x256xf32>
    %248 = vector.extract_strided_slice %247 {offsets = [0, 0], sizes = [32, 128], strides = [1, 1]} : vector<32x256xf32> to vector<32x128xf32>
    %249 = vector.extract_strided_slice %247 {offsets = [0, 128], sizes = [32, 128], strides = [1, 1]} : vector<32x256xf32> to vector<32x128xf32>
    %c0_91 = arith.constant 0 : index
    %c0_92 = arith.constant 0 : index
    %c0_93 = arith.constant 0 : index
    %250 = vector.load %arg11[%c0_91, %c0_92, %c0_93] : memref<1x128x128xbf16, #tpu.memory_space<vmem>>, vector<1x128x128xbf16>
    %251 = vector.shape_cast %250 : vector<1x128x128xbf16> to vector<128x128xbf16>
    %c0_94 = arith.constant 0 : index
    %c0_95 = arith.constant 0 : index
    %c0_96 = arith.constant 0 : index
    %252 = vector.load %arg12[%c0_94, %c0_95, %c0_96] : memref<1x1x128xf32, #tpu.memory_space<vmem>>, vector<1x1x128xf32>
    %253 = vector.shape_cast %252 : vector<1x1x128xf32> to vector<1x128xf32>
    %254 = vector.extract_strided_slice %239 {offsets = [0, 0], sizes = [8, 128], strides = [1, 1]} : vector<16x128xf32> to vector<8x128xf32>
    %255 = vector.extract_strided_slice %248 {offsets = [0, 0], sizes = [16, 128], strides = [1, 1]} : vector<32x128xf32> to vector<16x128xf32>
    %256 = vector.extract_strided_slice %249 {offsets = [0, 0], sizes = [16, 128], strides = [1, 1]} : vector<32x128xf32> to vector<16x128xf32>
    %cst_97 = arith.constant 0.000000e+00 : f32
    %257 = vector.broadcast %cst_97 : f32 to vector<8x128xf32>
    %258 = vector.extract_strided_slice %254 {offsets = [0, 0], sizes = [8, 8], strides = [1, 1]} : vector<8x128xf32> to vector<8x8xf32>
    %259 = vector.extract_strided_slice %255 {offsets = [0, 0], sizes = [16, 8], strides = [1, 1]} : vector<16x128xf32> to vector<16x8xf32>
    %cst_98 = arith.constant dense<0.000000e+00> : vector<8x16xf32>
    %260 = tpu.matmul %258, %259, %cst_98 {dimension_numbers = #tpu.dot_dimension_numbers<[1], [1], [0], [0], [0, 0, 1, 0], [], []>} : vector<8x8xf32>, vector<16x8xf32>, vector<8x16xf32> -> vector<8x16xf32>
    %cst_99 = arith.constant 0.353553385 : f32
    %261 = vector.broadcast %cst_99 : f32 to vector<8x16xf32>
    %262 = arith.mulf %260, %261 : vector<8x16xf32>
    %cst_100 = arith.constant dense<0xFF800000> : vector<8xf32>
    %263 = vector.multi_reduction <maximumf>, %262, %cst_100 [1] : vector<8x16xf32> to vector<8xf32>
    %264 = vector.shape_cast %263 : vector<8xf32> to vector<8x1xf32>
    %265 = vector.broadcast %264 : vector<8x1xf32> to vector<8x16xf32>
    %266 = arith.subf %262, %265 : vector<8x16xf32>
    %267 = math.exp %266 : vector<8x16xf32>
    %cst_101 = arith.constant dense<0.000000e+00> : vector<8xf32>
    %268 = vector.multi_reduction <add>, %267, %cst_101 [1] : vector<8x16xf32> to vector<8xf32>
    %269 = vector.shape_cast %268 : vector<8xf32> to vector<8x1xf32>
    %270 = tpu.reciprocal %269 {approx = true} : vector<8x1xf32> -> vector<8x1xf32>
    %271 = vector.broadcast %270 : vector<8x1xf32> to vector<8x16xf32>
    %272 = arith.mulf %267, %271 : vector<8x16xf32>
    %273 = vector.extract_strided_slice %256 {offsets = [0, 0], sizes = [16, 8], strides = [1, 1]} : vector<16x128xf32> to vector<16x8xf32>
    %cst_102 = arith.constant dense<0.000000e+00> : vector<8x8xf32>
    %274 = tpu.matmul %272, %273, %cst_102 {dimension_numbers = #tpu.dot_dimension_numbers<[1], [0], [0], [1], [0, 0, 1, 1], [], []>} : vector<8x16xf32>, vector<16x8xf32>, vector<8x8xf32> -> vector<8x8xf32>
    %275 = vector.extract_strided_slice %251 {offsets = [0, 0], sizes = [8, 128], strides = [1, 1]} : vector<128x128xbf16> to vector<8x128xbf16>
    %276 = arith.truncf %274 : vector<8x8xf32> to vector<8x8xbf16>
    %cst_103 = arith.constant dense<0.000000e+00> : vector<8x128xf32>
    %277 = tpu.matmul %276, %275, %cst_103 {dimension_numbers = #tpu.dot_dimension_numbers<[1], [0], [0], [1], [0, 0, 1, 1], [], []>} : vector<8x8xbf16>, vector<8x128xbf16>, vector<8x128xf32> -> vector<8x128xf32>
    %278 = arith.addf %257, %277 : vector<8x128xf32>
    %279 = vector.extract_strided_slice %254 {offsets = [0, 8], sizes = [8, 8], strides = [1, 1]} : vector<8x128xf32> to vector<8x8xf32>
    %280 = vector.extract_strided_slice %255 {offsets = [0, 8], sizes = [16, 8], strides = [1, 1]} : vector<16x128xf32> to vector<16x8xf32>
    %cst_104 = arith.constant dense<0.000000e+00> : vector<8x16xf32>
    %281 = tpu.matmul %279, %280, %cst_104 {dimension_numbers = #tpu.dot_dimension_numbers<[1], [1], [0], [0], [0, 0, 1, 0], [], []>} : vector<8x8xf32>, vector<16x8xf32>, vector<8x16xf32> -> vector<8x16xf32>
    %cst_105 = arith.constant 0.353553385 : f32
    %282 = vector.broadcast %cst_105 : f32 to vector<8x16xf32>
    %283 = arith.mulf %281, %282 : vector<8x16xf32>
    %cst_106 = arith.constant dense<0xFF800000> : vector<8xf32>
    %284 = vector.multi_reduction <maximumf>, %283, %cst_106 [1] : vector<8x16xf32> to vector<8xf32>
    %285 = vector.shape_cast %284 : vector<8xf32> to vector<8x1xf32>
    %286 = vector.broadcast %285 : vector<8x1xf32> to vector<8x16xf32>
    %287 = arith.subf %283, %286 : vector<8x16xf32>
    %288 = math.exp %287 : vector<8x16xf32>
    %cst_107 = arith.constant dense<0.000000e+00> : vector<8xf32>
    %289 = vector.multi_reduction <add>, %288, %cst_107 [1] : vector<8x16xf32> to vector<8xf32>
    %290 = vector.shape_cast %289 : vector<8xf32> to vector<8x1xf32>
    %291 = tpu.reciprocal %290 {approx = true} : vector<8x1xf32> -> vector<8x1xf32>
    %292 = vector.broadcast %291 : vector<8x1xf32> to vector<8x16xf32>
    %293 = arith.mulf %288, %292 : vector<8x16xf32>
    %294 = vector.extract_strided_slice %256 {offsets = [0, 8], sizes = [16, 8], strides = [1, 1]} : vector<16x128xf32> to vector<16x8xf32>
    %cst_108 = arith.constant dense<0.000000e+00> : vector<8x8xf32>
    %295 = tpu.matmul %293, %294, %cst_108 {dimension_numbers = #tpu.dot_dimension_numbers<[1], [0], [0], [1], [0, 0, 1, 1], [], []>} : vector<8x16xf32>, vector<16x8xf32>, vector<8x8xf32> -> vector<8x8xf32>
    %296 = vector.extract_strided_slice %251 {offsets = [8, 0], sizes = [8, 128], strides = [1, 1]} : vector<128x128xbf16> to vector<8x128xbf16>
    %297 = arith.truncf %295 : vector<8x8xf32> to vector<8x8xbf16>
    %cst_109 = arith.constant dense<0.000000e+00> : vector<8x128xf32>
    %298 = tpu.matmul %297, %296, %cst_109 {dimension_numbers = #tpu.dot_dimension_numbers<[1], [0], [0], [1], [0, 0, 1, 1], [], []>} : vector<8x8xbf16>, vector<8x128xbf16>, vector<8x128xf32> -> vector<8x128xf32>
    %299 = arith.addf %278, %298 : vector<8x128xf32>
    %300 = vector.extract_strided_slice %254 {offsets = [0, 16], sizes = [8, 8], strides = [1, 1]} : vector<8x128xf32> to vector<8x8xf32>
    %301 = vector.extract_strided_slice %255 {offsets = [0, 16], sizes = [16, 8], strides = [1, 1]} : vector<16x128xf32> to vector<16x8xf32>
    %cst_110 = arith.constant dense<0.000000e+00> : vector<8x16xf32>
    %302 = tpu.matmul %300, %301, %cst_110 {dimension_numbers = #tpu.dot_dimension_numbers<[1], [1], [0], [0], [0, 0, 1, 0], [], []>} : vector<8x8xf32>, vector<16x8xf32>, vector<8x16xf32> -> vector<8x16xf32>
    %cst_111 = arith.constant 0.353553385 : f32
    %303 = vector.broadcast %cst_111 : f32 to vector<8x16xf32>
    %304 = arith.mulf %302, %303 : vector<8x16xf32>
    %cst_112 = arith.constant dense<0xFF800000> : vector<8xf32>
    %305 = vector.multi_reduction <maximumf>, %304, %cst_112 [1] : vector<8x16xf32> to vector<8xf32>
    %306 = vector.shape_cast %305 : vector<8xf32> to vector<8x1xf32>
    %307 = vector.broadcast %306 : vector<8x1xf32> to vector<8x16xf32>
    %308 = arith.subf %304, %307 : vector<8x16xf32>
    %309 = math.exp %308 : vector<8x16xf32>
    %cst_113 = arith.constant dense<0.000000e+00> : vector<8xf32>
    %310 = vector.multi_reduction <add>, %309, %cst_113 [1] : vector<8x16xf32> to vector<8xf32>
    %311 = vector.shape_cast %310 : vector<8xf32> to vector<8x1xf32>
    %312 = tpu.reciprocal %311 {approx = true} : vector<8x1xf32> -> vector<8x1xf32>
    %313 = vector.broadcast %312 : vector<8x1xf32> to vector<8x16xf32>
    %314 = arith.mulf %309, %313 : vector<8x16xf32>
    %315 = vector.extract_strided_slice %256 {offsets = [0, 16], sizes = [16, 8], strides = [1, 1]} : vector<16x128xf32> to vector<16x8xf32>
    %cst_114 = arith.constant dense<0.000000e+00> : vector<8x8xf32>
    %316 = tpu.matmul %314, %315, %cst_114 {dimension_numbers = #tpu.dot_dimension_numbers<[1], [0], [0], [1], [0, 0, 1, 1], [], []>} : vector<8x16xf32>, vector<16x8xf32>, vector<8x8xf32> -> vector<8x8xf32>
    %317 = vector.extract_strided_slice %251 {offsets = [16, 0], sizes = [8, 128], strides = [1, 1]} : vector<128x128xbf16> to vector<8x128xbf16>
    %318 = arith.truncf %316 : vector<8x8xf32> to vector<8x8xbf16>
    %cst_115 = arith.constant dense<0.000000e+00> : vector<8x128xf32>
    %319 = tpu.matmul %318, %317, %cst_115 {dimension_numbers = #tpu.dot_dimension_numbers<[1], [0], [0], [1], [0, 0, 1, 1], [], []>} : vector<8x8xbf16>, vector<8x128xbf16>, vector<8x128xf32> -> vector<8x128xf32>
    %320 = arith.addf %299, %319 : vector<8x128xf32>
    %321 = vector.extract_strided_slice %254 {offsets = [0, 24], sizes = [8, 8], strides = [1, 1]} : vector<8x128xf32> to vector<8x8xf32>
    %322 = vector.extract_strided_slice %255 {offsets = [0, 24], sizes = [16, 8], strides = [1, 1]} : vector<16x128xf32> to vector<16x8xf32>
    %cst_116 = arith.constant dense<0.000000e+00> : vector<8x16xf32>
    %323 = tpu.matmul %321, %322, %cst_116 {dimension_numbers = #tpu.dot_dimension_numbers<[1], [1], [0], [0], [0, 0, 1, 0], [], []>} : vector<8x8xf32>, vector<16x8xf32>, vector<8x16xf32> -> vector<8x16xf32>
    %cst_117 = arith.constant 0.353553385 : f32
    %324 = vector.broadcast %cst_117 : f32 to vector<8x16xf32>
    %325 = arith.mulf %323, %324 : vector<8x16xf32>
    %cst_118 = arith.constant dense<0xFF800000> : vector<8xf32>
    %326 = vector.multi_reduction <maximumf>, %325, %cst_118 [1] : vector<8x16xf32> to vector<8xf32>
    %327 = vector.shape_cast %326 : vector<8xf32> to vector<8x1xf32>
    %328 = vector.broadcast %327 : vector<8x1xf32> to vector<8x16xf32>
    %329 = arith.subf %325, %328 : vector<8x16xf32>
    %330 = math.exp %329 : vector<8x16xf32>
    %cst_119 = arith.constant dense<0.000000e+00> : vector<8xf32>
    %331 = vector.multi_reduction <add>, %330, %cst_119 [1] : vector<8x16xf32> to vector<8xf32>
    %332 = vector.shape_cast %331 : vector<8xf32> to vector<8x1xf32>
    %333 = tpu.reciprocal %332 {approx = true} : vector<8x1xf32> -> vector<8x1xf32>
    %334 = vector.broadcast %333 : vector<8x1xf32> to vector<8x16xf32>
    %335 = arith.mulf %330, %334 : vector<8x16xf32>
    %336 = vector.extract_strided_slice %256 {offsets = [0, 24], sizes = [16, 8], strides = [1, 1]} : vector<16x128xf32> to vector<16x8xf32>
    %cst_120 = arith.constant dense<0.000000e+00> : vector<8x8xf32>
    %337 = tpu.matmul %335, %336, %cst_120 {dimension_numbers = #tpu.dot_dimension_numbers<[1], [0], [0], [1], [0, 0, 1, 1], [], []>} : vector<8x16xf32>, vector<16x8xf32>, vector<8x8xf32> -> vector<8x8xf32>
    %338 = vector.extract_strided_slice %251 {offsets = [24, 0], sizes = [8, 128], strides = [1, 1]} : vector<128x128xbf16> to vector<8x128xbf16>
    %339 = arith.truncf %337 : vector<8x8xf32> to vector<8x8xbf16>
    %cst_121 = arith.constant dense<0.000000e+00> : vector<8x128xf32>
    %340 = tpu.matmul %339, %338, %cst_121 {dimension_numbers = #tpu.dot_dimension_numbers<[1], [0], [0], [1], [0, 0, 1, 1], [], []>} : vector<8x8xbf16>, vector<8x128xbf16>, vector<8x128xf32> -> vector<8x128xf32>
    %341 = arith.addf %320, %340 : vector<8x128xf32>
    %342 = vector.extract_strided_slice %239 {offsets = [8, 0], sizes = [8, 128], strides = [1, 1]} : vector<16x128xf32> to vector<8x128xf32>
    %343 = vector.extract_strided_slice %248 {offsets = [16, 0], sizes = [16, 128], strides = [1, 1]} : vector<32x128xf32> to vector<16x128xf32>
    %344 = vector.extract_strided_slice %249 {offsets = [16, 0], sizes = [16, 128], strides = [1, 1]} : vector<32x128xf32> to vector<16x128xf32>
    %cst_122 = arith.constant 0.000000e+00 : f32
    %345 = vector.broadcast %cst_122 : f32 to vector<8x128xf32>
    %346 = vector.extract_strided_slice %342 {offsets = [0, 0], sizes = [8, 8], strides = [1, 1]} : vector<8x128xf32> to vector<8x8xf32>
    %347 = vector.extract_strided_slice %343 {offsets = [0, 0], sizes = [16, 8], strides = [1, 1]} : vector<16x128xf32> to vector<16x8xf32>
    %cst_123 = arith.constant dense<0.000000e+00> : vector<8x16xf32>
    %348 = tpu.matmul %346, %347, %cst_123 {dimension_numbers = #tpu.dot_dimension_numbers<[1], [1], [0], [0], [0, 0, 1, 0], [], []>} : vector<8x8xf32>, vector<16x8xf32>, vector<8x16xf32> -> vector<8x16xf32>
    %cst_124 = arith.constant 0.353553385 : f32
    %349 = vector.broadcast %cst_124 : f32 to vector<8x16xf32>
    %350 = arith.mulf %348, %349 : vector<8x16xf32>
    %cst_125 = arith.constant dense<0xFF800000> : vector<8xf32>
    %351 = vector.multi_reduction <maximumf>, %350, %cst_125 [1] : vector<8x16xf32> to vector<8xf32>
    %352 = vector.shape_cast %351 : vector<8xf32> to vector<8x1xf32>
    %353 = vector.broadcast %352 : vector<8x1xf32> to vector<8x16xf32>
    %354 = arith.subf %350, %353 : vector<8x16xf32>
    %355 = math.exp %354 : vector<8x16xf32>
    %cst_126 = arith.constant dense<0.000000e+00> : vector<8xf32>
    %356 = vector.multi_reduction <add>, %355, %cst_126 [1] : vector<8x16xf32> to vector<8xf32>
    %357 = vector.shape_cast %356 : vector<8xf32> to vector<8x1xf32>
    %358 = tpu.reciprocal %357 {approx = true} : vector<8x1xf32> -> vector<8x1xf32>
    %359 = vector.broadcast %358 : vector<8x1xf32> to vector<8x16xf32>
    %360 = arith.mulf %355, %359 : vector<8x16xf32>
    %361 = vector.extract_strided_slice %344 {offsets = [0, 0], sizes = [16, 8], strides = [1, 1]} : vector<16x128xf32> to vector<16x8xf32>
    %cst_127 = arith.constant dense<0.000000e+00> : vector<8x8xf32>
    %362 = tpu.matmul %360, %361, %cst_127 {dimension_numbers = #tpu.dot_dimension_numbers<[1], [0], [0], [1], [0, 0, 1, 1], [], []>} : vector<8x16xf32>, vector<16x8xf32>, vector<8x8xf32> -> vector<8x8xf32>
    %363 = vector.extract_strided_slice %251 {offsets = [0, 0], sizes = [8, 128], strides = [1, 1]} : vector<128x128xbf16> to vector<8x128xbf16>
    %364 = arith.truncf %362 : vector<8x8xf32> to vector<8x8xbf16>
    %cst_128 = arith.constant dense<0.000000e+00> : vector<8x128xf32>
    %365 = tpu.matmul %364, %363, %cst_128 {dimension_numbers = #tpu.dot_dimension_numbers<[1], [0], [0], [1], [0, 0, 1, 1], [], []>} : vector<8x8xbf16>, vector<8x128xbf16>, vector<8x128xf32> -> vector<8x128xf32>
    %366 = arith.addf %345, %365 : vector<8x128xf32>
    %367 = vector.extract_strided_slice %342 {offsets = [0, 8], sizes = [8, 8], strides = [1, 1]} : vector<8x128xf32> to vector<8x8xf32>
    %368 = vector.extract_strided_slice %343 {offsets = [0, 8], sizes = [16, 8], strides = [1, 1]} : vector<16x128xf32> to vector<16x8xf32>
    %cst_129 = arith.constant dense<0.000000e+00> : vector<8x16xf32>
    %369 = tpu.matmul %367, %368, %cst_129 {dimension_numbers = #tpu.dot_dimension_numbers<[1], [1], [0], [0], [0, 0, 1, 0], [], []>} : vector<8x8xf32>, vector<16x8xf32>, vector<8x16xf32> -> vector<8x16xf32>
    %cst_130 = arith.constant 0.353553385 : f32
    %370 = vector.broadcast %cst_130 : f32 to vector<8x16xf32>
    %371 = arith.mulf %369, %370 : vector<8x16xf32>
    %cst_131 = arith.constant dense<0xFF800000> : vector<8xf32>
    %372 = vector.multi_reduction <maximumf>, %371, %cst_131 [1] : vector<8x16xf32> to vector<8xf32>
    %373 = vector.shape_cast %372 : vector<8xf32> to vector<8x1xf32>
    %374 = vector.broadcast %373 : vector<8x1xf32> to vector<8x16xf32>
    %375 = arith.subf %371, %374 : vector<8x16xf32>
    %376 = math.exp %375 : vector<8x16xf32>
    %cst_132 = arith.constant dense<0.000000e+00> : vector<8xf32>
    %377 = vector.multi_reduction <add>, %376, %cst_132 [1] : vector<8x16xf32> to vector<8xf32>
    %378 = vector.shape_cast %377 : vector<8xf32> to vector<8x1xf32>
    %379 = tpu.reciprocal %378 {approx = true} : vector<8x1xf32> -> vector<8x1xf32>
    %380 = vector.broadcast %379 : vector<8x1xf32> to vector<8x16xf32>
    %381 = arith.mulf %376, %380 : vector<8x16xf32>
    %382 = vector.extract_strided_slice %344 {offsets = [0, 8], sizes = [16, 8], strides = [1, 1]} : vector<16x128xf32> to vector<16x8xf32>
    %cst_133 = arith.constant dense<0.000000e+00> : vector<8x8xf32>
    %383 = tpu.matmul %381, %382, %cst_133 {dimension_numbers = #tpu.dot_dimension_numbers<[1], [0], [0], [1], [0, 0, 1, 1], [], []>} : vector<8x16xf32>, vector<16x8xf32>, vector<8x8xf32> -> vector<8x8xf32>
    %384 = vector.extract_strided_slice %251 {offsets = [8, 0], sizes = [8, 128], strides = [1, 1]} : vector<128x128xbf16> to vector<8x128xbf16>
    %385 = arith.truncf %383 : vector<8x8xf32> to vector<8x8xbf16>
    %cst_134 = arith.constant dense<0.000000e+00> : vector<8x128xf32>
    %386 = tpu.matmul %385, %384, %cst_134 {dimension_numbers = #tpu.dot_dimension_numbers<[1], [0], [0], [1], [0, 0, 1, 1], [], []>} : vector<8x8xbf16>, vector<8x128xbf16>, vector<8x128xf32> -> vector<8x128xf32>
    %387 = arith.addf %366, %386 : vector<8x128xf32>
    %388 = vector.extract_strided_slice %342 {offsets = [0, 16], sizes = [8, 8], strides = [1, 1]} : vector<8x128xf32> to vector<8x8xf32>
    %389 = vector.extract_strided_slice %343 {offsets = [0, 16], sizes = [16, 8], strides = [1, 1]} : vector<16x128xf32> to vector<16x8xf32>
    %cst_135 = arith.constant dense<0.000000e+00> : vector<8x16xf32>
    %390 = tpu.matmul %388, %389, %cst_135 {dimension_numbers = #tpu.dot_dimension_numbers<[1], [1], [0], [0], [0, 0, 1, 0], [], []>} : vector<8x8xf32>, vector<16x8xf32>, vector<8x16xf32> -> vector<8x16xf32>
    %cst_136 = arith.constant 0.353553385 : f32
    %391 = vector.broadcast %cst_136 : f32 to vector<8x16xf32>
    %392 = arith.mulf %390, %391 : vector<8x16xf32>
    %cst_137 = arith.constant dense<0xFF800000> : vector<8xf32>
    %393 = vector.multi_reduction <maximumf>, %392, %cst_137 [1] : vector<8x16xf32> to vector<8xf32>
    %394 = vector.shape_cast %393 : vector<8xf32> to vector<8x1xf32>
    %395 = vector.broadcast %394 : vector<8x1xf32> to vector<8x16xf32>
    %396 = arith.subf %392, %395 : vector<8x16xf32>
    %397 = math.exp %396 : vector<8x16xf32>
    %cst_138 = arith.constant dense<0.000000e+00> : vector<8xf32>
    %398 = vector.multi_reduction <add>, %397, %cst_138 [1] : vector<8x16xf32> to vector<8xf32>
    %399 = vector.shape_cast %398 : vector<8xf32> to vector<8x1xf32>
    %400 = tpu.reciprocal %399 {approx = true} : vector<8x1xf32> -> vector<8x1xf32>
    %401 = vector.broadcast %400 : vector<8x1xf32> to vector<8x16xf32>
    %402 = arith.mulf %397, %401 : vector<8x16xf32>
    %403 = vector.extract_strided_slice %344 {offsets = [0, 16], sizes = [16, 8], strides = [1, 1]} : vector<16x128xf32> to vector<16x8xf32>
    %cst_139 = arith.constant dense<0.000000e+00> : vector<8x8xf32>
    %404 = tpu.matmul %402, %403, %cst_139 {dimension_numbers = #tpu.dot_dimension_numbers<[1], [0], [0], [1], [0, 0, 1, 1], [], []>} : vector<8x16xf32>, vector<16x8xf32>, vector<8x8xf32> -> vector<8x8xf32>
    %405 = vector.extract_strided_slice %251 {offsets = [16, 0], sizes = [8, 128], strides = [1, 1]} : vector<128x128xbf16> to vector<8x128xbf16>
    %406 = arith.truncf %404 : vector<8x8xf32> to vector<8x8xbf16>
    %cst_140 = arith.constant dense<0.000000e+00> : vector<8x128xf32>
    %407 = tpu.matmul %406, %405, %cst_140 {dimension_numbers = #tpu.dot_dimension_numbers<[1], [0], [0], [1], [0, 0, 1, 1], [], []>} : vector<8x8xbf16>, vector<8x128xbf16>, vector<8x128xf32> -> vector<8x128xf32>
    %408 = arith.addf %387, %407 : vector<8x128xf32>
    %409 = vector.extract_strided_slice %342 {offsets = [0, 24], sizes = [8, 8], strides = [1, 1]} : vector<8x128xf32> to vector<8x8xf32>
    %410 = vector.extract_strided_slice %343 {offsets = [0, 24], sizes = [16, 8], strides = [1, 1]} : vector<16x128xf32> to vector<16x8xf32>
    %cst_141 = arith.constant dense<0.000000e+00> : vector<8x16xf32>
    %411 = tpu.matmul %409, %410, %cst_141 {dimension_numbers = #tpu.dot_dimension_numbers<[1], [1], [0], [0], [0, 0, 1, 0], [], []>} : vector<8x8xf32>, vector<16x8xf32>, vector<8x16xf32> -> vector<8x16xf32>
    %cst_142 = arith.constant 0.353553385 : f32
    %412 = vector.broadcast %cst_142 : f32 to vector<8x16xf32>
    %413 = arith.mulf %411, %412 : vector<8x16xf32>
    %cst_143 = arith.constant dense<0xFF800000> : vector<8xf32>
    %414 = vector.multi_reduction <maximumf>, %413, %cst_143 [1] : vector<8x16xf32> to vector<8xf32>
    %415 = vector.shape_cast %414 : vector<8xf32> to vector<8x1xf32>
    %416 = vector.broadcast %415 : vector<8x1xf32> to vector<8x16xf32>
    %417 = arith.subf %413, %416 : vector<8x16xf32>
    %418 = math.exp %417 : vector<8x16xf32>
    %cst_144 = arith.constant dense<0.000000e+00> : vector<8xf32>
    %419 = vector.multi_reduction <add>, %418, %cst_144 [1] : vector<8x16xf32> to vector<8xf32>
    %420 = vector.shape_cast %419 : vector<8xf32> to vector<8x1xf32>
    %421 = tpu.reciprocal %420 {approx = true} : vector<8x1xf32> -> vector<8x1xf32>
    %422 = vector.broadcast %421 : vector<8x1xf32> to vector<8x16xf32>
    %423 = arith.mulf %418, %422 : vector<8x16xf32>
    %424 = vector.extract_strided_slice %344 {offsets = [0, 24], sizes = [16, 8], strides = [1, 1]} : vector<16x128xf32> to vector<16x8xf32>
    %cst_145 = arith.constant dense<0.000000e+00> : vector<8x8xf32>
    %425 = tpu.matmul %423, %424, %cst_145 {dimension_numbers = #tpu.dot_dimension_numbers<[1], [0], [0], [1], [0, 0, 1, 1], [], []>} : vector<8x16xf32>, vector<16x8xf32>, vector<8x8xf32> -> vector<8x8xf32>
    %426 = vector.extract_strided_slice %251 {offsets = [24, 0], sizes = [8, 128], strides = [1, 1]} : vector<128x128xbf16> to vector<8x128xbf16>
    %427 = arith.truncf %425 : vector<8x8xf32> to vector<8x8xbf16>
    %cst_146 = arith.constant dense<0.000000e+00> : vector<8x128xf32>
    %428 = tpu.matmul %427, %426, %cst_146 {dimension_numbers = #tpu.dot_dimension_numbers<[1], [0], [0], [1], [0, 0, 1, 1], [], []>} : vector<8x8xbf16>, vector<8x128xbf16>, vector<8x128xf32> -> vector<8x128xf32>
    %429 = arith.addf %408, %428 : vector<8x128xf32>
    %430 = tpu.concatenate %341, %429 in 0 : vector<8x128xf32>, vector<8x128xf32> -> vector<16x128xf32>
    %431 = vector.broadcast %253 : vector<1x128xf32> to vector<16x128xf32>
    %432 = arith.addf %430, %431 : vector<16x128xf32>
    %433 = arith.addf %231, %432 : vector<16x128xf32>
    %cst_147 = arith.constant dense<0.000000e+00> : vector<16xf32>
    %434 = vector.multi_reduction <add>, %433, %cst_147 [1] : vector<16x128xf32> to vector<16xf32>
    %435 = vector.shape_cast %434 : vector<16xf32> to vector<16x1xf32>
    %cst_148 = arith.constant 3.125000e-02 : f32
    %436 = vector.broadcast %cst_148 : f32 to vector<16x1xf32>
    %437 = arith.mulf %435, %436 : vector<16x1xf32>
    %438 = vector.broadcast %437 : vector<16x1xf32> to vector<16x128xf32>
    %439 = arith.subf %433, %438 : vector<16x128xf32>
    %440 = vector.broadcast %8 : vector<1x128xf32> to vector<16x128xf32>
    %441 = arith.mulf %439, %440 : vector<16x128xf32>
    %442 = arith.mulf %441, %441 : vector<16x128xf32>
    %cst_149 = arith.constant dense<0.000000e+00> : vector<16xf32>
    %443 = vector.multi_reduction <add>, %442, %cst_149 [1] : vector<16x128xf32> to vector<16xf32>
    %444 = vector.shape_cast %443 : vector<16xf32> to vector<16x1xf32>
    %cst_150 = arith.constant 3.125000e-02 : f32
    %445 = vector.broadcast %cst_150 : f32 to vector<16x1xf32>
    %446 = arith.mulf %444, %445 : vector<16x1xf32>
    %cst_151 = arith.constant 9.99999974E-6 : f32
    %447 = vector.broadcast %cst_151 : f32 to vector<16x1xf32>
    %448 = arith.addf %446, %447 : vector<16x1xf32>
    %449 = math.rsqrt %448 : vector<16x1xf32>
    %450 = vector.broadcast %449 : vector<16x1xf32> to vector<16x128xf32>
    %451 = arith.mulf %441, %450 : vector<16x128xf32>
    %452 = vector.extract_strided_slice %10 {offsets = [1, 0], sizes = [1, 128], strides = [1, 1]} : vector<3x128xf32> to vector<1x128xf32>
    %453 = vector.broadcast %452 : vector<1x128xf32> to vector<16x128xf32>
    %454 = arith.mulf %451, %453 : vector<16x128xf32>
    %455 = vector.extract_strided_slice %12 {offsets = [1, 0], sizes = [1, 128], strides = [1, 1]} : vector<3x128xf32> to vector<1x128xf32>
    %456 = vector.broadcast %455 : vector<1x128xf32> to vector<16x128xf32>
    %457 = arith.addf %454, %456 : vector<16x128xf32>
    %c0_152 = arith.constant 0 : index
    %c0_153 = arith.constant 0 : index
    %c0_154 = arith.constant 0 : index
    %458 = vector.load %arg13[%c0_152, %c0_153, %c0_154] : memref<1x128x128xbf16, #tpu.memory_space<vmem>>, vector<1x128x128xbf16>
    %459 = vector.shape_cast %458 : vector<1x128x128xbf16> to vector<128x128xbf16>
    %460 = arith.truncf %457 : vector<16x128xf32> to vector<16x128xbf16>
    %cst_155 = arith.constant dense<0.000000e+00> : vector<16x128xf32>
    %461 = tpu.matmul %460, %459, %cst_155 {dimension_numbers = #tpu.dot_dimension_numbers<[1], [0], [0], [1], [0, 0, 1, 1], [], []>} : vector<16x128xbf16>, vector<128x128xbf16>, vector<16x128xf32> -> vector<16x128xf32>
    %c0_156 = arith.constant 0 : index
    %c0_157 = arith.constant 0 : index
    %c0_158 = arith.constant 0 : index
    %462 = vector.load %arg14[%c0_156, %c0_157, %c0_158] : memref<1x1x128xf32, #tpu.memory_space<vmem>>, vector<1x1x128xf32>
    %463 = vector.shape_cast %462 : vector<1x1x128xf32> to vector<1x128xf32>
    %464 = vector.broadcast %463 : vector<1x128xf32> to vector<16x128xf32>
    %465 = arith.addf %461, %464 : vector<16x128xf32>
    %cst_159 = arith.constant 0.000000e+00 : f32
    %466 = vector.broadcast %cst_159 : f32 to vector<16x128xf32>
    %467 = arith.maximumf %465, %466 : vector<16x128xf32>
    %c0_160 = arith.constant 0 : index
    %c0_161 = arith.constant 0 : index
    %c0_162 = arith.constant 0 : index
    %468 = vector.load %arg15[%c0_160, %c0_161, %c0_162] : memref<1x128x128xbf16, #tpu.memory_space<vmem>>, vector<1x128x128xbf16>
    %469 = vector.shape_cast %468 : vector<1x128x128xbf16> to vector<128x128xbf16>
    %470 = arith.truncf %467 : vector<16x128xf32> to vector<16x128xbf16>
    %cst_163 = arith.constant dense<0.000000e+00> : vector<16x128xf32>
    %471 = tpu.matmul %470, %469, %cst_163 {dimension_numbers = #tpu.dot_dimension_numbers<[1], [0], [0], [1], [0, 0, 1, 1], [], []>} : vector<16x128xbf16>, vector<128x128xbf16>, vector<16x128xf32> -> vector<16x128xf32>
    %472 = arith.addf %457, %471 : vector<16x128xf32>
    %c0_164 = arith.constant 0 : index
    %c0_165 = arith.constant 0 : index
    %c0_166 = arith.constant 0 : index
    %473 = vector.load %arg16[%c0_164, %c0_165, %c0_166] : memref<1x1x128xf32, #tpu.memory_space<vmem>>, vector<1x1x128xf32>
    %474 = vector.shape_cast %473 : vector<1x1x128xf32> to vector<1x128xf32>
    %475 = vector.broadcast %474 : vector<1x128xf32> to vector<16x128xf32>
    %476 = arith.addf %472, %475 : vector<16x128xf32>
    %cst_167 = arith.constant dense<0.000000e+00> : vector<16xf32>
    %477 = vector.multi_reduction <add>, %476, %cst_167 [1] : vector<16x128xf32> to vector<16xf32>
    %478 = vector.shape_cast %477 : vector<16xf32> to vector<16x1xf32>
    %cst_168 = arith.constant 3.125000e-02 : f32
    %479 = vector.broadcast %cst_168 : f32 to vector<16x1xf32>
    %480 = arith.mulf %478, %479 : vector<16x1xf32>
    %481 = vector.broadcast %480 : vector<16x1xf32> to vector<16x128xf32>
    %482 = arith.subf %476, %481 : vector<16x128xf32>
    %483 = vector.broadcast %8 : vector<1x128xf32> to vector<16x128xf32>
    %484 = arith.mulf %482, %483 : vector<16x128xf32>
    %485 = arith.mulf %484, %484 : vector<16x128xf32>
    %cst_169 = arith.constant dense<0.000000e+00> : vector<16xf32>
    %486 = vector.multi_reduction <add>, %485, %cst_169 [1] : vector<16x128xf32> to vector<16xf32>
    %487 = vector.shape_cast %486 : vector<16xf32> to vector<16x1xf32>
    %cst_170 = arith.constant 3.125000e-02 : f32
    %488 = vector.broadcast %cst_170 : f32 to vector<16x1xf32>
    %489 = arith.mulf %487, %488 : vector<16x1xf32>
    %cst_171 = arith.constant 9.99999974E-6 : f32
    %490 = vector.broadcast %cst_171 : f32 to vector<16x1xf32>
    %491 = arith.addf %489, %490 : vector<16x1xf32>
    %492 = math.rsqrt %491 : vector<16x1xf32>
    %493 = vector.broadcast %492 : vector<16x1xf32> to vector<16x128xf32>
    %494 = arith.mulf %484, %493 : vector<16x128xf32>
    %495 = vector.extract_strided_slice %10 {offsets = [2, 0], sizes = [1, 128], strides = [1, 1]} : vector<3x128xf32> to vector<1x128xf32>
    %496 = vector.broadcast %495 : vector<1x128xf32> to vector<16x128xf32>
    %497 = arith.mulf %494, %496 : vector<16x128xf32>
    %498 = vector.extract_strided_slice %12 {offsets = [2, 0], sizes = [1, 128], strides = [1, 1]} : vector<3x128xf32> to vector<1x128xf32>
    %499 = vector.broadcast %498 : vector<1x128xf32> to vector<16x128xf32>
    %500 = arith.addf %497, %499 : vector<16x128xf32>
    %c0_172 = arith.constant 0 : index
    %c0_173 = arith.constant 0 : index
    %501 = vector.load %arg20[%c0_172, %c0_173] : memref<16x128xf32, #tpu.memory_space<vmem>>, vector<16x128xf32>
    tpu.vector_store %arg20[%c0_172, %c0_173], %500 {strides = array<i32>} : memref<16x128xf32, #tpu.memory_space<vmem>>, vector<16x128xf32>,
    %c1_i32 = arith.constant 1 : i32
    %502 = arith.cmpi eq, %arg0, %c1_i32 : i32
    %503 = arith.extui %502 : i1 to i32
    %c0_i32_174 = arith.constant 0 : i32
    %504 = arith.cmpi ne, %503, %c0_i32_174 : i32
    scf.if %504 {
      %c0_175 = arith.constant 0 : index
      %c0_176 = arith.constant 0 : index
      %505 = vector.load %arg19[%c0_175, %c0_176] : memref<16x128xf32, #tpu.memory_space<vmem>>, vector<16x128xf32>
      tpu.vector_store %arg19[%c0_175, %c0_176], %500 {strides = array<i32>} : memref<16x128xf32, #tpu.memory_space<vmem>>, vector<16x128xf32>,
    } else {
    }
    return
  }
  func.func @transform_0(%arg0: i32) -> (i32, i32) {
    %c0_i32 = arith.constant 0 : i32
    %c0_i32_0 = arith.constant 0 : i32
    %c0_i32_1 = arith.constant 0 : i32
    return %c0_i32, %c0_i32_0 : i32, i32
  }
  func.func @transform_1(%arg0: i32) -> (i32, i32) {
    %c0_i32 = arith.constant 0 : i32
    %c0_i32_0 = arith.constant 0 : i32
    %c0_i32_1 = arith.constant 0 : i32
    return %c0_i32, %c0_i32_0 : i32, i32
  }
  func.func @transform_2(%arg0: i32) -> (i32, i32, i32) {
    %c0_i32 = arith.constant 0 : i32
    %c0_i32_0 = arith.constant 0 : i32
    %c0_i32_1 = arith.constant 0 : i32
    return %arg0, %c0_i32, %c0_i32_0 : i32, i32, i32
  }
  func.func @transform_3(%arg0: i32) -> (i32, i32, i32) {
    %c0_i32 = arith.constant 0 : i32
    %c0_i32_0 = arith.constant 0 : i32
    %c0_i32_1 = arith.constant 0 : i32
    return %arg0, %c0_i32, %c0_i32_0 : i32, i32, i32
  }
  func.func @transform_4(%arg0: i32) -> (i32, i32, i32) {
    %c0_i32 = arith.constant 0 : i32
    %c0_i32_0 = arith.constant 0 : i32
    %c0_i32_1 = arith.constant 0 : i32
    return %arg0, %c0_i32, %c0_i32_0 : i32, i32, i32
  }
  func.func @transform_5(%arg0: i32) -> (i32, i32, i32) {
    %c0_i32 = arith.constant 0 : i32
    %c0_i32_0 = arith.constant 0 : i32
    %c0_i32_1 = arith.constant 0 : i32
    return %arg0, %c0_i32, %c0_i32_0 : i32, i32, i32
  }
  func.func @transform_6(%arg0: i32) -> (i32, i32, i32) {
    %c0_i32 = arith.constant 0 : i32
    %c0_i32_0 = arith.constant 0 : i32
    %c0_i32_1 = arith.constant 0 : i32
    return %arg0, %c0_i32, %c0_i32_0 : i32, i32, i32
  }
  func.func @transform_7(%arg0: i32) -> (i32, i32, i32) {
    %c0_i32 = arith.constant 0 : i32
    %c0_i32_0 = arith.constant 0 : i32
    %c0_i32_1 = arith.constant 0 : i32
    return %arg0, %c0_i32, %c0_i32_0 : i32, i32, i32
  }
  func.func @transform_8(%arg0: i32) -> (i32, i32, i32) {
    %c0_i32 = arith.constant 0 : i32
    %c0_i32_0 = arith.constant 0 : i32
    %c0_i32_1 = arith.constant 0 : i32
    return %arg0, %c0_i32, %c0_i32_0 : i32, i32, i32
  }
  func.func @transform_9(%arg0: i32) -> (i32, i32, i32) {
    %c0_i32 = arith.constant 0 : i32
    %c0_i32_0 = arith.constant 0 : i32
    %c0_i32_1 = arith.constant 0 : i32
    return %arg0, %c0_i32, %c0_i32_0 : i32, i32, i32
  }
  func.func @transform_10(%arg0: i32) -> (i32, i32, i32) {
    %c0_i32 = arith.constant 0 : i32
    %c0_i32_0 = arith.constant 0 : i32
    %c0_i32_1 = arith.constant 0 : i32
    return %arg0, %c0_i32, %c0_i32_0 : i32, i32, i32
  }
  func.func @transform_11(%arg0: i32) -> (i32, i32, i32) {
    %c0_i32 = arith.constant 0 : i32
    %c0_i32_0 = arith.constant 0 : i32
    %c0_i32_1 = arith.constant 0 : i32
    return %arg0, %c0_i32, %c0_i32_0 : i32, i32, i32
  }
  func.func @transform_12(%arg0: i32) -> (i32, i32, i32) {
    %c0_i32 = arith.constant 0 : i32
    %c0_i32_0 = arith.constant 0 : i32
    %c0_i32_1 = arith.constant 0 : i32
    return %arg0, %c0_i32, %c0_i32_0 : i32, i32, i32
  }
  func.func @transform_13(%arg0: i32) -> (i32, i32, i32) {
    %c0_i32 = arith.constant 0 : i32
    %c0_i32_0 = arith.constant 0 : i32
    %c0_i32_1 = arith.constant 0 : i32
    return %arg0, %c0_i32, %c0_i32_0 : i32, i32, i32
  }
  func.func @transform_14(%arg0: i32) -> (i32, i32, i32) {
    %c0_i32 = arith.constant 0 : i32
    %c0_i32_0 = arith.constant 0 : i32
    %c0_i32_1 = arith.constant 0 : i32
    return %arg0, %c0_i32, %c0_i32_0 : i32, i32, i32
  }
  func.func @transform_15(%arg0: i32) -> (i32, i32, i32) {
    %c0_i32 = arith.constant 0 : i32
    %c0_i32_0 = arith.constant 0 : i32
    %c0_i32_1 = arith.constant 0 : i32
    return %arg0, %c0_i32, %c0_i32_0 : i32, i32, i32
  }
  func.func @transform_16(%arg0: i32) -> (i32, i32, i32) {
    %c0_i32 = arith.constant 0 : i32
    %c0_i32_0 = arith.constant 0 : i32
    %c0_i32_1 = arith.constant 0 : i32
    return %arg0, %c0_i32, %c0_i32_0 : i32, i32, i32
  }
  func.func @transform_17(%arg0: i32) -> (i32, i32, i32) {
    %c0_i32 = arith.constant 0 : i32
    %c0_i32_0 = arith.constant 0 : i32
    %c0_i32_1 = arith.constant 0 : i32
    return %arg0, %c0_i32, %c0_i32_0 : i32, i32, i32
  }
  func.func @transform_18(%arg0: i32) -> (i32, i32) {
    %c0_i32 = arith.constant 0 : i32
    %c0_i32_0 = arith.constant 0 : i32
    %c0_i32_1 = arith.constant 0 : i32
    return %c0_i32, %c0_i32_0 : i32, i32
  }
}

</mosaic_0001>

<bundles_post_ra>
// kernel: tpu_custom_call.1
= control target key start
LH: loop header
LB: loop body
LE: loop exit
PB: predicated region body
PF: predicated region fallthrough
CT: control target
= control target key end

     0   :  { %s8267_s0 = inlined_call_operand.vmem [shape: f32[16,128], index: 0, kind: input, shape index: {}]   ;;  %s8268_s1 = inlined_call_operand.hbm [shape: bf16[32,128], index: 1, kind: input, shape index: {}]   ;;  %s8269_s2 = inlined_call_operand.hbm [shape: bf16[2,128,384], index: 2, kind: input, shape index: {}]   ;;  %s8270_s3 = inlined_call_operand.vmem [shape: f32[2,1,384], index: 3, kind: input, shape index: {}]   ;;  %s8271_s4 = inlined_call_operand.hbm [shape: bf16[2,128,128], index: 4, kind: input, shape index: {}]   ;;  %s8272_s5 = inlined_call_operand.vmem [shape: f32[2,1,128], index: 5, kind: input, shape index: {}]   ;;  %s8273_s6 = inlined_call_operand.hbm [shape: bf16[2,128,128], index: 6, kind: input, shape index: {}]   ;;  %s8274_s7 = inlined_call_operand.hbm [shape: f32[2,1,128], index: 7, kind: input, shape index: {}]   ;;  %s8275_s8 = inlined_call_operand.hbm [shape: bf16[2,128,256], index: 8, kind: input, shape index: {}]   ;;  %s8276_s9 = inlined_call_operand.vmem [shape: f32[2,1,256], index: 9, kind: input, shape index: {}]   ;;  %s8277_s10 = inlined_call_operand.hbm [shape: bf16[2,128,128], index: 10, kind: input, shape index: {}]   ;;  %s8278_s11 = inlined_call_operand.vmem [shape: f32[2,1,128], index: 11, kind: input, shape index: {}]   ;;  %s8279_s12 = inlined_call_operand.hbm [shape: bf16[2,128,128], index: 12, kind: input, shape index: {}]   ;;  %s8280_s13 = inlined_call_operand.vmem [shape: f32[2,1,128], index: 13, kind: input, shape index: {}]   ;;  %s8281_s14 = inlined_call_operand.hbm [shape: bf16[2,128,128], index: 14, kind: input, shape index: {}]   ;;  %s8282_s15 = inlined_call_operand.vmem [shape: f32[2,1,128], index: 15, kind: input, shape index: {}]   ;;  %s8283_s16 = inlined_call_operand.vmem [shape: f32[2,3,128], index: 16, kind: input, shape index: {}]   ;;  %s8284_s17 = inlined_call_operand.vmem [shape: f32[2,3,128], index: 17, kind: input, shape index: {}]   ;;  %s8285_s18 = inlined_call_operand.hbm [shape: f32[16,128], index: 18, kind: output, shape index: {}]  }
   0x1   :  { %8306 = sst [smem:[#allocation31_spill]] %s8267_s0 }
   0x2   :  { %8307 = sst [smem:[#allocation32_spill]] %s8268_s1 }
   0x3   :  { %8308 = sst [smem:[#allocation33_spill]] %s8269_s2 }
   0x4   :  { %8309 = sst [smem:[#allocation34_spill]] %s8270_s3 }
   0x5   :  { %8310 = sst [smem:[#allocation35_spill]] %s8271_s4 }
   0x6   :  { %8311 = sst [smem:[#allocation36_spill]] %s8273_s6 }
   0x7   :  { %8312 = sst [smem:[#allocation37_spill]] %s8274_s7 }
   0x8   :  { %8313 = sst [smem:[#allocation38_spill]] %s8275_s8 }
   0x9   :  { %8314 = sst [smem:[#allocation39_spill]] %s8276_s9 }
   0xa   :  { %8315 = sst [smem:[#allocation40_spill]] %s8277_s10 }
   0xb   :  { %8316 = sst [smem:[#allocation41_spill]] %s8278_s11 }
   0xc   :  { %8317 = sst [smem:[#allocation42_spill]] %s8279_s12 }
   0xd   :  { %8318 = sst [smem:[#allocation43_spill]] %s8280_s13 }
   0xe   :  { %8319 = sst [smem:[#allocation44_spill]] %s8281_s14 }
   0xf   :  { %8320 = sst [smem:[#allocation45_spill]] %s8282_s15 }
  0x10   :  { %8321 = sst [smem:[#allocation46_spill]] %s8283_s16 }
  0x11   :  { %8322 = sst [smem:[#allocation47_spill]] %s8284_s17 }
  0x12   :  { %8323 = sst [smem:[#allocation48_spill]] %s8285_s18 }
  0x13   :  { %23 = vsyncpa [#allocation4], 0 }
  0x14   :  { %24 = vsyncpa [#allocation7], 0 }
  0x15   :  { %26 = vsyncpa [#allocation7 + $0x1], 0 }
  0x16   :  { %27 = vsyncpa [#allocation10], 0 }
  0x17   :  { %29 = vsyncpa [#allocation10 + $0x1], 0 }
  0x18   :  { %30 = vsyncpa [#allocation13], 0 }
  0x19   :  { %32 = vsyncpa [#allocation13 + $0x1], 0 }
  0x1a   :  { %33 = vsyncpa [#allocation16], 0 }
  0x1b   :  { %35 = vsyncpa [#allocation16 + $0x1], 0 }
  0x1c   :  { %36 = vsyncpa [#allocation5], 0  ;;  %s7087_s27 = smov 0   ;;  %s7089_s28 = smov 0  }
  0x1d   :  { %s7091_s29 = smov 0   ;;  %s7093_s30 = smov 0  }
  0x1e LB: > { %8324 = sst [smem:[#allocation25_spill]] %s6958_s28  ;;  %s7108_s0 = sadd.s32 1, %s6966_s30   ;;  %s6966_s30 = sphi %s7093_s30, %s8375_s30   ;;  %s6962_s29 = sphi %s7091_s29, %s8378_s29   ;;  %s6958_s28 = sphi %s7089_s28, %s8377_s28   ;;  %s6954_s27 = sphi %s7087_s27, %s8376_s27  }
  0x1f   : > { %8325 = sst [smem:[#allocation26_spill]] %s6962_s29  ;;  %s91_s19 = sadd.s32 1, %s6962_s29 }
  0x20   : > { %8326 = sst [smem:[#allocation27_spill]] %s7108_s0  ;;  %s88_s1 = ssub.s32 %s6966_s30, %s7108_s0 }
  0x21   : > { %p98_p0 = scmp.ne.s32.totalorder %s6962_s29, %s6958_s28  ;;  %p89_p1 = scmp.eq.s32.totalorder %s88_s1, 0 }
  0x22   : > { %p99_p2 = scmp.eq.s32.totalorder %s6966_s30, 0  ;;  %p6426_p3 = scmp.lt.s32.totalorder %s6966_s30, 2 }
  0x23   : > { %s7118_s20 = scalar_select %p89_p1, %s6962_s29, %s91_s19  }
  0x24   : > { %p100_p4 = por %p99_p2, %p98_p0  ;;  %s7121_s21 = sand.u32 1, %s6966_s30  }
  0x25   : > { %8327 = sst [smem:[#allocation28_spill]] %s7118_s20  ;;  %s7124_s22 = sand.u32 1, %s6962_s29  }
  0x26   : > { %s6368_s2 = smul.u32 192, %s7124_s22  ;;  %p7127_p5 = pnand %p6426_p3, %p100_p4 }
  0x27   : > { %s6369_s24 = smul.u32 3072, %s6966_s30  ;;  %s8329_s1 = sld [smem:[#allocation33_spill]] }
  0x28   : > { %s559_s19 = scalar_lea.vmem [#allocation6], %s6368_s2  ;;  %p7144_p7 = pneg %p7127_p5 }
  0x29   : > { %s566_s20 = sshll.u32 %s559_s19, 4  ;;  %s7137_s20 = int_to_ptr.vmem [resolvable:$true] %s566_s20 }
  0x2d   : > { %s7135_s0 = scalar_lea.hbm %s8329_s1, %s6369_s24  ;;  %s6643_s26 = scalar_lea.hbm %s8329_s1, 6144 }
  0x2e   : > { %s6638_s18 = scalar_lea.hbm %s7135_s0, 3072  ;;  %p6644_p10 = scmp.lt.s32.totalorder %s7135_s0, %s8329_s1 }
  0x2f   : > { %p6639_p6 = scmp.ne.s32.totalorder %s7135_s0, %s6638_s18  ;;  %p6645_p11 = scmp.lt.s32.totalorder %s6643_s26, %s6638_s18 }
  0x31   : > { %p6641_p8 = pnand %p7144_p7, %p6639_p6  ;;  %p6646_p12 = por %p6645_p11, %p6644_p10 }
  0x33   : > { %p6642_p9 = pneg %p6641_p8 }
  0x35   : > { %p6647_p13 = pnand %p6646_p12, %p6642_p9 }
  0x37   : > { %6650 = shalt.err (!%p6647_p13)
}
  0x38   : > { %s6651_s29 = scalar_lea.vmem %s7137_s20, 3072  ;;  %s6968_s16 = smov [#allocation6]  }
  0x39   : > { %p6652_p0 = scmp.ne.s32.totalorder %s7137_s20, %s6651_s29  ;;  %s6656_s24 = sshll.u32 %s6968_s16, 4  ;;  %s6657_s24 = int_to_ptr.vmem [resolvable:$false] %s6656_s24 }
  0x3a   : > { %s6658_s25 = scalar_lea.vmem %s6657_s24, 6144  ;;  %p6659_p3 = scmp.lt.s32.totalorder %s7137_s20, %s6657_s24 }
  0x3b   : > { %p6654_p1 = pnand %p6652_p0, %p7144_p7  ;;  %p6660_p4 = scmp.lt.s32.totalorder %s6658_s25, %s6651_s29 }
  0x3d   : > { %p6655_p2 = pneg %p6654_p1  ;;  %p6661_p6 = por %p6660_p4, %p6659_p3 }
  0x3f   : > { %p6662_p8 = pnand %p6661_p6, %p6655_p2 }
  0x41   : > { %6665 = shalt.err (!%p6662_p8)
}
  0x42   : > { %s6969_s18 = smov 192   ;;  %s6970_s26 = smov 12  }
  0x43   : > { %s8331_s2 = scalar_lea.sflag [#allocation7], %s7121_s21  ;;  %s7169_s16 = sshll.u32 %s7124_s22, 6 }
  0x44   : > { %6403 = dma.hbm_to_vmem [thread:$0]  (!%p7127_p5), %s7135_s0, 3072, %s7137_s20, %s8331_s2, %s6969_s18, %s6969_s18, %s6970_s26  }
  0x45   : > { %s7172_s29 = sshll.u32 %s6966_s30, 10  ;;  %s8332_s6 = sld [smem:[#allocation36_spill]] }
  0x46   : > { %s614_s1 = scalar_lea.vmem [#allocation9], %s7169_s16  ;;  %s8292_s13 = scalar_lea.sflag [#allocation10], %s7121_s21 }
  0x47   : > { %s621_s15 = sshll.u32 %s614_s1, 4  ;;  %s7181_s15 = int_to_ptr.vmem [resolvable:$true] %s621_s15 }
  0x4b   : > { %s7178_s25 = scalar_lea.hbm %s8332_s6, %s7172_s29  ;;  %s6671_s26 = scalar_lea.hbm %s8332_s6, 2048 }
  0x4c   : > { %s6666_s0 = scalar_lea.hbm %s7178_s25, 1024  ;;  %p6672_p12 = scmp.lt.s32.totalorder %s7178_s25, %s8332_s6 }
  0x4d   : > { %p6667_p9 = scmp.ne.s32.totalorder %s7178_s25, %s6666_s0  ;;  %p6673_p13 = scmp.lt.s32.totalorder %s6671_s26, %s6666_s0 }
  0x4f   : > { %p6669_p10 = pnand %p6667_p9, %p7144_p7  ;;  %p6674_p0 = por %p6673_p13, %p6672_p12 }
  0x51   : > { %p6670_p11 = pneg %p6669_p10 }
  0x53   : > { %p6675_p1 = pnand %p6674_p0, %p6670_p11 }
  0x55   : > { %6678 = shalt.err (!%p6675_p1)
}
  0x56   : > { %s6679_s1 = scalar_lea.vmem %s7181_s15, 1024  ;;  %s6971_s24 = smov [#allocation9]  }
  0x57   : > { %p6680_p2 = scmp.ne.s32.totalorder %s7181_s15, %s6679_s1  ;;  %s6684_s20 = sshll.u32 %s6971_s24, 4  ;;  %s6685_s20 = int_to_ptr.vmem [resolvable:$false] %s6684_s20 }
  0x58   : > { %s6686_s18 = scalar_lea.vmem %s6685_s20, 2048  ;;  %p6687_p6 = scmp.lt.s32.totalorder %s7181_s15, %s6685_s20 }
  0x59   : > { %p6682_p3 = pnand %p6680_p2, %p7144_p7  ;;  %p6688_p8 = scmp.lt.s32.totalorder %s6686_s18, %s6679_s1 }
  0x5b   : > { %p6683_p4 = pneg %p6682_p3  ;;  %p6689_p9 = por %p6688_p8, %p6687_p6 }
  0x5d   : > { %p6690_p10 = pnand %p6689_p9, %p6683_p4 }
  0x5f   : > { %6693 = shalt.err (!%p6690_p10)
}
  0x60   : > { %s8293_s0 = smov 64   ;;  %s8297_s26 = smov 4  }
  0x61   : > { %6409 = dma.hbm_to_vmem [thread:$0]  (!%p7127_p5), %s7178_s25, 1024, %s7181_s15, %s8292_s13, %s8293_s0, %s8293_s0, %s8297_s26  }
  0x62   : > { %s5673_s2 = sshll.u32 %s7124_s22, 7  ;;  %s5848_s19 = sshll.u32 %s6966_s30, 11 }
  0x63   : > { %s8333_s8 = sld [smem:[#allocation38_spill]]  ;;  %s652_s18 = scalar_lea.vmem [#allocation12], %s5673_s2 }
  0x64   : > { %s659_s6 = sshll.u32 %s652_s18, 4  ;;  %s8296_s9 = scalar_lea.sflag [#allocation13], %s7121_s21  ;;  %s7216_s6 = int_to_ptr.vmem [resolvable:$true] %s659_s6 }
  0x69   : > { %s7214_s20 = scalar_lea.hbm %s8333_s8, %s5848_s19  ;;  %s6699_s13 = scalar_lea.hbm %s8333_s8, 4096 }
  0x6a   : > { %s6694_s3 = scalar_lea.hbm %s7214_s20, 2048  ;;  %p6700_p0 = scmp.lt.s32.totalorder %s7214_s20, %s8333_s8 }
  0x6b   : > { %p6695_p11 = scmp.ne.s32.totalorder %s7214_s20, %s6694_s3  ;;  %p6701_p1 = scmp.lt.s32.totalorder %s6699_s13, %s6694_s3 }
  0x6d   : > { %p6697_p12 = pnand %p6695_p11, %p7144_p7  ;;  %p6702_p2 = por %p6701_p1, %p6700_p0 }
  0x6f   : > { %p6698_p13 = pneg %p6697_p12 }
  0x71   : > { %p6703_p3 = pnand %p6702_p2, %p6698_p13 }
  0x73   : > { %6706 = shalt.err (!%p6703_p3)
}
  0x74   : > { %s6707_s2 = scalar_lea.vmem %s7216_s6, 2048  ;;  %s6974_s24 = smov [#allocation12]  }
  0x75   : > { %p6708_p4 = scmp.ne.s32.totalorder %s7216_s6, %s6707_s2  ;;  %s6712_s18 = sshll.u32 %s6974_s24, 4  ;;  %s6713_s18 = int_to_ptr.vmem [resolvable:$false] %s6712_s18 }
  0x76   : > { %s6714_s15 = scalar_lea.vmem %s6713_s18, 4096  ;;  %p6715_p9 = scmp.lt.s32.totalorder %s7216_s6, %s6713_s18 }
  0x77   : > { %p6710_p6 = pnand %p6708_p4, %p7144_p7  ;;  %p6716_p10 = scmp.lt.s32.totalorder %s6714_s15, %s6707_s2 }
  0x79   : > { %p6711_p8 = pneg %p6710_p6  ;;  %p6717_p11 = por %p6716_p10, %p6715_p9 }
  0x7b   : > { %p6718_p12 = pnand %p6717_p11, %p6711_p8 }
  0x7d   : > { %6721 = shalt.err (!%p6718_p12)
}
  0x7e   : > { %s6975_s3 = smov 128   ;;  %s6976_s13 = smov 8  }
  0x7f   : > { %6415 = dma.hbm_to_vmem [thread:$0]  (!%p7127_p5), %s7214_s20, 2048, %s7216_s6, %s8296_s9, %s6975_s3, %s6975_s3, %s6976_s13  }
  0x80   : > { %s8334_s12 = sld [smem:[#allocation42_spill]]  ;;  %s707_s2 = scalar_lea.vmem [#allocation15], %s7169_s16 }
  0x81   : > { %s714_s24 = sshll.u32 %s707_s2, 4  ;;  %s8295_s18 = scalar_lea.sflag [#allocation16], %s7121_s21  ;;  %s7248_s24 = int_to_ptr.vmem [resolvable:$true] %s714_s24 }
  0x86   : > { %s7245_s19 = scalar_lea.hbm %s8334_s12, %s7172_s29  ;;  %s6727_s20 = scalar_lea.hbm %s8334_s12, 2048 }
  0x87   : > { %s6722_s15 = scalar_lea.hbm %s7245_s19, 1024  ;;  %p6728_p2 = scmp.lt.s32.totalorder %s7245_s19, %s8334_s12 }
  0x88   : > { %p6723_p13 = scmp.ne.s32.totalorder %s7245_s19, %s6722_s15  ;;  %p6729_p3 = scmp.lt.s32.totalorder %s6727_s20, %s6722_s15 }
  0x8a   : > { %p6725_p0 = pnand %p6723_p13, %p7144_p7  ;;  %p6730_p4 = por %p6729_p3, %p6728_p2 }
  0x8c   : > { %p6726_p1 = pneg %p6725_p0 }
  0x8e   : > { %p6731_p6 = pnand %p6730_p4, %p6726_p1 }
  0x90   : > { %6734 = shalt.err (!%p6731_p6)
}
  0x91   : > { %s6735_s25 = scalar_lea.vmem %s7248_s24, 1024  ;;  %s6977_s1 = smov [#allocation15]  }
  0x92   : > { %p6736_p8 = scmp.ne.s32.totalorder %s7248_s24, %s6735_s25  ;;  %s6740_s0 = sshll.u32 %s6977_s1, 4  ;;  %s6741_s0 = int_to_ptr.vmem [resolvable:$false] %s6740_s0 }
  0x93   : > { %s6742_s2 = scalar_lea.vmem %s6741_s0, 2048  ;;  %p6743_p11 = scmp.lt.s32.totalorder %s7248_s24, %s6741_s0 }
  0x94   : > { %p6738_p9 = pnand %p6736_p8, %p7144_p7  ;;  %p6744_p12 = scmp.lt.s32.totalorder %s6742_s2, %s6735_s25 }
  0x96   : > { %p6739_p10 = pneg %p6738_p9  ;;  %p6745_p13 = por %p6744_p12, %p6743_p11 }
  0x98   : > { %p6746_p0 = pnand %p6745_p13, %p6739_p10 }
  0x9a   : > { %6749 = shalt.err (!%p6746_p0)
}
  0x9b   : > { %s8335_s15 = smov 64   ;;  %s7277_s6 = sadd.s32 4294967295, %s6966_s30  }
  0x9c   : > { %6421 = dma.hbm_to_vmem [thread:$0]  (!%p7127_p5), %s7245_s19, 1024, %s7248_s24, %s8295_s18, %s8335_s15, %s8335_s15, %s8297_s26  }
  0x9d   : > { %p104_p1 = scmp.ne.s32.totalorder %s6958_s28, %s6954_s27  ;;  %p8299_p2 = scmp.eq.s32.totalorder %s7277_s6, 0 }
  0x9e   : > { %p5662_p3 = scmp.ge.s32.totalorder %s6966_s30, 1  ;;  %p526_p4 = scmp.lt.s32.totalorder %s6966_s30, 3 }
  0x9f   : > { %p7286_p6 = por %p8299_p2, %p104_p1  ;;  %s6978_s19 = smov [#allocation3]  }
  0xa0   : > { %p7291_p9 = pnand %p5662_p3, %p526_p4  ;;  %s541_s24 = sshll.u32 %s6978_s19, 4  ;;  %s7297_s24 = int_to_ptr.vmem [resolvable:$true] %s541_s24 }
  0xa1   : > { %s8336_s20 = scalar_select %p7286_p6, 1, 0 }
  0xa2   : > { %s8337_s3 = scalar_select %p7291_p9, 1, 0 }
  0xa3   : > { %p6396_p10 = pneg %p7291_p9  ;;  %s8338_s4 = sld [smem:[#allocation35_spill]] }
  0xa4   : > { %s587_s1 = scalar_lea.vmem [#allocation8], %s7169_s16 }
  0xa5   : > { %s594_s0 = sshll.u32 %s587_s1, 4  ;;  %p7308_p11 = pnand %p6396_p10, %p8299_p2  ;;  %s595_s0 = int_to_ptr.vmem [resolvable:$true] %s594_s0 }
  0xa7   : > { %s8339_s2 = scalar_select %p7308_p11, 1, 0 }
  0xa9   : > { %s7303_s25 = scalar_lea.hbm %s8338_s4, %s7172_s29  ;;  %s6755_s13 = scalar_lea.hbm %s8338_s4, 2048 }
  0xaa   : > { %s6750_s19 = scalar_lea.hbm %s7303_s25, 1024  ;;  %p6756_p1 = scmp.lt.s32.totalorder %s7303_s25, %s8338_s4 }
  0xab   : > { %p6751_p12 = scmp.ne.s32.totalorder %s7303_s25, %s6750_s19  ;;  %p6757_p3 = scmp.lt.s32.totalorder %s6755_s13, %s6750_s19 }
  0xad   : > { %p6753_p13 = pnand %p6751_p12, %p7144_p7  ;;  %p6758_p4 = por %p6757_p3, %p6756_p1 }
  0xaf   : > { %p6754_p0 = pneg %p6753_p13 }
  0xb1   : > { %p6759_p10 = pnand %p6758_p4, %p6754_p0 }
  0xb3   : > { %6762 = shalt.err (!%p6759_p10)
}
  0xb4   : > { %s6763_s1 = scalar_lea.vmem %s595_s0, 1024  ;;  %s6979_s8 = smov [#allocation8]  }
  0xb5   : > { %p6764_p8 = scmp.ne.s32.totalorder %s595_s0, %s6763_s1  ;;  %s6768_s12 = sshll.u32 %s6979_s8, 4  ;;  %s6769_s12 = int_to_ptr.vmem [resolvable:$false] %s6768_s12 }
  0xb6   : > { %s6770_s11 = scalar_lea.vmem %s6769_s12, 2048  ;;  %p6771_p12 = scmp.lt.s32.totalorder %s595_s0, %s6769_s12 }
  0xb7   : > { %p6766_p2 = pnand %p6764_p8, %p7144_p7  ;;  %p6772_p13 = scmp.lt.s32.totalorder %s6770_s11, %s6763_s1 }
  0xb9   : > { %p6767_p6 = pneg %p6766_p2  ;;  %p6773_p9 = por %p6772_p13, %p6771_p12 }
  0xbb   : > { %p6774_p11 = pnand %p6773_p9, %p6767_p6 }
  0xbd   : > { %6777 = shalt.err (!%p6774_p11)
}
  0xbe   : > { %s8340_s9 = smov 4   ;;  %s8341_s26 = scalar_lea.sflag [#allocation7], %s7121_s21 }
  0xbf   : > { %6406 = dma.hbm_to_vmem [thread:$0]  (!%p7127_p5), %s7303_s25, 1024, %s595_s0, %s8341_s26, %s8335_s15, %s8335_s15, %s8340_s9  }
  0xc0   : > { %p8342_p2 = scmp.ne.s32.totalorder %s8339_s2, 0  ;;  %s6789_s8 = scalar_lea.vmem %s7297_s24, 256 }
  0xc1   : > { %p6790_p0 = scmp.ne.s32.totalorder %s7297_s24, %s6789_s8  ;;  %p6797_p9 = scmp.lt.s32.totalorder %s7297_s24, %s7297_s24 }
  0xc2   : > { %p6780_p8 = pneg %p8342_p2  ;;  %p6798_p11 = scmp.lt.s32.totalorder %s6789_s8, %s6789_s8 }
  0xc4   : > { %p6792_p1 = pnand %p6790_p0, %p6780_p8  ;;  %p6799_p3 = por %p6798_p11, %p6797_p9 }
  0xc6   : > { %p6793_p6 = pneg %p6792_p1 }
  0xc8   : > { %p6800_p4 = pnand %p6799_p3, %p6793_p6 }
  0xca   : > { %6803 = shalt.err (!%p6800_p4)
}
  0xcb   : > { %s8343_s18 = sld [smem:[#allocation32_spill]]  ;;  %s5672_s25 = sshll.u32 %s6966_s30, 4 }
  0xcc   : > { %s634_s0 = scalar_lea.vmem [#allocation11], %s7124_s22  ;;  %s8344_s7 = sld [smem:[#allocation37_spill]] }
  0xcd   : > { %s641_s19 = sshll.u32 %s634_s0, 4  ;;  %s642_s19 = int_to_ptr.vmem [resolvable:$true] %s641_s19 }
  0xd1   : > { %6399 = dma.hbm_to_vmem [thread:$0]  (!%p8342_p2), %s8343_s18, 256, %s7297_s24, [#allocation4], %s8335_s15, %s8335_s15, %s8340_s9  }
  0xd2   : > { %s639_s1 = scalar_lea.hbm %s8344_s7, %s5672_s25  ;;  %s6809_s11 = scalar_lea.hbm %s8344_s7, 32 }
  0xd3   : > { %s6804_s2 = scalar_lea.hbm %s639_s1, 16  ;;  %p6810_p2 = scmp.lt.s32.totalorder %s639_s1, %s8344_s7 }
  0xd4   : > { %p6805_p10 = scmp.ne.s32.totalorder %s639_s1, %s6804_s2  ;;  %p6811_p8 = scmp.lt.s32.totalorder %s6809_s11, %s6804_s2 }
  0xd6   : > { %p6807_p12 = pnand %p6805_p10, %p7144_p7  ;;  %p6812_p0 = por %p6811_p8, %p6810_p2 }
  0xd8   : > { %p6808_p13 = pneg %p6807_p12 }
  0xda   : > { %p6813_p1 = pnand %p6812_p0, %p6808_p13 }
  0xdc   : > { %6816 = shalt.err (!%p6813_p1)
}
  0xdd   : > { %s6817_s30 = scalar_lea.vmem %s642_s19, 16  ;;  %s6980_s22 = smov [#allocation11]  }
  0xde   : > { %p6818_p6 = scmp.ne.s32.totalorder %s642_s19, %s6817_s30  ;;  %s6822_s24 = sshll.u32 %s6980_s22, 4  ;;  %s6823_s24 = int_to_ptr.vmem [resolvable:$false] %s6822_s24 }
  0xdf   : > { %s6824_s18 = scalar_lea.vmem %s6823_s24, 32  ;;  %p6825_p3 = scmp.lt.s32.totalorder %s642_s19, %s6823_s24 }
  0xe0   : > { %p6820_p9 = pnand %p6818_p6, %p7144_p7  ;;  %p6826_p4 = scmp.lt.s32.totalorder %s6824_s18, %s6817_s30 }
  0xe2   : > { %p6821_p11 = pneg %p6820_p9  ;;  %p6827_p10 = por %p6826_p4, %p6825_p3 }
  0xe4   : > { %p6828_p12 = pnand %p6827_p10, %p6821_p11 }
  0xe6   : > { %6831 = shalt.err (!%p6828_p12)
}
  0xe7   : > { %s8345_s4 = scalar_lea.sflag [#allocation10], %s7121_s21  ;;  %s8346_s10 = sld [smem:[#allocation40_spill]] }
  0xe8   : > { %6412 = dma.hbm_to_vmem [thread:$0]  (!%p7127_p5), %s639_s1, 16, %s642_s19, %s8345_s4  }
  0xe9   : > { %s680_s13 = scalar_lea.vmem [#allocation14], %s7169_s16  ;;  %s8347_s14 = sld [smem:[#allocation44_spill]] }
  0xea   : > { %s687_s2 = sshll.u32 %s680_s13, 4  ;;  %s7374_s2 = int_to_ptr.vmem [resolvable:$true] %s687_s2 }
  0xed   : > { %s7371_s27 = scalar_lea.hbm %s8346_s10, %s7172_s29  ;;  %s6837_s30 = scalar_lea.hbm %s8346_s10, 2048 }
  0xee   : > { %s6832_s12 = scalar_lea.hbm %s7371_s27, 1024  ;;  %p6838_p0 = scmp.lt.s32.totalorder %s7371_s27, %s8346_s10 }
  0xef   : > { %s7380_s11 = scalar_lea.hbm %s8347_s14, %s7172_s29  ;;  %p6833_p13 = scmp.ne.s32.totalorder %s7371_s27, %s6832_s12 }
  0xf0   : > { %p6839_p1 = scmp.lt.s32.totalorder %s6837_s30, %s6832_s12 }
  0xf1   : > { %p6835_p2 = pnand %p6833_p13, %p7144_p7 }
  0xf2   : > { %p6840_p6 = por %p6839_p1, %p6838_p0 }
  0xf3   : > { %p6836_p8 = pneg %p6835_p2 }
  0xf5   : > { %p6841_p9 = pnand %p6840_p6, %p6836_p8 }
  0xf7   : > { %6844 = shalt.err (!%p6841_p9)
}
  0xf8   : > { %s6845_s29 = scalar_lea.vmem %s7374_s2, 1024  ;;  %s6981_s18 = smov [#allocation14]  }
  0xf9   : > { %p6846_p11 = scmp.ne.s32.totalorder %s7374_s2, %s6845_s29  ;;  %s6850_s4 = sshll.u32 %s6981_s18, 4  ;;  %s6851_s4 = int_to_ptr.vmem [resolvable:$false] %s6850_s4 }
  0xfa   : > { %s6852_s25 = scalar_lea.vmem %s6851_s4, 2048  ;;  %p6853_p10 = scmp.lt.s32.totalorder %s7374_s2, %s6851_s4 }
  0xfb   : > { %p6848_p3 = pnand %p6846_p11, %p7144_p7  ;;  %p6854_p12 = scmp.lt.s32.totalorder %s6852_s25, %s6845_s29 }
  0xfd   : > { %p6849_p4 = pneg %p6848_p3  ;;  %p6855_p13 = por %p6854_p12, %p6853_p10 }
  0xff   : > { %p6856_p2 = pnand %p6855_p13, %p6849_p4 }
 0x101   : > { %6859 = shalt.err (!%p6856_p2)
}
 0x102   : > { %s8348_s0 = scalar_lea.sflag [#allocation13], %s7121_s21  ;;  %s734_s13 = scalar_lea.vmem [#allocation17], %s7169_s16 }
 0x103   : > { %6418 = dma.hbm_to_vmem [thread:$0]  (!%p7127_p5), %s7371_s27, 1024, %s7374_s2, %s8348_s0, %s8335_s15, %s8335_s15, %s8340_s9  }
 0x104   : > { %s741_s26 = sshll.u32 %s734_s13, 4  ;;  %s6860_s8 = scalar_lea.hbm %s7380_s11, 1024  ;;  %s742_s26 = int_to_ptr.vmem [resolvable:$true] %s741_s26 }
 0x105   : > { %p6861_p8 = scmp.ne.s32.totalorder %s7380_s11, %s6860_s8  ;;  %s6865_s1 = scalar_lea.hbm %s8347_s14, 2048 }
 0x106   : > { %p6866_p6 = scmp.lt.s32.totalorder %s7380_s11, %s8347_s14  ;;  %p6867_p9 = scmp.lt.s32.totalorder %s6865_s1, %s6860_s8 }
 0x107   : > { %p6863_p0 = pnand %p6861_p8, %p7144_p7 }
 0x108   : > { %p6868_p11 = por %p6867_p9, %p6866_p6 }
 0x109   : > { %p6864_p1 = pneg %p6863_p0 }
 0x10b   : > { %p6869_p3 = pnand %p6868_p11, %p6864_p1 }
 0x10d   : > { %6872 = shalt.err (!%p6869_p3)
}
 0x10e   : > { %s6873_s16 = scalar_lea.vmem %s742_s26, 1024  ;;  %s6982_s27 = smov [#allocation17]  }
 0x10f   : > { %p6874_p4 = scmp.ne.s32.totalorder %s742_s26, %s6873_s16  ;;  %s6878_s2 = sshll.u32 %s6982_s27, 4  ;;  %s6879_s2 = int_to_ptr.vmem [resolvable:$false] %s6878_s2 }
 0x110   : > { %s6880_s24 = scalar_lea.vmem %s6879_s2, 2048  ;;  %p6881_p13 = scmp.lt.s32.totalorder %s742_s26, %s6879_s2 }
 0x111   : > { %p6876_p10 = pnand %p6874_p4, %p7144_p7  ;;  %p6882_p2 = scmp.lt.s32.totalorder %s6880_s24, %s6873_s16 }
 0x113   : > { %p6877_p12 = pneg %p6876_p10  ;;  %p6883_p8 = por %p6882_p2, %p6881_p13 }
 0x115   : > { %p6884_p0 = pnand %p6883_p8, %p6877_p12 }
 0x117   : > { %6887 = shalt.err (!%p6884_p0)
}
 0x118   : > { %s8349_s29 = scalar_lea.sflag [#allocation16], %s7121_s21  ;;  %p8350_p7 = scmp.ne.s32.totalorder %s8337_s3, 0 }
 0x119   : > { %6424 = dma.hbm_to_vmem [thread:$0]  (!%p7127_p5), %s7380_s11, 1024, %s742_s26, %s8349_s29, %s8335_s15, %s8335_s15, %s8340_s9  }
 0x11a   : > { %773 = sbr.rel (%p8350_p7) target bundleno = 10266 (0x281a), region = 92 }
 0x11f   : > { %p8351_p1 = scmp.eq.s32.totalorder %s7277_s6, 0 }
 0x121   : > { %6929 = dma.done.wait (%p8351_p1), [#allocation4], 256   ;;  %p8352_p6 = pmov %p8351_p1 }
 0x122   : > { %s779_s17 = sand.u32 1, %s7277_s6   ;;  %s7437_s23 = sand.u32 1, %s6958_s28  }
 0x123   : > { %6931 = vsyncadd (%p8352_p6), [#allocation4], 4294967040  ;;  %s6370_s18 = smul.u32 192, %s7437_s23  ;;  %s780_s21 = scalar_lea.sflag [#allocation7], %s779_s17 }
 0x124   : > { %p8353_p5 = scmp.ne.s32.totalorder %s8336_s20, 0 }
 0x125   : > { %s7440_s4 = scalar_lea.vmem [#allocation6], %s6370_s18 }
 0x126   : > { %6933 = dma.done.wait (%p8353_p5), %s780_s21, 4096  }
 0x127   : > { %6935 = vsyncadd (%p8353_p5), %s780_s21, 4294963200  ;;  %s7447_s15 = sshll.u32 %s7437_s23, 6  ;;  %s798_s9 = scalar_lea.sflag [#allocation10], %s779_s17 }
 0x128   : > { %s7450_s3 = scalar_lea.vmem [#allocation8], %s7447_s15  ;;  %s7453_s11 = scalar_lea.vmem [#allocation9], %s7447_s15 }
 0x129   : > { %6937 = dma.done.wait (%p8353_p5), %s798_s9, 1040  }
 0x12a   : > { %6939 = vsyncadd (%p8353_p5), %s798_s9, 4294966256  ;;  %s5689_s25 = sshll.u32 %s7437_s23, 7  ;;  %s815_s13 = scalar_lea.sflag [#allocation13], %s779_s17 }
 0x12b   : > { %s7461_s26 = scalar_lea.vmem [#allocation12], %s5689_s25 }
 0x12c   : > { %6941 = dma.done.wait (%p8353_p5), %s815_s13, 3072  }
 0x12d   : > { %6943 = vsyncadd (%p8353_p5), %s815_s13, 4294964224  ;;  %s7468_s8 = scalar_lea.vmem [#allocation14], %s7447_s15  ;;  %s833_s12 = scalar_lea.sflag [#allocation16], %s779_s17 }
 0x12e   : > { %8354 = sst [smem:[#allocation29_spill]] %s7468_s8  ;;  %s7471_s19 = scalar_lea.vmem [#allocation15], %s7447_s15 }
 0x12f   : > { %8355 = sst [smem:[#allocation30_spill]] %s7471_s19 }
 0x130   : > { %6945 = dma.done.wait (%p8353_p5), %s833_s12, 2048  }
 0x131   : > { %6947 = vsyncadd (%p8353_p5), %s833_s12, 4294965248  ;;  %p955_p9 = scmp.lt.s32.totalorder %s7277_s6, 1  ;;  %s8357_s9 = sld [smem:[#allocation34_spill]] }
 0x132   : > { %s8358_s0 = sld [smem:[#allocation39_spill]]  ;;  %p8363_p11 = scmp.ne.s32.totalorder %s7277_s6, 0 }
 0x133   : > { %s7479_s1 = scalar_select %p955_p9, %s7277_s6, 1 }
 0x134   : > { %s8359_s28 = sld [smem:[#allocation43_spill]] }
 0x135   : > { %s6371_s30 = smul.u32 3, %s7479_s1  ;;  %s5693_s20 = sshll.u32 %s7479_s1, 1 }
 0x136   : > { %s8360_s19 = sld [smem:[#allocation45_spill]]  ;;  %s5694_s2 = sshll.u32 %s7479_s1, 2 }
 0x137   : > { %s7494_s25 = scalar_lea.vmem %s8357_s9, %s6371_s30  ;;  %s8361_s17 = sld [smem:[#allocation46_spill]] }
 0x138   : > { %s7499_s7 = scalar_lea.vmem %s8358_s0, %s5693_s20  ;;  %s8362_s9 = sld [smem:[#allocation47_spill]] }
 0x139   : > { %s7521_s0 = scalar_lea.vmem [#allocation17], %s7447_s15 }
 0x13a   : > { %s971_s22 = scalar_lea.vmem %s8359_s28, %s7479_s1  ;;  %987 = sbr.rel (%p8363_p11) target bundleno = 324 (0x144), region = 132 }
 0x13b   : > { %s8364_s28 = sld [smem:[#allocation31_spill]] (!%p8363_p11) }
 0x13c   : > { %s974_s8 = scalar_lea.vmem %s8360_s19, %s7479_s1 }
 0x13d   : > { %s7513_s18 = scalar_lea.vmem %s8361_s17, %s5694_s2 }
 0x13e   : > { %s7518_s13 = scalar_lea.vmem %s8362_s9, %s5694_s2 }
 0x141   : > { %s8365_s20 = smov %s8364_s28  ;;  %v988_v0 = vld [vmem:[%s8364_s28] sm:$0xff] }
 0x142   : > { %v989_v1 = vld [vmem:[%s8365_s20 + $0x8] sm:$0xff]  ;;  %990 = vst [vmem:[#allocation2] sm:$0xff] %v988_v0 }
 0x143   : > { %991 = vst [vmem:[#allocation2 + $0x8] sm:$0xff] %v989_v1 }
 0x144 PF: > { %v6478_v2 = vld [vmem:[%s7440_s4 + $0xac] ss:$12 sps:$4 sm:$0xff]   ;;  %v6480_v3 = vld [vmem:[%s7440_s4 + $0xa8] ss:$12 sps:$4 sm:$0xff]   ;;  %v6983_v4 = vmov 0   ;;  %v6984_v22 = vmov 0.0   ;;  %v994_v23 = vlaneseq  ;;  %s8366_s12 = scalar_lea.vmem %s8272_s5, %s7479_s1 }
 0x145   : > { %1211 = vmatprep.mubr.bf16.mxu0 %v6983_v4  ;;  %1179 = vmatprep.subr.bf16.mxu0 %v6478_v2  ;;  %v6481_v5 = vld [vmem:[%s7440_s4 + $0x94] ss:$12 sps:$4 sm:$0xff]   ;;  %v6483_v6 = vld [vmem:[%s7440_s4 + $0x90] ss:$12 sps:$4 sm:$0xff]   ;;  %v6486_v8 = vld [vmem:[%s7440_s4 + $0x78] ss:$12 sps:$4 sm:$0xff]  }
 0x146   : > { %1180 = vmatpush1.bf16.msra.mxu0 %v6480_v3  ;;  %v6484_v7 = vld [vmem:[%s7440_s4 + $0x7c] ss:$12 sps:$4 sm:$0xff]   ;;  %v6487_v9 = vld [vmem:[%s7440_s4 + $0x64] ss:$12 sps:$4 sm:$0xff]   ;;  %v6489_v10 = vld [vmem:[%s7440_s4 + $0x60] ss:$12 sps:$4 sm:$0xff]   ;;  %6000 = vmatprep.subr.bf16.mxu1 %v6984_v22 }
 0x147   : > { %1181 = vmatprep.subr.bf16.mxu0 %v6481_v5  ;;  %v6490_v11 = vld [vmem:[%s7440_s4 + $0x4c] ss:$12 sps:$4 sm:$0xff]   ;;  %v6492_v12 = vld [vmem:[%s7440_s4 + $0x48] ss:$12 sps:$4 sm:$0xff]   ;;  %v6495_v14 = vld [vmem:[%s7440_s4 + $0x30] ss:$12 sps:$4 sm:$0xff]  }
 0x148   : > { %v6493_v13 = vld [vmem:[%s7440_s4 + $0x34] ss:$12 sps:$4 sm:$0xff]   ;;  %v6496_v15 = vld [vmem:[%s7440_s4 + $0x1c] ss:$12 sps:$4 sm:$0xff]   ;;  %v6498_v16 = vld [vmem:[%s7440_s4 + $0x18] ss:$12 sps:$4 sm:$0xff]  }
 0x149   : > { %v6499_v17 = vld [vmem:[%s7440_s4 + $0x4] ss:$12 sps:$4 sm:$0xff]   ;;  %v6501_v18 = vld [vmem:[%s7440_s4] ss:$12 sps:$4 sm:$0xff]   ;;  %vm6985_vm0 = vmmov 0   ;;  %v7561_v24 = vshrl.u32 %v994_v23, 7 }
 0x14a   : > { %1182 = vmatpush1.bf16.msra.mxu0 %v6483_v6  ;;  %v7548_v19 = vld [vmem:[#allocation2] sm:$0xff]  ;;  %v7550_v20 = vld [vmem:[#allocation2 + $0x8] sm:$0xff]  ;;  %6016 = vmatprep.mubr.msk.bf16.mxu1 %vm6985_vm0, %v6984_v22  ;;  %vm1268_vm1 = vcmask 64512   ;;  %s6986_s15 = smov 120   ;;  %v6502_v36 = vld [vmem:[%s7440_s4 + $0xb0] ss:$12 sps:$4 sm:$0xff]  }
 0x14b   : > { %1183 = vmatprep.subr.bf16.mxu0 %v6484_v7  ;;  %v1033_v21 = vpack.c.bf16 %v7550_v20, %v7548_v19  ;;  %v7564_v25 = vsub.s32 1, %v7561_v24  ;;  %v7567_v26 = vld [vmem:[%s7494_s25] sm:$0x7]  ;;  %v7570_v27 = vsub.s32 0, %v7561_v24  ;;  %6001 = vmatpush3.bf16.msra.mxu1 %v6502_v36  ;;  %v6503_v37 = vld [vmem:[%s7440_s4 + $0x98] ss:$12 sps:$4 sm:$0xff]  }
 0x14c   : > { %6002 = vmatprep.subr.bf16.mxu1 %v6984_v22  ;;  %v6504_v38 = vld [vmem:[%s7440_s4 + $0x80] ss:$12 sps:$4 sm:$0xff]   ;;  %v6505_v39 = vld [vmem:[%s7440_s4 + $0x68] ss:$12 sps:$4 sm:$0xff]   ;;  %v6506_v40 = vld [vmem:[%s7440_s4 + $0x50] ss:$12 sps:$4 sm:$0xff]  }
 0x14d   : > { %v7574_v28 = vrot.slane %v7567_v26, %v7564_v25  ;;  %v1039_v30 = vrot.slane %v7567_v26, %v7570_v27  ;;  %v6507_v41 = vld [vmem:[%s7440_s4 + $0x38] ss:$12 sps:$4 sm:$0xff]   ;;  %v6508_v42 = vld [vmem:[%s7440_s4 + $0x20] ss:$12 sps:$4 sm:$0xff]   ;;  %v6509_v43 = vld [vmem:[%s7440_s4 + $0x8] ss:$12 sps:$4 sm:$0xff]  }
 0x14e   : > { %1184 = vmatpush1.bf16.msra.mxu0 %v6486_v8  ;;  %v7624_v58 = vsub.s32 2, %v7561_v24  ;;  %s6987_s4 = smov 112   ;;  %vm1602_vm2 = vcmask 1043456   ;;  %s6988_s17 = smov 104   ;;  %vm3379_vm4 = vcmask 130048  }
 0x14f   : > { %1185 = vmatprep.subr.bf16.mxu0 %v6487_v9  ;;  %6003 = vmatpush3.bf16.msra.mxu1 %v6503_v37  ;;  %s8369_s16 = sld [smem:[#allocation41_spill]]  ;;  %p5841_p3 = scmp.ne.s32.totalorder %s7277_s6, 1 }
 0x150   : > { %6004 = vmatprep.subr.bf16.mxu1 %v6984_v22  ;;  %v1047_v60 = vrot.slane %v7567_v26, %v7624_v58  ;;  %s8371_s24 = sld [smem:[#allocation30_spill]] }
 0x152   : > { %1186 = vmatpush1.bf16.msra.mxu0 %v6489_v10 }
 0x153   : > { %1187 = vmatprep.subr.bf16.mxu0 %v6490_v11  ;;  %6005 = vmatpush3.bf16.msra.mxu1 %v6504_v38 }
 0x154   : > { %6006 = vmatprep.subr.bf16.mxu1 %v6984_v22 }
 0x155   : > { %s8370_s2 = scalar_lea.vmem %s8369_s16, %s7479_s1 }
 0x156   : > { %1188 = vmatpush1.bf16.msra.mxu0 %v6492_v12 }
 0x157   : > { %1189 = vmatprep.subr.bf16.mxu0 %v6493_v13  ;;  %6007 = vmatpush3.bf16.msra.mxu1 %v6505_v39  ;;  %v1264_v13 = vld [vmem:[%s7450_s3 + $0x4] sm:$0xf] }
 0x158   : > { %6008 = vmatprep.subr.bf16.mxu1 %v6984_v22 }
 0x15a   : > { %1190 = vmatpush1.bf16.msra.mxu0 %v6495_v14  ;;  %v7649_v14 = vsel %vm1602_vm2, %v1264_v13, 0 }
 0x15b   : > { %1191 = vmatprep.subr.bf16.mxu0 %v6496_v15  ;;  %6009 = vmatpush3.bf16.msra.mxu1 %v6506_v40 }
 0x15c   : > { %6010 = vmatprep.subr.bf16.mxu1 %v6984_v22 }
 0x15e   : > { %1192 = vmatpush1.bf16.msra.mxu0 %v6498_v16 }
 0x15f   : > { %1193 = vmatprep.subr.bf16.mxu0 %v6499_v17  ;;  %6011 = vmatpush3.bf16.msra.mxu1 %v6507_v41  ;;  %v1263_v17 = vld [vmem:[%s7450_s3] sm:$0xf] }
 0x160   : > { %6012 = vmatprep.subr.bf16.mxu1 %v6984_v22  ;;  %v7656_v24 = vsel %vm1602_vm2, %v1263_v17, 0 }
 0x162   : > { %1194 = vmatpush1.bf16.msra.mxu0 %v6501_v18 }
 0x163   : > { %6020 = vmatprep.subr.mxu0 %v6984_v22  ;;  %6013 = vmatpush3.bf16.msra.mxu1 %v6508_v42 }
 0x164   : > { %6014 = vmatprep.subr.bf16.mxu1 %v6984_v22 }
 0x165   : > { %1212 = vmatmul.mubr.bf16.vlgmr.msra.gmra.mxu0 %v1033_v21 }
 0x166   : > { %6022 = vmatprep.mubr.msk.f32.mxu0 %vm6985_vm0, %v6984_v22 }
 0x167   : > { %6015 = vmatpush3.bf16.msra.mxu1 %v6509_v43 }
 0x168   : > { %6025 = vmatprep.subr.mxu1 %v6984_v22 }
 0x16a   : > { %6017 = vmatmul.mubr.bf16.vlgmr.msra.gmra.mxu1 %v1033_v21 }
 0x16b   : > { %6027 = vmatprep.mubr.msk.f32.mxu1 %vm6985_vm0, %v6984_v22 }
 0x225   : > { %v1213_v29 = vpop.f32.mrf.mxu0 }
 0x226   : > { %v7587_v35 = vadd.f32 %v1213_v29, %v1039_v30 }
 0x227   : > { %v1215_v31 = vpop.f32.mrf.mxu0 }
 0x228   : > { %v7579_v32 = vadd.f32 %v1215_v31, %v7574_v28 }
 0x229   : > { %v1217_v33 = vpop.f32.mrf.mxu0 }
 0x22a   : > { %v7581_v34 = vadd.f32 %v1217_v33, %v1039_v30  ;;  %1433 = vrot.lane.b32.xlu0 %v7579_v32, %s6986_s15  ;;  %6021 = vmatpush3.xpose.msk.msra.mxu0 %vm1268_vm1, %v7579_v32  ;;  %v1256_v59 = vpop.f32.mrf.mxu1 }
 0x22b   : > { %6030 = vmatprep.subr.mxu0 %v6984_v22  ;;  %v7619_v46 = vpop.f32.mrf.mxu0  ;;  %v7628_v62 = vadd.f32 %v1256_v59, %v1047_v60 }
 0x22c   : > { %v6018_v61 = vpop.f32.mrf.mxu1 }
 0x22d   : > { %6023 = vmatmul.mubr.msk.f32.vlgmr.msra.gmra.mxu0 %vm1268_vm1, %v7587_v35  ;;  %6026 = vmatpush3.msra.mxu1 %v7628_v62 }
 0x22e   : > { %1431 = vrot.lane.b32.xlu0 %v7587_v35, %s6986_s15  ;;  %6032 = vmatprep.mubr.msk.f32.mxu0 %vm6985_vm0, %v6984_v22  ;;  %v1259_v1 = vpop.f32.mrf.mxu1 }
 0x22f   : > { %6035 = vmatprep.subr.mxu1 %v6984_v22  ;;  %v7633_v2 = vadd.f32 %v1259_v1, %v1047_v60 }
 0x230   : > { %v6019_v3 = vpop.f32.mrf.mxu1 }
 0x29c   : > { %v1434_v44 = vpop.permute.xlu0 %1433 }
 0x29d   : > { %6031 = vmatpush3.xpose.msk.msra.mxu0 %vm1268_vm1, %v1434_v44 }
 0x29e   : > { %6040 = vmatprep.subr.bf16.mxu0 %v6984_v22 }
 0x2a0   : > { %v1432_v45 = vpop.permute.xlu0 %1431 }
 0x2a1   : > { %6033 = vmatmul.mubr.msk.f32.vlgmr.msra.gmra.mxu0 %vm1268_vm1, %v1432_v45 }
 0x2a2   : > { %6042 = vmatprep.mubr.msk.bf16.mxu0 %vm6985_vm0, %v6984_v22  ;;  %6041 = vmatpush3.bf16.msra.mxu0 %v7649_v14 }
 0x2a3   : > { %6052 = vmatprep.subr.mxu0 %v6984_v22 }
 0x2ed   : > { %v1341_v47 = vpop.f32.mrf.mxu0 }
 0x2ee   : > { %v1345_v48 = vmul.f32 0.35355338, %v1341_v47 }
 0x2ef   : > { %v6024_v49 = vpop.f32.mrf.mxu0 }
 0x2f0   : > { %v1346_v50 = vsel %vm1268_vm1, %v1345_v48, -inf }
 0x2f1   : > { %1347 = vmax.xlane.f32.xlu1 %v1346_v50 }
 0x361   : > { %v1505_v51 = vpop.f32.mrf.mxu0 }
 0x362   : > { %v1509_v52 = vmul.f32 0.35355338, %v1505_v51 }
 0x363   : > { %v6034_v53 = vpop.f32.mrf.mxu0 }
 0x364   : > { %v1510_v54 = vsel %vm1268_vm1, %v1509_v52, -inf }
 0x365   : > { %1511 = vmax.xlane.f32.xlu1 %v1510_v54 }
 0x37a   : > { %v1348_v55 = vpop.xlane.xlu1 %1347 }
 0x37b   : > { %v1349_v56 = vsub.f32 %v1345_v48, %v1348_v55 }
 0x37d   : > { %v1350_v57 = vmul.f32 1.442695, %v1349_v56 }
 0x37f   : > { %6560 = vpow2.f32 %v1350_v57 }
 0x38c   : > { %v6561_v63 = vpop.eup %6560 }
 0x38d   : > { %v1352_v0 = vsel %vm1268_vm1, %v6561_v63, 0.0 }
 0x38e   : > { %1353 = vadd.xlane.f32.xlu0 %v1352_v0 }
 0x3a4   : > { %1782 = vrot.lane.b32.xlu0 %v7628_v62, %s6987_s4 }
 0x3ee   : > { %v1512_v5 = vpop.xlane.xlu1 %1511 }
 0x3ef   : > { %v1513_v6 = vsub.f32 %v1509_v52, %v1512_v5 }
 0x3f1   : > { %v1514_v7 = vmul.f32 1.442695, %v1513_v6 }
 0x3f3   : > { %6562 = vpow2.f32 %v1514_v7 }
 0x400   : > { %v6563_v8 = vpop.eup %6562 }
 0x401   : > { %v1516_v9 = vsel %vm1268_vm1, %v6563_v8, 0.0 }
 0x402   : > { %1517 = vadd.xlane.f32.xlu1 %v1516_v9 }
 0x413   : > { %1522 = vrot.lane.b32.xlu1 %v7628_v62, %s6986_s15 }
 0x417   : > { %v1354_v10 = vpop.xlane.xlu0 %1353  ;;  %1694 = vrot.lane.b32.xlu1 %v7579_v32, %s6987_s4 }
 0x418   : > { %6564 = vrcp.f32 %v1354_v10 }
 0x41b   : > { %1692 = vrot.lane.b32.xlu1 %v7587_v35, %s6987_s4  ;;  %v1783_v31 = vpop.permute.xlu0 %1782 }
 0x425   : > { %v6565_v11 = vpop.eup %6564 }
 0x426   : > { %v1356_v12 = vmul.f32 %v6565_v11, %v6561_v63 }
 0x428   : > { %6028 = vmatmul.mubr.msk.f32.vlgmr.msra.gmra.mxu1 %vm1268_vm1, %v1356_v12 }
 0x429   : > { %6037 = vmatprep.mubr.msk.f32.mxu1 %vm6985_vm0, %v6984_v22 }
 0x48b   : > { %v1518_v15 = vpop.xlane.xlu1 %1517 }
 0x48c   : > { %6566 = vrcp.f32 %v1518_v15 }
 0x48f   : > { %v1523_v16 = vpop.permute.xlu1 %1522 }
 0x490   : > { %6036 = vmatpush3.msra.mxu1 %v1523_v16  ;;  %v7704_v16 = vadd.f32 %v7619_v46, %v7574_v28 }
 0x491   : > { %6046 = vmatprep.subr.bf16.mxu1 %v6984_v22 }
 0x493   : > { %v1695_v38 = vpop.permute.xlu1 %1694 }
 0x497   : > { %v1693_v39 = vpop.permute.xlu1 %1692 }
 0x499   : > { %v6567_v18 = vpop.eup %6566 }
 0x49a   : > { %v1520_v21 = vmul.f32 %v6567_v18, %v6563_v8 }
 0x49c   : > { %6038 = vmatmul.mubr.msk.f32.vlgmr.msra.gmra.mxu1 %vm1268_vm1, %v1520_v21 }
 0x49d   : > { %6047 = vmatpush3.bf16.msra.mxu1 %v7656_v24  ;;  %6048 = vmatprep.mubr.msk.bf16.mxu1 %vm6985_vm0, %v6984_v22 }
 0x49e   : > { %6057 = vmatprep.subr.mxu1 %v6984_v22 }
 0x4e8   : > { %v1426_v26 = vpop.f32.mrf.mxu1 }
 0x4e9   : > { %v1430_v29 = vpack.c.bf16 %v1426_v26, %v1426_v26  ;;  %v1266_v26 = vld [vmem:[%s7450_s3 + $0xc] sm:$0xf] }
 0x4ea   : > { %v6029_v30 = vpop.f32.mrf.mxu1 }
 0x4eb   : > { %6049 = vmatmul.mubr.msk.bf16.vlgmr.msra.gmra.mxu1 %vm1268_vm1, %v1430_v29  ;;  %v7712_v30 = vsel %vm1602_vm2, %v1266_v26, 0 }
 0x4ec   : > { %6058 = vmatpush3.msra.mxu1 %v1783_v31  ;;  %6059 = vmatprep.mubr.msk.f32.mxu1 %vm6985_vm0, %v6984_v22 }
 0x4ed   : > { %6068 = vmatprep.subr.mxu1 %v6984_v22 }
 0x55c   : > { %v1594_v33 = vpop.f32.mrf.mxu1 }
 0x55d   : > { %v1598_v36 = vpack.c.bf16 %v1594_v33, %v1594_v33 }
 0x55e   : > { %v6039_v37 = vpop.f32.mrf.mxu1 }
 0x55f   : > { %6043 = vmatmul.mubr.msk.bf16.vlgmr.msra.gmra.mxu0 %vm1268_vm1, %v1598_v36 }
 0x560   : > { %6053 = vmatpush3.xpose.msk.msra.mxu0 %vm1268_vm1, %v1695_v38  ;;  %6054 = vmatprep.mubr.msk.f32.mxu0 %vm6985_vm0, %v6984_v22 }
 0x561   : > { %6062 = vmatprep.subr.bf16.mxu0 %v6984_v22 }
 0x567   : > { %6055 = vmatmul.mubr.msk.f32.vlgmr.msra.gmra.mxu0 %vm1268_vm1, %v1693_v39 }
 0x568   : > { %6064 = vmatprep.mubr.msk.bf16.mxu0 %vm6985_vm0, %v6984_v22 }
 0x5ab   : > { %v1686_v40 = vpop.f32.mrf.mxu1 }
 0x5ad   : > { %v6050_v41 = vpop.f32.mrf.mxu1 }
 0x5af   : > { %v1689_v42 = vpop.f32.mrf.mxu1 }
 0x5b1   : > { %v6051_v43 = vpop.f32.mrf.mxu1 }
 0x61f   : > { %v1640_v44 = vpop.f32.mrf.mxu0 }
 0x620   : > { %v1687_v17 = vadd.f32 %v1686_v40, %v1640_v44 }
 0x621   : > { %v6044_v45 = vpop.f32.mrf.mxu0 }
 0x623   : > { %v1643_v47 = vpop.f32.mrf.mxu0 }
 0x625   : > { %v6045_v48 = vpop.f32.mrf.mxu0 }
 0x627   : > { %v1766_v49 = vpop.f32.mrf.mxu0 }
 0x628   : > { %v1770_v50 = vmul.f32 0.35355338, %v1766_v49 }
 0x629   : > { %v6056_v51 = vpop.f32.mrf.mxu0 }
 0x62a   : > { %v1771_v52 = vsel %vm1268_vm1, %v1770_v50, -inf }
 0x62b   : > { %1772 = vmax.xlane.f32.xlu1 %v1771_v52 }
 0x6b4   : > { %v1773_v53 = vpop.xlane.xlu1 %1772 }
 0x6b5   : > { %v1774_v54 = vsub.f32 %v1770_v50, %v1773_v53 }
 0x6b7   : > { %v1775_v55 = vmul.f32 1.442695, %v1774_v54 }
 0x6b9   : > { %6568 = vpow2.f32 %v1775_v55 }
 0x6c6   : > { %v6569_v56 = vpop.eup %6568 }
 0x6c7   : > { %v1777_v57 = vsel %vm1268_vm1, %v6569_v56, 0.0 }
 0x6c8   : > { %1778 = vadd.xlane.f32.xlu0 %v1777_v57 }
 0x6de   : > { %1908 = vrot.lane.b32.xlu0 %v7579_v32, %s6988_s17  ;;  %v1265_v32 = vld [vmem:[%s7450_s3 + $0x8] sm:$0xf] }
 0x6e2   : > { %1906 = vrot.lane.b32.xlu0 %v7587_v35, %s6988_s17  ;;  %v7691_v35 = vsel %vm1602_vm2, %v1265_v32, 0 }
 0x6e3   : > { %6063 = vmatpush3.bf16.msra.mxu0 %v7691_v35 }
 0x6e4   : > { %6078 = vmatprep.subr.bf16.mxu0 %v6984_v22 }
 0x751   : > { %v1779_v59 = vpop.xlane.xlu0 %1778 }
 0x752   : > { %6570 = vrcp.f32 %v1779_v59 }
 0x755   : > { %v1909_v61 = vpop.permute.xlu0 %1908 }
 0x759   : > { %v1907_v0 = vpop.permute.xlu0 %1906 }
 0x75f   : > { %v6571_v60 = vpop.eup %6570 }
 0x760   : > { %v1781_v63 = vmul.f32 %v6571_v60, %v6569_v56 }
 0x762   : > { %6060 = vmatmul.mubr.msk.f32.vlgmr.msra.gmra.mxu1 %vm1268_vm1, %v1781_v63 }
 0x763   : > { %6069 = vmatpush3.xpose.msk.msra.mxu1 %vm1268_vm1, %v1909_v61  ;;  %6070 = vmatprep.mubr.msk.f32.mxu1 %vm6985_vm0, %v6984_v22 }
 0x764   : > { %6073 = vmatprep.subr.mxu1 %v6984_v22 }
 0x766   : > { %6071 = vmatmul.mubr.msk.f32.vlgmr.msra.gmra.mxu1 %vm1268_vm1, %v1907_v0 }
 0x767   : > { %6075 = vmatprep.mubr.msk.f32.mxu1 %vm6985_vm0, %v6984_v22 }
 0x822   : > { %v1854_v1 = vpop.f32.mrf.mxu1 }
 0x823   : > { %v1858_v3 = vpack.c.bf16 %v1854_v1, %v1854_v1 }
 0x824   : > { %v6061_v5 = vpop.f32.mrf.mxu1 }
 0x825   : > { %6065 = vmatmul.mubr.msk.bf16.vlgmr.msra.gmra.mxu0 %vm1268_vm1, %v1858_v3 }
 0x826   : > { %v1980_v6 = vpop.f32.mrf.mxu1  ;;  %6080 = vmatprep.mubr.msk.bf16.mxu0 %vm6985_vm0, %v6984_v22  ;;  %6079 = vmatpush3.bf16.msra.mxu0 %v7712_v30 }
 0x827   : > { %v1984_v7 = vmul.f32 0.35355338, %v1980_v6  ;;  %6094 = vmatprep.subr.mxu0 %v6984_v22 }
 0x828   : > { %v6072_v8 = vpop.f32.mrf.mxu1 }
 0x829   : > { %v1985_v9 = vsel %vm1268_vm1, %v1984_v7, -inf }
 0x82a   : > { %1986 = vmax.xlane.f32.xlu0 %v1985_v9 }
 0x8b3   : > { %v1987_v10 = vpop.xlane.xlu0 %1986 }
 0x8b4   : > { %v1988_v11 = vsub.f32 %v1984_v7, %v1987_v10 }
 0x8b6   : > { %v1989_v12 = vmul.f32 1.442695, %v1988_v11 }
 0x8b8   : > { %6572 = vpow2.f32 %v1989_v12 }
 0x8c5   : > { %v6573_v13 = vpop.eup %6572 }
 0x8c6   : > { %v1991_v15 = vsel %vm1268_vm1, %v6573_v13, 0.0 }
 0x8c7   : > { %1992 = vadd.xlane.f32.xlu1 %v1991_v15 }
 0x8d8   : > { %1996 = vrot.lane.b32.xlu1 %v7628_v62, %s6988_s17 }
 0x8dc   : > { %2284 = vrot.lane.b32.xlu1 %v7704_v16, %s6986_s15 }
 0x8e0   : > { %2282 = vrot.lane.b32.xlu1 %v7581_v34, %s6986_s15 }
 0x8e5   : > { %v1899_v18 = vpop.f32.mrf.mxu0 }
 0x8e6   : > { %v1905_v21 = vadd.f32 %v1899_v18, %v1687_v17 }
 0x8e7   : > { %v6066_v29 = vpop.f32.mrf.mxu0 }
 0x8e9   : > { %v1902_v62 = vpop.f32.mrf.mxu0 }
 0x8eb   : > { %v6067_v28 = vpop.f32.mrf.mxu0 }
 0x950   : > { %v1993_v46 = vpop.xlane.xlu1 %1992 }
 0x951   : > { %6574 = vrcp.f32 %v1993_v46 }
 0x954   : > { %v1997_v31 = vpop.permute.xlu1 %1996 }
 0x955   : > { %6074 = vmatpush3.msra.mxu1 %v1997_v31 }
 0x956   : > { %6084 = vmatprep.subr.mxu1 %v6984_v22 }
 0x958   : > { %v2285_v40 = vpop.permute.xlu1 %2284 }
 0x95c   : > { %v2283_v45 = vpop.permute.xlu1 %2282 }
 0x95e   : > { %v6575_v33 = vpop.eup %6574 }
 0x95f   : > { %v1995_v36 = vmul.f32 %v6575_v33, %v6573_v13 }
 0x961   : > { %6076 = vmatmul.mubr.msk.f32.vlgmr.msra.gmra.mxu1 %vm1268_vm1, %v1995_v36 }
 0x962   : > { %6085 = vmatpush3.xpose.msk.msra.mxu1 %vm1268_vm1, %v7704_v16  ;;  %6086 = vmatprep.mubr.msk.f32.mxu1 %vm6985_vm0, %v6984_v22 }
 0x963   : > { %6089 = vmatprep.subr.mxu1 %v6984_v22 }
 0x965   : > { %6087 = vmatmul.mubr.msk.f32.vlgmr.msra.gmra.mxu1 %vm1268_vm1, %v7581_v34 }
 0x966   : > { %6090 = vmatpush3.msra.mxu1 %v7633_v2  ;;  %6091 = vmatprep.mubr.msk.f32.mxu1 %vm6985_vm0, %v6984_v22 }
 0x967   : > { %6099 = vmatprep.subr.mxu1 %v6984_v22 }
 0xa21   : > { %v2068_v37 = vpop.f32.mrf.mxu1 }
 0xa22   : > { %v2072_v38 = vpack.c.bf16 %v2068_v37, %v2068_v37 }
 0xa23   : > { %v6077_v39 = vpop.f32.mrf.mxu1 }
 0xa24   : > { %6081 = vmatmul.mubr.msk.bf16.vlgmr.msra.gmra.mxu0 %vm1268_vm1, %v2072_v38 }
 0xa25   : > { %6095 = vmatpush3.xpose.msk.msra.mxu0 %vm1268_vm1, %v2285_v40  ;;  %v2192_v41 = vpop.f32.mrf.mxu1  ;;  %6096 = vmatprep.mubr.msk.f32.mxu0 %vm6985_vm0, %v6984_v22 }
 0xa26   : > { %v2196_v42 = vmul.f32 0.35355338, %v2192_v41  ;;  %6104 = vmatprep.subr.bf16.mxu0 %v6984_v22 }
 0xa27   : > { %v6088_v43 = vpop.f32.mrf.mxu1 }
 0xa28   : > { %v2197_v44 = vsel %vm1268_vm1, %v2196_v42, -inf }
 0xa29   : > { %2198 = vmax.xlane.f32.xlu1 %v2197_v44 }
 0xa2c   : > { %6097 = vmatmul.mubr.msk.f32.vlgmr.msra.gmra.mxu0 %vm1268_vm1, %v2283_v45 }
 0xa2d   : > { %6105 = vmatpush3.bf16.msra.mxu0 %v7649_v14  ;;  %6106 = vmatprep.mubr.msk.bf16.mxu0 %vm6985_vm0, %v6984_v22 }
 0xa2e   : > { %6116 = vmatprep.subr.mxu0 %v6984_v22 }
 0xa3a   : > { %2536 = vrot.lane.b32.xlu1 %v7581_v34, %s6987_s4 }
 0xab2   : > { %v2199_v47 = vpop.xlane.xlu1 %2198 }
 0xab3   : > { %v2200_v48 = vsub.f32 %v2196_v42, %v2199_v47 }
 0xab5   : > { %v2201_v49 = vmul.f32 1.442695, %v2200_v48 }
 0xab7   : > { %6576 = vpow2.f32 %v2201_v49 }
 0xac4   : > { %v6577_v59 = vpop.eup %6576 }
 0xac5   : > { %v2203_v60 = vsel %vm1268_vm1, %v6577_v59, 0.0 }
 0xae4   : > { %v2113_v50 = vpop.f32.mrf.mxu0 }
 0xae5   : > { %v7742_v51 = vadd.f32 %v2113_v50, %v1905_v21 }
 0xae6   : > { %v6082_v52 = vpop.f32.mrf.mxu0 }
 0xae8   : > { %v2116_v53 = vpop.f32.mrf.mxu0 }
 0xaea   : > { %v6083_v54 = vpop.f32.mrf.mxu0 }
 0xaec   : > { %v2356_v55 = vpop.f32.mrf.mxu0 }
 0xaed   : > { %v2360_v14 = vmul.f32 0.35355338, %v2356_v55 }
 0xaee   : > { %v6098_v56 = vpop.f32.mrf.mxu0 }
 0xaef   : > { %v2361_v57 = vsel %vm1268_vm1, %v2360_v14, -inf }
 0xaf0   : > { %2362 = vmax.xlane.f32.xlu0 %v2361_v57 }
 0xaf4   : > { %2204 = vadd.xlane.f32.xlu0 %v2203_v60 }
 0xb79   : > { %v2363_v61 = vpop.xlane.xlu0 %2362 }
 0xb7a   : > { %v2364_v63 = vsub.f32 %v2360_v14, %v2363_v61 }
 0xb7c   : > { %v2365_v0 = vmul.f32 1.442695, %v2364_v63 }
 0xb7d   : > { %v2205_v32 = vpop.xlane.xlu0 %2204 }
 0xb7e   : > { %6578 = vpow2.f32 %v2365_v0 }
 0xb7f   : > { %6580 = vrcp.f32 %v2205_v32 }
 0xb8b   : > { %v6579_v1 = vpop.eup %6578 }
 0xb8c   : > { %v6581_v3 = vpop.eup %6580  ;;  %v2367_v5 = vsel %vm1268_vm1, %v6579_v1, 0.0 }
 0xb8d   : > { %2368 = vadd.xlane.f32.xlu0 %v2367_v5  ;;  %v2207_v6 = vmul.f32 %v6581_v3, %v6577_v59 }
 0xb8f   : > { %6092 = vmatmul.mubr.msk.f32.vlgmr.msra.gmra.mxu1 %vm1268_vm1, %v2207_v6 }
 0xb90   : > { %6101 = vmatprep.mubr.msk.f32.mxu1 %vm6985_vm0, %v6984_v22 }
 0xba3   : > { %2373 = vrot.lane.b32.xlu0 %v7633_v2, %s6986_s15 }
 0xba7   : > { %2538 = vrot.lane.b32.xlu0 %v7704_v16, %s6987_s4 }
 0xc16   : > { %v2369_v7 = vpop.xlane.xlu0 %2368 }
 0xc17   : > { %6582 = vrcp.f32 %v2369_v7 }
 0xc1a   : > { %v2374_v8 = vpop.permute.xlu0 %2373 }
 0xc1b   : > { %6100 = vmatpush3.msra.mxu1 %v2374_v8 }
 0xc1c   : > { %6110 = vmatprep.subr.bf16.mxu1 %v6984_v22 }
 0xc1e   : > { %v2539_v21 = vpop.permute.xlu0 %2538 }
 0xc24   : > { %v6583_v9 = vpop.eup %6582 }
 0xc25   : > { %v2371_v10 = vmul.f32 %v6583_v9, %v6579_v1  ;;  %v995_v9 = vand.u32 127, %v994_v23 }
 0xc27   : > { %6102 = vmatmul.mubr.msk.f32.vlgmr.msra.gmra.mxu1 %vm1268_vm1, %v2371_v10  ;;  %vm996_vm3 = vcmp.lt.s32.totalorder %v995_v9, 32 }
 0xc28   : > { %6111 = vmatpush3.bf16.msra.mxu1 %v7656_v24  ;;  %6112 = vmatprep.mubr.msk.bf16.mxu1 %vm6985_vm0, %v6984_v22  ;;  %v2537_v24 = vpop.permute.xlu1 %2536 }
 0xc29   : > { %6121 = vmatprep.subr.mxu1 %v6984_v22 }
 0xc4f   : > { %v2277_v11 = vpop.f32.mrf.mxu1 }
 0xc50   : > { %v2281_v12 = vpack.c.bf16 %v2277_v11, %v2277_v11 }
 0xc51   : > { %v6093_v13 = vpop.f32.mrf.mxu1 }
 0xc52   : > { %6113 = vmatmul.mubr.msk.bf16.vlgmr.msra.gmra.mxu1 %vm1268_vm1, %v2281_v12  ;;  %v7811_v12 = vsel %vm996_vm3, 1.0, %v6984_v22 }
 0xc53   : > { %6123 = vmatprep.mubr.msk.f32.mxu1 %vm6985_vm0, %v6984_v22 }
 0xce7   : > { %v2445_v15 = vpop.f32.mrf.mxu1 }
 0xce8   : > { %v2449_v17 = vpack.c.bf16 %v2445_v15, %v2445_v15 }
 0xce9   : > { %v6103_v18 = vpop.f32.mrf.mxu1 }
 0xcea   : > { %6107 = vmatmul.mubr.msk.bf16.vlgmr.msra.gmra.mxu0 %vm1268_vm1, %v2449_v17 }
 0xceb   : > { %6117 = vmatpush3.xpose.msk.msra.mxu0 %vm1268_vm1, %v2539_v21  ;;  %6118 = vmatprep.mubr.msk.f32.mxu0 %vm6985_vm0, %v6984_v22 }
 0xcec   : > { %6126 = vmatprep.subr.bf16.mxu0 %v6984_v22 }
 0xcf2   : > { %6119 = vmatmul.mubr.msk.f32.vlgmr.msra.gmra.mxu0 %vm1268_vm1, %v2537_v24 }
 0xcf3   : > { %6127 = vmatpush3.bf16.msra.mxu0 %v7691_v35  ;;  %6128 = vmatprep.mubr.msk.bf16.mxu0 %vm6985_vm0, %v6984_v22 }
 0xcf4   : > { %6142 = vmatprep.subr.bf16.mxu0 %v6984_v22 }
 0xd12   : > { %v7773_v26 = vpop.f32.mrf.mxu1 }
 0xd14   : > { %v6114_v29 = vpop.f32.mrf.mxu1 }
 0xd16   : > { %v2533_v62 = vpop.f32.mrf.mxu1 }
 0xd18   : > { %v6115_v28 = vpop.f32.mrf.mxu1 }
 0xdaa   : > { %v2487_v46 = vpop.f32.mrf.mxu0 }
 0xdab   : > { %v2531_v1 = vadd.f32 %v7773_v26, %v2487_v46 }
 0xdac   : > { %v6108_v31 = vpop.f32.mrf.mxu0 }
 0xdae   : > { %v2490_v33 = vpop.f32.mrf.mxu0 }
 0xdb0   : > { %v6109_v36 = vpop.f32.mrf.mxu0 }
 0xdb1   : > { %v6510_v36 = vld [vmem:[%s7461_s26 + $0x70] ss:$8 sps:$4 sm:$0xff]  }
 0xdb2   : > { %v2610_v37 = vpop.f32.mrf.mxu0 }
 0xdb3   : > { %v2614_v38 = vmul.f32 0.35355338, %v2610_v37  ;;  %v6512_v37 = vld [vmem:[%s7461_s26 + $0x74] ss:$8 sps:$4 sm:$0xff]  }
 0xdb4   : > { %v6120_v39 = vpop.f32.mrf.mxu0 }
 0xdb5   : > { %v2615_v40 = vsel %vm1268_vm1, %v2614_v38, -inf  ;;  %v6513_v39 = vld [vmem:[%s7461_s26 + $0x60] ss:$8 sps:$4 sm:$0xff]  }
 0xdb6   : > { %2616 = vmax.xlane.f32.xlu0 %v2615_v40  ;;  %v6518_v40 = vld [vmem:[%s7461_s26 + $0x54] ss:$8 sps:$4 sm:$0xff]  }
 0xdcc   : > { %2626 = vrot.lane.b32.xlu0 %v7633_v2, %s6987_s4 }
 0xdd0   : > { %2747 = vrot.lane.b32.xlu0 %v7581_v34, %s6988_s17 }
 0xe3f   : > { %v2617_v35 = vpop.xlane.xlu0 %2616 }
 0xe40   : > { %v2618_v41 = vsub.f32 %v2614_v38, %v2617_v35  ;;  %v6515_v38 = vld [vmem:[%s7461_s26 + $0x64] ss:$8 sps:$4 sm:$0xff]   ;;  %v6534_v35 = vld [vmem:[%s7453_s11 + $0x38] sm:$0xff]  }
 0xe42   : > { %v2619_v42 = vmul.f32 1.442695, %v2618_v41  ;;  %v6516_v41 = vld [vmem:[%s7461_s26 + $0x50] ss:$8 sps:$4 sm:$0xff]  }
 0xe43   : > { %v2627_v43 = vpop.permute.xlu0 %2626 }
 0xe44   : > { %6584 = vpow2.f32 %v2619_v42  ;;  %6122 = vmatpush3.msra.mxu1 %v2627_v43  ;;  %v6521_v42 = vld [vmem:[%s7461_s26 + $0x44] ss:$8 sps:$4 sm:$0xff]   ;;  %v6519_v43 = vld [vmem:[%s7461_s26 + $0x40] ss:$8 sps:$4 sm:$0xff]  }
 0xe45   : > { %6132 = vmatprep.subr.mxu1 %v6984_v22 }
 0xe47   : > { %v2748_v50 = vpop.permute.xlu0 %2747 }
 0xe51   : > { %v6585_v44 = vpop.eup %6584 }
 0xe52   : > { %v2621_v45 = vsel %vm1268_vm1, %v6585_v44, 0.0 }
 0xe53   : > { %2622 = vadd.xlane.f32.xlu1 %v2621_v45  ;;  %v6522_v45 = vld [vmem:[%s7461_s26 + $0x30] ss:$8 sps:$4 sm:$0xff]  }
 0xe64   : > { %2749 = vrot.lane.b32.xlu1 %v7704_v16, %s6988_s17 }
 0xedc   : > { %v2623_v47 = vpop.xlane.xlu1 %2622 }
 0xedd   : > { %6586 = vrcp.f32 %v2623_v47  ;;  %v6527_v47 = vld [vmem:[%s7461_s26 + $0x24] ss:$8 sps:$4 sm:$0xff]  }
 0xee0   : > { %v2750_v34 = vpop.permute.xlu1 %2749 }
 0xeea   : > { %v6587_v48 = vpop.eup %6586 }
 0xeeb   : > { %v2625_v49 = vmul.f32 %v6587_v48, %v6585_v44  ;;  %v6524_v44 = vld [vmem:[%s7461_s26 + $0x34] ss:$8 sps:$4 sm:$0xff]   ;;  %v6525_v48 = vld [vmem:[%s7461_s26 + $0x20] ss:$8 sps:$4 sm:$0xff]  }
 0xeed   : > { %6124 = vmatmul.mubr.msk.f32.vlgmr.msra.gmra.mxu1 %vm1268_vm1, %v2625_v49  ;;  %v6530_v49 = vld [vmem:[%s7461_s26 + $0x14] ss:$8 sps:$4 sm:$0xff]  }
 0xeee   : > { %6133 = vmatpush3.xpose.msk.msra.mxu1 %vm1268_vm1, %v2750_v34  ;;  %6134 = vmatprep.mubr.msk.f32.mxu1 %vm6985_vm0, %v6984_v22  ;;  %v6528_v34 = vld [vmem:[%s7461_s26 + $0x10] ss:$8 sps:$4 sm:$0xff]  }
 0xeef   : > { %6137 = vmatprep.subr.mxu1 %v6984_v22 }
 0xef1   : > { %6135 = vmatmul.mubr.msk.f32.vlgmr.msra.gmra.mxu1 %vm1268_vm1, %v2748_v50  ;;  %v6533_v50 = vld [vmem:[%s7461_s26 + $0x4] ss:$8 sps:$4 sm:$0xff]  }
 0xef2   : > { %6139 = vmatprep.mubr.msk.f32.mxu1 %vm6985_vm0, %v6984_v22 }
 0xfad   : > { %v2698_v16 = vpop.f32.mrf.mxu1 }
 0xfae   : > { %v2702_v52 = vpack.c.bf16 %v2698_v16, %v2698_v16  ;;  %v6531_v16 = vld [vmem:[%s7461_s26] ss:$8 sps:$4 sm:$0xff]  }
 0xfaf   : > { %v6125_v53 = vpop.f32.mrf.mxu1 }
 0xfb0   : > { %6129 = vmatmul.mubr.msk.bf16.vlgmr.msra.gmra.mxu0 %vm1268_vm1, %v2702_v52  ;;  %v6535_v52 = vld [vmem:[#allocation3] sm:$0xff]  }
 0xfb1   : > { %v2821_v54 = vpop.f32.mrf.mxu1  ;;  %6143 = vmatpush3.bf16.msra.mxu0 %v7712_v30  ;;  %6144 = vmatprep.mubr.msk.bf16.mxu0 %vm6985_vm0, %v6984_v22  ;;  %v5754_v30 = vld [vmem:[%s8366_s12] ss:$0 sm:$0xff] }
 0xfb2   : > { %v2825_v55 = vmul.f32 0.35355338, %v2821_v54  ;;  %v2964_v0 = vadd.f32 %v5754_v30, %v7742_v51  ;;  %3241 = vmatprep.subr.bf16.mxu0 %v6512_v37 }
 0xfb3   : > { %v6136_v14 = vpop.f32.mrf.mxu1 }
 0xfb4   : > { %v2826_v56 = vsel %vm1268_vm1, %v2825_v55, -inf }
 0xfb5   : > { %2827 = vmax.xlane.f32.xlu0 %v2826_v56 }
 0xfcb   : > { %2837 = vrot.lane.b32.xlu0 %v7633_v2, %s6988_s17  ;;  %v2966_v2 = vadd.f32 %v2964_v0, %v7548_v19 }
0x103e   : > { %v2828_v57 = vpop.xlane.xlu0 %2827 }
0x103f   : > { %v2829_v59 = vsub.f32 %v2825_v55, %v2828_v57  ;;  %v6537_v57 = vld [vmem:[%s7453_s11 + $0x28] sm:$0xff]  }
0x1041   : > { %v2830_v60 = vmul.f32 1.442695, %v2829_v59  ;;  %v6538_v59 = vld [vmem:[%s7453_s11 + $0x20] sm:$0xff]  }
0x1042   : > { %v2838_v61 = vpop.permute.xlu0 %2837 }
0x1043   : > { %6588 = vpow2.f32 %v2830_v60  ;;  %6138 = vmatpush3.msra.mxu1 %v2838_v61  ;;  %v6539_v60 = vld [vmem:[%s7453_s11 + $0x18] sm:$0xff]   ;;  %v6541_v61 = vld [vmem:[%s7453_s11 + $0x8] sm:$0xff]  }
0x1044   : > { %6148 = vmatprep.subr.bf16.mxu1 %v6984_v22 }
0x1050   : > { %v6589_v63 = vpop.eup %6588 }
0x1051   : > { %v2832_v32 = vsel %vm1268_vm1, %v6589_v63, 0.0 }
0x1052   : > { %2833 = vadd.xlane.f32.xlu1 %v2832_v32 }
0x1056   : > { %2968 = vadd.xlane.f32.xlu1 %v2966_v2 }
0x1070   : > { %v2740_v3 = vpop.f32.mrf.mxu0 }
0x1071   : > { %v2746_v5 = vadd.f32 %v2740_v3, %v2531_v1 }
0x1072   : > { %v6130_v6 = vpop.f32.mrf.mxu0 }
0x1074   : > { %v2743_v7 = vpop.f32.mrf.mxu0 }
0x1076   : > { %v6131_v8 = vpop.f32.mrf.mxu0 }
0x10db   : > { %v2834_v10 = vpop.xlane.xlu1 %2833 }
0x10dc   : > { %6590 = vrcp.f32 %v2834_v10 }
0x10df   : > { %v2969_v11 = vpop.xlane.xlu1 %2968 }
0x10e0   : > { %v2972_v51 = vmul.f32 0.03125, %v2969_v11 }
0x10e2   : > { %v2974_v13 = vsub.f32 %v2966_v2, %v2972_v51 }
0x10e4   : > { %v7814_v19 = vmul.f32 %v7811_v12, %v2974_v13  ;;  %v7874_v13 = vld [vmem:[%s7513_s18] sm:$0x7] }
0x10e6   : > { %v2978_v15 = vmul.f32 %v7814_v19, %v7814_v19 }
0x10e8   : > { %2980 = vadd.xlane.f32.xlu0 %v2978_v15 }
0x10e9   : > { %v6591_v17 = vpop.eup %6590 }
0x10ea   : > { %v2836_v18 = vmul.f32 %v6591_v17, %v6589_v63  ;;  %v3137_v63 = vld [vmem:[%s7499_s7] sm:$0x3]  ;;  %v2995_v17 = vrot.slane %v7874_v13, %v7570_v27  ;;  %s8367_s7 = scalar_lea.vmem [#allocation11], %s7437_s23  ;;  %s8368_s23 = sld [smem:[#allocation29_spill]] }
0x10eb   : > { %v7861_v32 = vrot.slane %v3137_v63, %v7570_v27 }
0x10ec   : > { %6140 = vmatmul.mubr.msk.f32.vlgmr.msra.gmra.mxu1 %vm1268_vm1, %v2836_v18  ;;  %v7880_v18 = vld [vmem:[%s7518_s13] sm:$0x7] }
0x10ed   : > { %6164 = vmatprep.mubr.msk.bf16.mxu1 %vm6985_vm0, %v6984_v22  ;;  %6149 = vmatpush3.bf16.msra.mxu1 %v6534_v35 }
0x10ee   : > { %6150 = vmatprep.subr.bf16.mxu1 %v6984_v22 }
0x1171   : > { %v2981_v6 = vpop.xlane.xlu0 %2980 }
0x1172   : > { %v2984_v7 = vmul.f32 0.03125, %v2981_v6 }
0x1174   : > { %v2986_v8 = vadd.f32 1e-05, %v2984_v7 }
0x1176   : > { %6592 = vrsqrt.f32 %v2986_v8 }
0x1183   : > { %v6593_v51 = vpop.eup %6592 }
0x1184   : > { %v2990_v15 = vmul.f32 %v6593_v51, %v7814_v19  ;;  %v6543_v19 = vld [vmem:[#allocation3 + $0x8] sm:$0xff]  }
0x11ac   : > { %v2909_v23 = vpop.f32.mrf.mxu1 }
0x11ad   : > { %v2913_v21 = vpack.c.bf16 %v2909_v23, %v2909_v23 }
0x11ae   : > { %v6141_v24 = vpop.f32.mrf.mxu1 }
0x11af   : > { %6145 = vmatmul.mubr.msk.bf16.vlgmr.msra.gmra.mxu0 %vm1268_vm1, %v2913_v21  ;;  %v2996_v24 = vmul.f32 %v2995_v17, %v2990_v15  ;;  %v3295_v15 = vld [vmem:[%s8368_s23 + $0x4] sm:$0xf] }
0x11b0   : > { %3273 = vmatprep.mubr.bf16.mxu0 %v6983_v4  ;;  %3242 = vmatpush1.bf16.msra.mxu0 %v6510_v36  ;;  %v5755_v36 = vld [vmem:[%s8367_s7] ss:$0 sm:$0xff] }
0x11b1   : > { %3243 = vmatprep.subr.bf16.mxu0 %v6515_v38 }
0x11b4   : > { %3244 = vmatpush1.bf16.msra.mxu0 %v6513_v39 }
0x11b5   : > { %3245 = vmatprep.subr.bf16.mxu0 %v6518_v40 }
0x11b8   : > { %3246 = vmatpush1.bf16.msra.mxu0 %v6516_v41 }
0x11b9   : > { %3247 = vmatprep.subr.bf16.mxu0 %v6521_v42 }
0x11bc   : > { %3248 = vmatpush1.bf16.msra.mxu0 %v6519_v43 }
0x11bd   : > { %3249 = vmatprep.subr.bf16.mxu0 %v6524_v44 }
0x11c0   : > { %3250 = vmatpush1.bf16.msra.mxu0 %v6522_v45 }
0x11c1   : > { %3251 = vmatprep.subr.bf16.mxu0 %v6527_v47 }
0x11c4   : > { %3252 = vmatpush1.bf16.msra.mxu0 %v6525_v48 }
0x11c5   : > { %3253 = vmatprep.subr.bf16.mxu0 %v6530_v49 }
0x11c8   : > { %3254 = vmatpush1.bf16.msra.mxu0 %v6528_v34 }
0x11c9   : > { %3255 = vmatprep.subr.bf16.mxu0 %v6533_v50 }
0x11cc   : > { %3256 = vmatpush1.bf16.msra.mxu0 %v6531_v16 }
0x11cd   : > { %6182 = vmatprep.subr.mxu0 %v6984_v22 }
0x11cf   : > { %3274 = vmatmul.mubr.bf16.vlgmr.msra.gmra.mxu0 %v6535_v52 }
0x11d0   : > { %3283 = vmatprep.mubr.bf16.mxu0 %v6983_v4  ;;  %v6540_v4 = vld [vmem:[%s7453_s11 + $0x10] sm:$0xff]  }
0x11d7   : > { %3284 = vmatmul.mubr.bf16.gmra.mxu0 %v6543_v19 }
0x11d8   : > { %6186 = vmatprep.mubr.msk.f32.mxu0 %vm6985_vm0, %v6984_v22 }
0x126f   : > { %v2951_v26 = vpop.f32.mrf.mxu0 }
0x1270   : > { %v2957_v29 = vadd.f32 %v2951_v26, %v2746_v5  ;;  %v3001_v26 = vrot.slane %v7880_v18, %v7570_v27 }
0x1271   : > { %v6146_v62 = vpop.f32.mrf.mxu0 }
0x1272   : > { %v2965_v28 = vadd.f32 %v5754_v30, %v2957_v29  ;;  %v6542_v30 = vld [vmem:[%s7453_s11] sm:$0xff]   ;;  %v7884_v62 = vadd.f32 %v3001_v26, %v2996_v24 }
0x1273   : > { %v2954_v46 = vpop.f32.mrf.mxu0 }
0x1274   : > { %v2967_v31 = vadd.f32 %v2965_v28, %v7550_v20  ;;  %v6536_v20 = vld [vmem:[%s7453_s11 + $0x30] sm:$0xff]  }
0x1275   : > { %v6147_v33 = vpop.f32.mrf.mxu0  ;;  %6151 = vmatpush3.bf16.msra.mxu1 %v6536_v20 }
0x1276   : > { %2970 = vadd.xlane.f32.xlu1 %v2967_v31  ;;  %6152 = vmatprep.subr.bf16.mxu1 %v6984_v22  ;;  %v7905_v33 = vrot.slane %v3137_v63, %v7564_v25 }
0x1279   : > { %6153 = vmatpush3.bf16.msra.mxu1 %v6537_v57 }
0x127a   : > { %6154 = vmatprep.subr.bf16.mxu1 %v6984_v22 }
0x127d   : > { %6155 = vmatpush3.bf16.msra.mxu1 %v6538_v59 }
0x127e   : > { %6156 = vmatprep.subr.bf16.mxu1 %v6984_v22 }
0x1281   : > { %6157 = vmatpush3.bf16.msra.mxu1 %v6539_v60 }
0x1282   : > { %6158 = vmatprep.subr.bf16.mxu1 %v6984_v22 }
0x1285   : > { %6159 = vmatpush3.bf16.msra.mxu1 %v6540_v4 }
0x1286   : > { %6160 = vmatprep.subr.bf16.mxu1 %v6984_v22 }
0x1289   : > { %6161 = vmatpush3.bf16.msra.mxu1 %v6541_v61 }
0x128a   : > { %6162 = vmatprep.subr.bf16.mxu1 %v6984_v22 }
0x128d   : > { %6163 = vmatpush3.bf16.msra.mxu1 %v6542_v30 }
0x128e   : > { %6168 = vmatprep.subr.mxu1 %v6984_v22 }
0x128f   : > { %v3275_v0 = vpop.f32.mrf.mxu0 }
0x1290   : > { %v7867_v5 = vadd.f32 %v3275_v0, %v7861_v32 }
0x1291   : > { %v3277_v2 = vpop.f32.mrf.mxu0 }
0x1292   : > { %v7919_v41 = vadd.f32 %v3277_v2, %v7905_v33 }
0x1293   : > { %v3279_v1 = vpop.f32.mrf.mxu0 }
0x1294   : > { %v7864_v3 = vadd.f32 %v3279_v1, %v7861_v32 }
0x1295   : > { %v3281_v37 = vpop.f32.mrf.mxu0 }
0x1296   : > { %v7912_v40 = vadd.f32 %v3281_v37, %v7905_v33 }
0x1297   : > { %v7937_v34 = vpop.f32.mrf.mxu0 }
0x1299   : > { %v7939_v50 = vpop.f32.mrf.mxu0 }
0x129b   : > { %v7941_v16 = vpop.f32.mrf.mxu0 }
0x129d   : > { %v7943_v52 = vpop.f32.mrf.mxu0 }
0x12ff   : > { %v2971_v53 = vpop.xlane.xlu1 %2970 }
0x1300   : > { %v2973_v54 = vmul.f32 0.03125, %v2971_v53 }
0x1302   : > { %v2975_v55 = vsub.f32 %v2967_v31, %v2973_v54 }
0x1304   : > { %v2977_v14 = vmul.f32 %v7811_v12, %v2975_v55 }
0x1306   : > { %v2979_v56 = vmul.f32 %v2977_v14, %v2977_v14 }
0x1308   : > { %2982 = vadd.xlane.f32.xlu1 %v2979_v56 }
0x1319   : > { %3469 = vrot.lane.b32.xlu1 %v7864_v3, %s6986_s15 }
0x131d   : > { %3467 = vrot.lane.b32.xlu1 %v7867_v5, %s6986_s15 }
0x1391   : > { %v2983_v9 = vpop.xlane.xlu1 %2982 }
0x1392   : > { %v2985_v10 = vmul.f32 0.03125, %v2983_v9  ;;  %v3294_v9 = vld [vmem:[%s8368_s23] sm:$0xf] }
0x1394   : > { %v2987_v11 = vadd.f32 1e-05, %v2985_v10  ;;  %v7962_v10 = vsel %vm1602_vm2, %v3294_v9, 0 }
0x1395   : > { %v3470_v27 = vpop.permute.xlu1 %3469 }
0x1396   : > { %6594 = vrsqrt.f32 %v2987_v11  ;;  %6183 = vmatpush3.xpose.msk.msra.mxu0 %vm1268_vm1, %v3470_v27 }
0x1397   : > { %6184 = vmatprep.subr.mxu0 %v6984_v22 }
0x1399   : > { %v3468_v31 = vpop.permute.xlu1 %3467 }
0x139a   : > { %6185 = vmatpush3.xpose.msk.msra.mxu0 %vm1268_vm1, %v3468_v31 }
0x139b   : > { %6202 = vmatprep.subr.bf16.mxu0 %v6984_v22 }
0x13a3   : > { %v6595_v23 = vpop.eup %6594 }
0x13a4   : > { %v2991_v21 = vmul.f32 %v6595_v23, %v2977_v14 }
0x13a6   : > { %v2997_v29 = vmul.f32 %v2995_v17, %v2991_v21  ;;  %v7969_v21 = vsel %vm1602_vm2, %v3295_v15, 0 }
0x13a8   : > { %v7886_v28 = vadd.f32 %v3001_v26, %v2997_v29 }
0x13aa   : > { %v3020_v46 = vpack.c.bf16 %v7886_v28, %v7884_v62 }
0x13ac   : > { %6165 = vmatmul.mubr.bf16.vlgmr.msra.gmra.mxu1 %v3020_v46 }
0x13ad   : > { %6169 = vmatpush3.xpose.msk.msra.mxu1 %vm1268_vm1, %v7864_v3  ;;  %6172 = vmatprep.mubr.msk.f32.mxu1 %vm6985_vm0, %v6984_v22 }
0x13ae   : > { %6170 = vmatprep.subr.mxu1 %v6984_v22 }
0x13b1   : > { %6171 = vmatpush3.xpose.msk.msra.mxu1 %vm1268_vm1, %v7867_v5 }
0x13b2   : > { %6175 = vmatprep.subr.mxu1 %v6984_v22 }
0x146c   : > { %v3110_v38 = vpop.f32.mrf.mxu1 }
0x146d   : > { %v7909_v39 = vadd.f32 %v5755_v36, %v3110_v38 }
0x146e   : > { %v6166_v35 = vpop.f32.mrf.mxu1 }
0x146f   : > { %3465 = vrot.lane.b32.xlu1 %v7909_v39, %s6986_s15  ;;  %6173 = vmatmul.mubr.msk.f32.vlgmr.msra.gmra.mxu1 %vm1268_vm1, %v7909_v39 }
0x1470   : > { %6176 = vmatpush3.msra.mxu1 %v7912_v40  ;;  %v3113_v20 = vpop.f32.mrf.mxu1  ;;  %6179 = vmatprep.mubr.msk.f32.mxu1 %vm6985_vm0, %v6984_v22 }
0x1471   : > { %v7924_v42 = vadd.f32 %v5755_v36, %v3113_v20  ;;  %6177 = vmatprep.subr.mxu1 %v6984_v22 }
0x1472   : > { %6178 = vmatpush3.msra.mxu1 %v7919_v41  ;;  %v6167_v43 = vpop.f32.mrf.mxu1 }
0x1473   : > { %6189 = vmatprep.subr.mxu1 %v6984_v22 }
0x14e1   : > { %v3466_v44 = vpop.permute.xlu1 %3465 }
0x14e2   : > { %6187 = vmatmul.mubr.msk.f32.vlgmr.msra.gmra.mxu0 %vm1268_vm1, %v3466_v44 }
0x14e3   : > { %6204 = vmatprep.mubr.msk.bf16.mxu0 %vm6985_vm0, %v6984_v22  ;;  %6203 = vmatpush3.bf16.msra.mxu0 %v7962_v10 }
0x14e4   : > { %6215 = vmatprep.subr.mxu0 %v6984_v22 }
0x152f   : > { %v3374_v45 = vpop.f32.mrf.mxu1 }
0x1530   : > { %v3378_v47 = vmul.f32 0.35355338, %v3374_v45 }
0x1531   : > { %v6174_v48 = vpop.f32.mrf.mxu1 }
0x1532   : > { %v3380_v49 = vsel %vm3379_vm4, %v3378_v47, -inf }
0x1533   : > { %3381 = vmax.xlane.f32.xlu1 %v3380_v49 }
0x1544   : > { %3737 = vrot.lane.b32.xlu1 %v7864_v3, %s6987_s4 }
0x1548   : > { %3827 = vrot.lane.b32.xlu1 %v7919_v41, %s6987_s4 }
0x15a2   : > { %v3543_v53 = vpop.f32.mrf.mxu0 }
0x15a3   : > { %v3547_v54 = vmul.f32 0.35355338, %v3543_v53 }
0x15a4   : > { %v6188_v55 = vpop.f32.mrf.mxu0 }
0x15a5   : > { %v3548_v14 = vsel %vm3379_vm4, %v3547_v54, -inf }
0x15a6   : > { %3549 = vmax.xlane.f32.xlu0 %v3548_v14 }
0x15bc   : > { %3563 = vrot.lane.b32.xlu0 %v7912_v40, %s6986_s15  ;;  %v3382_v56 = vpop.xlane.xlu1 %3381 }
0x15bd   : > { %v3383_v57 = vsub.f32 %v3378_v47, %v3382_v56 }
0x15bf   : > { %v3384_v59 = vmul.f32 1.442695, %v3383_v57 }
0x15c0   : > { %v3738_v31 = vpop.permute.xlu1 %3737 }
0x15c1   : > { %6596 = vpow2.f32 %v3384_v59 }
0x15ce   : > { %v6597_v60 = vpop.eup %6596 }
0x15cf   : > { %v3386_v4 = vsel %vm3379_vm4, %v6597_v60, 0.0 }
0x15db   : > { %3387 = vadd.xlane.f32.xlu0 %v3386_v4 }
0x162f   : > { %v3550_v61 = vpop.xlane.xlu0 %3549 }
0x1630   : > { %v3551_v30 = vsub.f32 %v3547_v54, %v3550_v61 }
0x1632   : > { %v3552_v63 = vmul.f32 1.442695, %v3551_v30 }
0x1633   : > { %v3564_v1 = vpop.permute.xlu0 %3563 }
0x1634   : > { %6598 = vpow2.f32 %v3552_v63 }
0x1641   : > { %v6599_v0 = vpop.eup %6598 }
0x1642   : > { %v3554_v2 = vsel %vm3379_vm4, %v6599_v0, 0.0 }
0x1643   : > { %3555 = vadd.xlane.f32.xlu0 %v3554_v2  ;;  %v3296_v2 = vld [vmem:[%s8368_s23 + $0x8] sm:$0xf] }
0x1659   : > { %3561 = vrot.lane.b32.xlu0 %v7919_v41, %s6986_s15 }
0x165d   : > { %3735 = vrot.lane.b32.xlu0 %v7867_v5, %s6987_s4 }
0x1661   : > { %3733 = vrot.lane.b32.xlu0 %v7909_v39, %s6987_s4 }
0x1664   : > { %v3388_v6 = vpop.xlane.xlu0 %3387 }
0x1665   : > { %6600 = vrcp.f32 %v3388_v6 }
0x1672   : > { %v6601_v7 = vpop.eup %6600 }
0x1673   : > { %v3390_v8 = vmul.f32 %v6601_v7, %v6597_v60  ;;  %v3828_v60 = vpop.permute.xlu1 %3827 }
0x1675   : > { %6180 = vmatmul.mubr.msk.f32.vlgmr.msra.gmra.mxu1 %vm3379_vm4, %v3390_v8 }
0x1676   : > { %6190 = vmatpush3.msra.mxu1 %v3564_v1  ;;  %6193 = vmatprep.mubr.msk.f32.mxu1 %vm6985_vm0, %v6984_v22  ;;  %v8017_v1 = vsel %vm1602_vm2, %v3296_v2, 0 }
0x1677   : > { %6191 = vmatprep.subr.mxu1 %v6984_v22 }
0x16cc   : > { %v3556_v11 = vpop.xlane.xlu0 %3555 }
0x16cd   : > { %6602 = vrcp.f32 %v3556_v11 }
0x16d0   : > { %v3562_v51 = vpop.permute.xlu0 %3561 }
0x16d1   : > { %6192 = vmatpush3.msra.mxu1 %v3562_v51 }
0x16d2   : > { %6196 = vmatprep.subr.bf16.mxu1 %v6984_v22 }
0x16d4   : > { %v3736_v36 = vpop.permute.xlu0 %3735 }
0x16d8   : > { %v3734_v37 = vpop.permute.xlu0 %3733 }
0x16da   : > { %v6603_v17 = vpop.eup %6602 }
0x16db   : > { %v3558_v23 = vmul.f32 %v6603_v17, %v6599_v0  ;;  %v8029_v17 = vadd.f32 %v7941_v16, %v7861_v32  ;;  %v8041_v16 = vadd.f32 %v7937_v34, %v7861_v32 }
0x16dd   : > { %6194 = vmatmul.mubr.msk.f32.vlgmr.msra.gmra.mxu1 %vm3379_vm4, %v3558_v23 }
0x16de   : > { %6197 = vmatpush3.bf16.msra.mxu1 %v7969_v21  ;;  %6198 = vmatprep.mubr.msk.bf16.mxu1 %vm6985_vm0, %v6984_v22 }
0x16df   : > { %6208 = vmatprep.subr.mxu1 %v6984_v22 }
0x1735   : > { %v3460_v24 = vpop.f32.mrf.mxu1 }
0x1736   : > { %v3464_v26 = vpack.c.bf16 %v3460_v24, %v3460_v24 }
0x1737   : > { %v6181_v29 = vpop.f32.mrf.mxu1 }
0x1738   : > { %6205 = vmatmul.mubr.msk.bf16.vlgmr.msra.gmra.mxu0 %vm1268_vm1, %v3464_v26 }
0x1739   : > { %6219 = vmatprep.mubr.msk.f32.mxu0 %vm6985_vm0, %v6984_v22 }
0x179d   : > { %v3636_v46 = vpop.f32.mrf.mxu1 }
0x179e   : > { %v3640_v27 = vpack.c.bf16 %v3636_v46, %v3636_v46 }
0x179f   : > { %v6195_v19 = vpop.f32.mrf.mxu1 }
0x17a0   : > { %6199 = vmatmul.mubr.msk.bf16.vlgmr.msra.gmra.mxu1 %vm1268_vm1, %v3640_v27 }
0x17a1   : > { %6209 = vmatpush3.xpose.msk.msra.mxu1 %vm1268_vm1, %v3738_v31  ;;  %6212 = vmatprep.mubr.msk.f32.mxu1 %vm6985_vm0, %v6984_v22 }
0x17a2   : > { %6210 = vmatprep.subr.mxu1 %v6984_v22 }
0x17a5   : > { %6211 = vmatpush3.xpose.msk.msra.mxu1 %vm1268_vm1, %v3736_v36 }
0x17a6   : > { %6222 = vmatprep.subr.bf16.mxu1 %v6984_v22 }
0x17a8   : > { %6213 = vmatmul.mubr.msk.f32.vlgmr.msra.gmra.mxu1 %vm1268_vm1, %v3734_v37 }
0x17a9   : > { %6224 = vmatprep.mubr.msk.bf16.mxu1 %vm6985_vm0, %v6984_v22  ;;  %6223 = vmatpush3.bf16.msra.mxu1 %v8017_v1 }
0x17aa   : > { %6235 = vmatprep.subr.mxu1 %v6984_v22 }
0x17f8   : > { %v7989_v38 = vpop.f32.mrf.mxu0 }
0x17fa   : > { %v6206_v35 = vpop.f32.mrf.mxu0 }
0x17fc   : > { %v3730_v20 = vpop.f32.mrf.mxu0 }
0x17fd   : > { %v3297_v20 = vld [vmem:[%s8368_s23 + $0xc] sm:$0xf] }
0x17fe   : > { %v6207_v43 = vpop.f32.mrf.mxu0 }
0x17ff   : > { %v8051_v43 = vsel %vm1602_vm2, %v3297_v20, 0 }
0x1860   : > { %v7991_v44 = vpop.f32.mrf.mxu1 }
0x1861   : > { %v3728_v27 = vadd.f32 %v7989_v38, %v7991_v44 }
0x1862   : > { %v6200_v45 = vpop.f32.mrf.mxu1 }
0x1864   : > { %v3684_v47 = vpop.f32.mrf.mxu1 }
0x1866   : > { %v6201_v48 = vpop.f32.mrf.mxu1 }
0x1868   : > { %v3811_v49 = vpop.f32.mrf.mxu1 }
0x1869   : > { %v3815_v53 = vmul.f32 0.35355338, %v3811_v49 }
0x186a   : > { %v6214_v54 = vpop.f32.mrf.mxu1 }
0x186b   : > { %v3816_v55 = vsel %vm3379_vm4, %v3815_v53, -inf }
0x186c   : > { %3817 = vmax.xlane.f32.xlu0 %v3816_v55  ;;  %v8085_v55 = vadd.f32 %v7939_v50, %v7905_v33 }
0x1882   : > { %3829 = vrot.lane.b32.xlu0 %v7912_v40, %s6987_s4 }
0x1886   : > { %3958 = vrot.lane.b32.xlu0 %v7864_v3, %s6988_s17 }
0x188a   : > { %3956 = vrot.lane.b32.xlu0 %v7867_v5, %s6988_s17 }
0x18f5   : > { %v3818_v14 = vpop.xlane.xlu0 %3817 }
0x18f6   : > { %v3819_v56 = vsub.f32 %v3815_v53, %v3818_v14  ;;  %v8080_v53 = vadd.f32 %v7943_v52, %v7905_v33 }
0x18f8   : > { %v3820_v57 = vmul.f32 1.442695, %v3819_v56 }
0x18f9   : > { %v3830_v59 = vpop.permute.xlu0 %3829 }
0x18fa   : > { %6604 = vpow2.f32 %v3820_v57  ;;  %6216 = vmatpush3.msra.mxu0 %v3830_v59 }
0x18fb   : > { %6217 = vmatprep.subr.mxu0 %v6984_v22 }
0x18fc   : > { %6218 = vmatpush3.msra.mxu0 %v3828_v60 }
0x18fd   : > { %6228 = vmatprep.subr.mxu0 %v6984_v22  ;;  %v3959_v30 = vpop.permute.xlu0 %3958 }
0x1901   : > { %v3957_v0 = vpop.permute.xlu0 %3956 }
0x1907   : > { %v6605_v4 = vpop.eup %6604 }
0x1908   : > { %v3822_v61 = vsel %vm3379_vm4, %v6605_v4, 0.0 }
0x1909   : > { %3823 = vadd.xlane.f32.xlu1 %v3822_v61 }
0x191a   : > { %3954 = vrot.lane.b32.xlu1 %v7909_v39, %s6988_s17 }
0x1992   : > { %v3824_v3 = vpop.xlane.xlu1 %3823 }
0x1993   : > { %6606 = vrcp.f32 %v3824_v3 }
0x1996   : > { %v3955_v39 = vpop.permute.xlu1 %3954 }
0x19a0   : > { %v6607_v5 = vpop.eup %6606 }
0x19a1   : > { %v3826_v63 = vmul.f32 %v6607_v5, %v6605_v4 }
0x19a3   : > { %6220 = vmatmul.mubr.msk.f32.vlgmr.msra.gmra.mxu0 %vm3379_vm4, %v3826_v63 }
0x19a4   : > { %6229 = vmatpush3.xpose.msk.msra.mxu0 %vm1268_vm1, %v3959_v30  ;;  %6232 = vmatprep.mubr.msk.f32.mxu0 %vm6985_vm0, %v6984_v22 }
0x19a5   : > { %6230 = vmatprep.subr.mxu0 %v6984_v22 }
0x19a8   : > { %6231 = vmatpush3.xpose.msk.msra.mxu0 %vm1268_vm1, %v3957_v0 }
0x19a9   : > { %6242 = vmatprep.subr.bf16.mxu0 %v6984_v22 }
0x19ab   : > { %6233 = vmatmul.mubr.msk.f32.vlgmr.msra.gmra.mxu0 %vm1268_vm1, %v3955_v39 }
0x19ac   : > { %6244 = vmatprep.mubr.msk.bf16.mxu0 %vm6985_vm0, %v6984_v22  ;;  %6243 = vmatpush3.bf16.msra.mxu0 %v8051_v43 }
0x19ad   : > { %6255 = vmatprep.subr.mxu0 %v6984_v22 }
0x1a63   : > { %v3902_v6 = vpop.f32.mrf.mxu0 }
0x1a64   : > { %v3906_v7 = vpack.c.bf16 %v3902_v6, %v3902_v6 }
0x1a65   : > { %v6221_v8 = vpop.f32.mrf.mxu0 }
0x1a66   : > { %6225 = vmatmul.mubr.msk.bf16.vlgmr.msra.gmra.mxu1 %vm1268_vm1, %v3906_v7 }
0x1a67   : > { %6239 = vmatprep.mubr.msk.f32.mxu1 %vm6985_vm0, %v6984_v22 }
0x1a6b   : > { %v4032_v9 = vpop.f32.mrf.mxu0 }
0x1a6c   : > { %v4036_v11 = vmul.f32 0.35355338, %v4032_v9 }
0x1a6d   : > { %v6234_v51 = vpop.f32.mrf.mxu0 }
0x1a6e   : > { %v4037_v15 = vsel %vm3379_vm4, %v4036_v11, -inf }
0x1a6f   : > { %4038 = vmax.xlane.f32.xlu0 %v4037_v15 }
0x1a85   : > { %4050 = vrot.lane.b32.xlu0 %v7912_v40, %s6988_s17 }
0x1a89   : > { %4344 = vrot.lane.b32.xlu0 %v8029_v17, %s6986_s15 }
0x1a8d   : > { %4340 = vrot.lane.b32.xlu0 %v7924_v42, %s6986_s15 }
0x1af8   : > { %v4039_v23 = vpop.xlane.xlu0 %4038 }
0x1af9   : > { %v4040_v24 = vsub.f32 %v4036_v11, %v4039_v23 }
0x1afb   : > { %v4041_v26 = vmul.f32 1.442695, %v4040_v24 }
0x1afc   : > { %v4051_v29 = vpop.permute.xlu0 %4050 }
0x1afd   : > { %6608 = vpow2.f32 %v4041_v26  ;;  %6236 = vmatpush3.msra.mxu1 %v4051_v29 }
0x1afe   : > { %6237 = vmatprep.subr.mxu1 %v6984_v22 }
0x1b00   : > { %v4345_v44 = vpop.permute.xlu0 %4344 }
0x1b04   : > { %v4341_v47 = vpop.permute.xlu0 %4340 }
0x1b0a   : > { %v6609_v40 = vpop.eup %6608 }
0x1b0b   : > { %v4043_v46 = vsel %vm3379_vm4, %v6609_v40, 0.0 }
0x1b0c   : > { %4044 = vadd.xlane.f32.xlu1 %v4043_v46 }
0x1b1d   : > { %4048 = vrot.lane.b32.xlu1 %v7919_v41, %s6988_s17 }
0x1b21   : > { %4342 = vrot.lane.b32.xlu1 %v8041_v16, %s6986_s15 }
0x1b26   : > { %v3947_v19 = vpop.f32.mrf.mxu1 }
0x1b27   : > { %v8047_v31 = vadd.f32 %v3947_v19, %v3728_v27 }
0x1b28   : > { %v6226_v36 = vpop.f32.mrf.mxu1 }
0x1b2a   : > { %v3950_v37 = vpop.f32.mrf.mxu1 }
0x1b2c   : > { %v6227_v35 = vpop.f32.mrf.mxu1 }
0x1b95   : > { %v4045_v32 = vpop.xlane.xlu1 %4044 }
0x1b96   : > { %6610 = vrcp.f32 %v4045_v32 }
0x1b99   : > { %v4049_v41 = vpop.permute.xlu1 %4048 }
0x1b9a   : > { %6238 = vmatpush3.msra.mxu1 %v4049_v41 }
0x1b9b   : > { %6248 = vmatprep.subr.mxu1 %v6984_v22 }
0x1b9d   : > { %v4343_v45 = vpop.permute.xlu1 %4342 }
0x1ba3   : > { %v6611_v34 = vpop.eup %6610 }
0x1ba4   : > { %v4047_v38 = vmul.f32 %v6611_v34, %v6609_v40 }
0x1ba6   : > { %6240 = vmatmul.mubr.msk.f32.vlgmr.msra.gmra.mxu1 %vm3379_vm4, %v4047_v38 }
0x1ba7   : > { %6249 = vmatpush3.xpose.msk.msra.mxu1 %vm1268_vm1, %v8029_v17  ;;  %6252 = vmatprep.mubr.msk.f32.mxu1 %vm6985_vm0, %v6984_v22 }
0x1ba8   : > { %6250 = vmatprep.subr.mxu1 %v6984_v22 }
0x1bab   : > { %6251 = vmatpush3.xpose.msk.msra.mxu1 %vm1268_vm1, %v8041_v16 }
0x1bac   : > { %6262 = vmatprep.subr.mxu1 %v6984_v22 }
0x1bae   : > { %6253 = vmatmul.mubr.msk.f32.vlgmr.msra.gmra.mxu1 %vm1268_vm1, %v7924_v42 }
0x1baf   : > { %6263 = vmatpush3.xpose.msk.msra.mxu1 %vm1268_vm1, %v4345_v44  ;;  %6266 = vmatprep.mubr.msk.f32.mxu1 %vm6985_vm0, %v6984_v22 }
0x1bb0   : > { %6264 = vmatprep.subr.mxu1 %v6984_v22 }
0x1bb3   : > { %6265 = vmatpush3.xpose.msk.msra.mxu1 %vm1268_vm1, %v4343_v45 }
0x1bb4   : > { %6282 = vmatprep.subr.bf16.mxu1 %v6984_v22 }
0x1bb6   : > { %6267 = vmatmul.mubr.msk.f32.vlgmr.msra.gmra.mxu1 %vm1268_vm1, %v4341_v47 }
0x1bb7   : > { %6283 = vmatpush3.bf16.msra.mxu1 %v7962_v10  ;;  %6284 = vmatprep.mubr.msk.bf16.mxu1 %vm6985_vm0, %v6984_v22 }
0x1bb8   : > { %6295 = vmatprep.subr.mxu1 %v6984_v22 }
0x1c66   : > { %v4123_v48 = vpop.f32.mrf.mxu1 }
0x1c67   : > { %v4127_v49 = vpack.c.bf16 %v4123_v48, %v4123_v48 }
0x1c68   : > { %v6241_v54 = vpop.f32.mrf.mxu1 }
0x1c69   : > { %6245 = vmatmul.mubr.msk.bf16.vlgmr.msra.gmra.mxu0 %vm1268_vm1, %v4127_v49 }
0x1c6a   : > { %6256 = vmatpush3.msra.mxu0 %v8080_v53  ;;  %6259 = vmatprep.mubr.msk.f32.mxu0 %vm6985_vm0, %v6984_v22 }
0x1c6b   : > { %6257 = vmatprep.subr.mxu0 %v6984_v22 }
0x1c6c   : > { %6258 = vmatpush3.msra.mxu0 %v8085_v55 }
0x1c6d   : > { %6269 = vmatprep.subr.mxu0 %v6984_v22 }
0x1c6e   : > { %v4250_v52 = vpop.f32.mrf.mxu1 }
0x1c6f   : > { %v4254_v10 = vmul.f32 0.35355338, %v4250_v52 }
0x1c70   : > { %v6254_v14 = vpop.f32.mrf.mxu1 }
0x1c71   : > { %v4255_v56 = vsel %vm3379_vm4, %v4254_v10, -inf }
0x1c72   : > { %4256 = vmax.xlane.f32.xlu1 %v4255_v56 }
0x1c76   : > { %v4418_v57 = vpop.f32.mrf.mxu1 }
0x1c77   : > { %v4422_v33 = vmul.f32 0.35355338, %v4418_v57 }
0x1c78   : > { %v6268_v50 = vpop.f32.mrf.mxu1 }
0x1c79   : > { %v4423_v59 = vsel %vm3379_vm4, %v4422_v33, -inf }
0x1c7a   : > { %4424 = vmax.xlane.f32.xlu0 %v4423_v59 }
0x1cfb   : > { %v4257_v60 = vpop.xlane.xlu1 %4256 }
0x1cfc   : > { %v4258_v4 = vsub.f32 %v4254_v10, %v4257_v60 }
0x1cfe   : > { %v4259_v61 = vmul.f32 1.442695, %v4258_v4 }
0x1d00   : > { %6612 = vpow2.f32 %v4259_v61 }
0x1d03   : > { %v4425_v3 = vpop.xlane.xlu0 %4424 }
0x1d04   : > { %v4426_v5 = vsub.f32 %v4422_v33, %v4425_v3 }
0x1d06   : > { %v4427_v30 = vmul.f32 1.442695, %v4426_v5 }
0x1d08   : > { %6614 = vpow2.f32 %v4427_v30 }
0x1d0d   : > { %v6613_v63 = vpop.eup %6612 }
0x1d0e   : > { %v4261_v0 = vsel %vm3379_vm4, %v6613_v63, 0.0 }
0x1d0f   : > { %4262 = vadd.xlane.f32.xlu0 %v4261_v0 }
0x1d15   : > { %v6615_v39 = vpop.eup %6614 }
0x1d16   : > { %v4429_v2 = vsel %vm3379_vm4, %v6615_v39, 0.0 }
0x1d17   : > { %4430 = vadd.xlane.f32.xlu1 %v4429_v2 }
0x1d25   : > { %4438 = vrot.lane.b32.xlu0 %v8080_v53, %s6986_s15 }
0x1d28   : > { %4436 = vrot.lane.b32.xlu1 %v8085_v55, %s6986_s15 }
0x1d29   : > { %4604 = vrot.lane.b32.xlu0 %v8041_v16, %s6987_s4  ;;  %v4168_v6 = vpop.f32.mrf.mxu0 }
0x1d2a   : > { %v8104_v7 = vadd.f32 %v4168_v6, %v8047_v31 }
0x1d2b   : > { %v6246_v8 = vpop.f32.mrf.mxu0 }
0x1d2c   : > { %4606 = vrot.lane.b32.xlu1 %v8029_v17, %s6987_s4 }
0x1d2d   : > { %v4171_v9 = vpop.f32.mrf.mxu0 }
0x1d2f   : > { %v6247_v11 = vpop.f32.mrf.mxu0 }
0x1d30   : > { %4602 = vrot.lane.b32.xlu1 %v7924_v42, %s6987_s4 }
0x1d34   : > { %4696 = vrot.lane.b32.xlu1 %v8085_v55, %s6987_s4 }
0x1d98   : > { %v4263_v51 = vpop.xlane.xlu0 %4262 }
0x1d99   : > { %6616 = vrcp.f32 %v4263_v51 }
0x1d9c   : > { %v4439_v26 = vpop.permute.xlu0 %4438 }
0x1da0   : > { %v4431_v15 = vpop.xlane.xlu1 %4430 }
0x1da1   : > { %6618 = vrcp.f32 %v4431_v15 }
0x1da4   : > { %v4437_v29 = vpop.permute.xlu1 %4436 }
0x1da6   : > { %v6617_v23 = vpop.eup %6616 }
0x1da7   : > { %v4265_v24 = vmul.f32 %v6617_v23, %v6613_v63 }
0x1da8   : > { %v4607_v20 = vpop.permute.xlu1 %4606 }
0x1da9   : > { %6260 = vmatmul.mubr.msk.f32.vlgmr.msra.gmra.mxu0 %vm3379_vm4, %v4265_v24 }
0x1daa   : > { %6270 = vmatpush3.msra.mxu0 %v4439_v26  ;;  %6273 = vmatprep.mubr.msk.f32.mxu0 %vm6985_vm0, %v6984_v22 }
0x1dab   : > { %6271 = vmatprep.subr.mxu0 %v6984_v22 }
0x1dac   : > { %6272 = vmatpush3.msra.mxu0 %v4437_v29  ;;  %v4603_v32 = vpop.permute.xlu1 %4602 }
0x1dad   : > { %6276 = vmatprep.subr.bf16.mxu0 %v6984_v22 }
0x1dae   : > { %v6619_v40 = vpop.eup %6618 }
0x1daf   : > { %v4433_v46 = vmul.f32 %v6619_v40, %v6615_v39 }
0x1db0   : > { %v4697_v59 = vpop.permute.xlu1 %4696 }
0x1db1   : > { %6274 = vmatmul.mubr.msk.f32.vlgmr.msra.gmra.mxu0 %vm3379_vm4, %v4433_v46 }
0x1db2   : > { %6277 = vmatpush3.bf16.msra.mxu0 %v7969_v21  ;;  %6278 = vmatprep.mubr.msk.bf16.mxu0 %vm6985_vm0, %v6984_v22  ;;  %v4605_v21 = vpop.permute.xlu0 %4604 }
0x1db3   : > { %6288 = vmatprep.subr.mxu0 %v6984_v22 }
0x1e69   : > { %v4335_v27 = vpop.f32.mrf.mxu0 }
0x1e6a   : > { %v4339_v19 = vpack.c.bf16 %v4335_v27, %v4335_v27 }
0x1e6b   : > { %v6261_v31 = vpop.f32.mrf.mxu0 }
0x1e6c   : > { %6285 = vmatmul.mubr.msk.bf16.vlgmr.msra.gmra.mxu1 %vm1268_vm1, %v4339_v19 }
0x1e6d   : > { %6299 = vmatprep.mubr.msk.f32.mxu1 %vm6985_vm0, %v6984_v22 }
0x1e71   : > { %v4511_v36 = vpop.f32.mrf.mxu0 }
0x1e72   : > { %v4515_v37 = vpack.c.bf16 %v4511_v36, %v4511_v36 }
0x1e73   : > { %v6275_v35 = vpop.f32.mrf.mxu0 }
0x1e74   : > { %6279 = vmatmul.mubr.msk.bf16.vlgmr.msra.gmra.mxu0 %vm1268_vm1, %v4515_v37 }
0x1e75   : > { %6289 = vmatpush3.xpose.msk.msra.mxu0 %vm1268_vm1, %v4607_v20  ;;  %6292 = vmatprep.mubr.msk.f32.mxu0 %vm6985_vm0, %v6984_v22 }
0x1e76   : > { %6290 = vmatprep.subr.mxu0 %v6984_v22 }
0x1e79   : > { %6291 = vmatpush3.xpose.msk.msra.mxu0 %vm1268_vm1, %v4605_v21 }
0x1e7a   : > { %6302 = vmatprep.subr.bf16.mxu0 %v6984_v22 }
0x1e7c   : > { %6293 = vmatmul.mubr.msk.f32.vlgmr.msra.gmra.mxu0 %vm1268_vm1, %v4603_v32 }
0x1e7d   : > { %6303 = vmatpush3.bf16.msra.mxu0 %v8017_v1  ;;  %6304 = vmatprep.mubr.msk.bf16.mxu0 %vm6985_vm0, %v6984_v22 }
0x1e7e   : > { %6315 = vmatprep.subr.mxu0 %v6984_v22 }
0x1f2c   : > { %v4596_v41 = vpop.f32.mrf.mxu1 }
0x1f2e   : > { %v6286_v34 = vpop.f32.mrf.mxu1 }
0x1f30   : > { %v4599_v38 = vpop.f32.mrf.mxu1 }
0x1f32   : > { %v6287_v44 = vpop.f32.mrf.mxu1 }
0x1f34   : > { %v4553_v45 = vpop.f32.mrf.mxu0 }
0x1f35   : > { %v8137_v47 = vadd.f32 %v4596_v41, %v4553_v45 }
0x1f36   : > { %v6280_v48 = vpop.f32.mrf.mxu0 }
0x1f38   : > { %v4556_v49 = vpop.f32.mrf.mxu0 }
0x1f3a   : > { %v6281_v54 = vpop.f32.mrf.mxu0 }
0x1f3c   : > { %v4680_v52 = vpop.f32.mrf.mxu0 }
0x1f3d   : > { %v4684_v10 = vmul.f32 0.35355338, %v4680_v52  ;;  %v6544_v52 = vld [vmem:[%s8371_s24 + $0x38] sm:$0xff]  }
0x1f3e   : > { %v6294_v14 = vpop.f32.mrf.mxu0 }
0x1f3f   : > { %v4685_v1 = vsel %vm3379_vm4, %v4684_v10, -inf }
0x1f40   : > { %4686 = vmax.xlane.f32.xlu0 %v4685_v1 }
0x1f56   : > { %4698 = vrot.lane.b32.xlu0 %v8080_v53, %s6987_s4 }
0x1f5a   : > { %4824 = vrot.lane.b32.xlu0 %v8029_v17, %s6988_s17 }
0x1f5e   : > { %4820 = vrot.lane.b32.xlu0 %v7924_v42, %s6988_s17 }
0x1fc9   : > { %v4687_v56 = vpop.xlane.xlu0 %4686 }
0x1fca   : > { %v4688_v57 = vsub.f32 %v4684_v10, %v4687_v56  ;;  %v6545_v10 = vld [vmem:[%s8371_s24 + $0x30] sm:$0xff]  }
0x1fcc   : > { %v4689_v33 = vmul.f32 1.442695, %v4688_v57 }
0x1fcd   : > { %v4699_v50 = vpop.permute.xlu0 %4698 }
0x1fce   : > { %6620 = vpow2.f32 %v4689_v33  ;;  %6296 = vmatpush3.msra.mxu1 %v4699_v50  ;;  %v6546_v33 = vld [vmem:[%s8371_s24 + $0x28] sm:$0xff]   ;;  %v6547_v50 = vld [vmem:[%s8371_s24 + $0x20] sm:$0xff]  }
0x1fcf   : > { %6297 = vmatprep.subr.mxu1 %v6984_v22 }
0x1fd0   : > { %6298 = vmatpush3.msra.mxu1 %v4697_v59  ;;  %v6548_v59 = vld [vmem:[%s8371_s24 + $0x18] sm:$0xff]  }
0x1fd1   : > { %6308 = vmatprep.subr.mxu1 %v6984_v22  ;;  %v4825_v3 = vpop.permute.xlu0 %4824 }
0x1fdb   : > { %v6621_v60 = vpop.eup %6620 }
0x1fdc   : > { %v4691_v4 = vsel %vm3379_vm4, %v6621_v60, 0.0 }
0x1fdd   : > { %4692 = vadd.xlane.f32.xlu1 %v4691_v4  ;;  %v6550_v4 = vld [vmem:[%s8371_s24 + $0x8] sm:$0xff]  }
0x1fee   : > { %4822 = vrot.lane.b32.xlu1 %v8041_v16, %s6988_s17  ;;  %v4821_v16 = vpop.permute.xlu0 %4820 }
0x2066   : > { %v4693_v42 = vpop.xlane.xlu1 %4692 }
0x2067   : > { %6622 = vrcp.f32 %v4693_v42  ;;  %v6551_v42 = vld [vmem:[%s8371_s24] sm:$0xff]  }
0x206a   : > { %v4823_v5 = vpop.permute.xlu1 %4822 }
0x2074   : > { %v6623_v17 = vpop.eup %6622 }
0x2075   : > { %v4695_v61 = vmul.f32 %v6623_v17, %v6621_v60  ;;  %v6549_v60 = vld [vmem:[%s8371_s24 + $0x10] sm:$0xff]   ;;  %v6552_v17 = vld [vmem:[%s7521_s0 + $0x38] sm:$0xff]  }
0x2077   : > { %6300 = vmatmul.mubr.msk.f32.vlgmr.msra.gmra.mxu1 %vm3379_vm4, %v4695_v61  ;;  %v6553_v61 = vld [vmem:[%s7521_s0 + $0x30] sm:$0xff]  }
0x2078   : > { %6309 = vmatpush3.xpose.msk.msra.mxu1 %vm1268_vm1, %v4825_v3  ;;  %6312 = vmatprep.mubr.msk.f32.mxu1 %vm6985_vm0, %v6984_v22  ;;  %v6554_v3 = vld [vmem:[%s7521_s0 + $0x28] sm:$0xff]  }
0x2079   : > { %6310 = vmatprep.subr.mxu1 %v6984_v22 }
0x207c   : > { %6311 = vmatpush3.xpose.msk.msra.mxu1 %vm1268_vm1, %v4823_v5  ;;  %v6555_v5 = vld [vmem:[%s7521_s0 + $0x20] sm:$0xff]  }
0x207d   : > { %6322 = vmatprep.subr.bf16.mxu1 %v6984_v22 }
0x207f   : > { %6313 = vmatmul.mubr.msk.f32.vlgmr.msra.gmra.mxu1 %vm1268_vm1, %v4821_v16  ;;  %v6556_v16 = vld [vmem:[%s7521_s0 + $0x18] sm:$0xff]  }
0x2080   : > { %6323 = vmatpush3.bf16.msra.mxu1 %v8051_v43  ;;  %6324 = vmatprep.mubr.msk.bf16.mxu1 %vm6985_vm0, %v6984_v22  ;;  %v5822_v43 = vld [vmem:[%s8370_s2] ss:$0 sm:$0xff] }
0x2081   : > { %6348 = vmatprep.subr.bf16.mxu1 %v6984_v22  ;;  %v5044_v9 = vadd.f32 %v5822_v43, %v8104_v7 }
0x2083   : > { %v5046_v11 = vadd.f32 %v5044_v9, %v7884_v62  ;;  %v5075_v9 = vrot.slane %v7874_v13, %v7564_v25  ;;  %v6559_v13 = vld [vmem:[%s7521_s0] sm:$0xff]  }
0x2137   : > { %v4771_v30 = vpop.f32.mrf.mxu1 }
0x2138   : > { %v4775_v63 = vpack.c.bf16 %v4771_v30, %v4771_v30 }
0x2139   : > { %v6301_v0 = vpop.f32.mrf.mxu1 }
0x213a   : > { %6305 = vmatmul.mubr.msk.bf16.vlgmr.msra.gmra.mxu0 %vm1268_vm1, %v4775_v63 }
0x213b   : > { %6319 = vmatprep.mubr.msk.f32.mxu0 %vm6985_vm0, %v6984_v22 }
0x213f   : > { %v4898_v39 = vpop.f32.mrf.mxu1 }
0x2140   : > { %v4902_v2 = vmul.f32 0.35355338, %v4898_v39 }
0x2141   : > { %v6314_v6 = vpop.f32.mrf.mxu1 }
0x2142   : > { %v4903_v8 = vsel %vm3379_vm4, %v4902_v2, -inf }
0x2143   : > { %4904 = vmax.xlane.f32.xlu1 %v4903_v8 }
0x2154   : > { %4914 = vrot.lane.b32.xlu1 %v8085_v55, %s6988_s17 }
0x2178   : > { %5048 = vadd.xlane.f32.xlu1 %v5046_v11 }
0x21cc   : > { %v4905_v51 = vpop.xlane.xlu1 %4904 }
0x21cd   : > { %v4906_v15 = vsub.f32 %v4902_v2, %v4905_v51 }
0x21cf   : > { %v4907_v23 = vmul.f32 1.442695, %v4906_v15 }
0x21d0   : > { %v4915_v19 = vpop.permute.xlu1 %4914 }
0x21d1   : > { %6624 = vpow2.f32 %v4907_v23  ;;  %v5081_v23 = vrot.slane %v7880_v18, %v7564_v25  ;;  %v5823_v25 = vld [vmem:[%s971_s22] ss:$0 sm:$0xff] }
0x21de   : > { %v6625_v24 = vpop.eup %6624 }
0x21df   : > { %v4909_v26 = vsel %vm3379_vm4, %v6625_v24, 0.0 }
0x21e0   : > { %4910 = vadd.xlane.f32.xlu0 %v4909_v26 }
0x21f6   : > { %4916 = vrot.lane.b32.xlu0 %v8080_v53, %s6988_s17 }
0x21fa   : > { %v4813_v55 = vpop.f32.mrf.mxu0 }
0x21fb   : > { %v4819_v29 = vadd.f32 %v4813_v55, %v8137_v47 }
0x21fc   : > { %v6306_v40 = vpop.f32.mrf.mxu0 }
0x21fd   : > { %v6557_v40 = vld [vmem:[%s7521_s0 + $0x10] sm:$0xff]  }
0x21fe   : > { %v4816_v46 = vpop.f32.mrf.mxu0 }
0x21ff   : > { %v6558_v46 = vld [vmem:[%s7521_s0 + $0x8] sm:$0xff]  }
0x2200   : > { %v6307_v7 = vpop.f32.mrf.mxu0 }
0x2201   : > { %v5049_v20 = vpop.xlane.xlu1 %5048 }
0x2202   : > { %v5052_v21 = vmul.f32 0.03125, %v5049_v20 }
0x2204   : > { %v5054_v41 = vsub.f32 %v5046_v11, %v5052_v21 }
0x2206   : > { %v5056_v48 = vmul.f32 %v7811_v12, %v5054_v41 }
0x2208   : > { %v5058_v54 = vmul.f32 %v5056_v48, %v5056_v48 }
0x2269   : > { %v4911_v27 = vpop.xlane.xlu0 %4910 }
0x226a   : > { %6626 = vrcp.f32 %v4911_v27 }
0x226d   : > { %v4917_v62 = vpop.permute.xlu0 %4916 }
0x226e   : > { %6316 = vmatpush3.msra.mxu0 %v4917_v62 }
0x226f   : > { %6317 = vmatprep.subr.mxu0 %v6984_v22 }
0x2270   : > { %6318 = vmatpush3.msra.mxu0 %v4915_v19 }
0x2271   : > { %6328 = vmatprep.subr.bf16.mxu0 %v6984_v22 }
0x2277   : > { %v6627_v31 = vpop.eup %6626 }
0x2278   : > { %v4913_v36 = vmul.f32 %v6627_v31, %v6625_v24 }
0x227a   : > { %6320 = vmatmul.mubr.msk.f32.vlgmr.msra.gmra.mxu0 %vm3379_vm4, %v4913_v36 }
0x227b   : > { %6344 = vmatprep.mubr.msk.bf16.mxu0 %vm6985_vm0, %v6984_v22  ;;  %6329 = vmatpush3.bf16.msra.mxu0 %v6544_v52 }
0x227c   : > { %6330 = vmatprep.subr.bf16.mxu0 %v6984_v22 }
0x227f   : > { %6331 = vmatpush3.bf16.msra.mxu0 %v6545_v10 }
0x2280   : > { %6332 = vmatprep.subr.bf16.mxu0 %v6984_v22 }
0x2283   : > { %6333 = vmatpush3.bf16.msra.mxu0 %v6546_v33 }
0x2284   : > { %6334 = vmatprep.subr.bf16.mxu0 %v6984_v22 }
0x2287   : > { %6335 = vmatpush3.bf16.msra.mxu0 %v6547_v50 }
0x2288   : > { %6336 = vmatprep.subr.bf16.mxu0 %v6984_v22 }
0x228b   : > { %6337 = vmatpush3.bf16.msra.mxu0 %v6548_v59 }
0x228c   : > { %6338 = vmatprep.subr.bf16.mxu0 %v6984_v22 }
0x228f   : > { %6339 = vmatpush3.bf16.msra.mxu0 %v6549_v60 }
0x2290   : > { %6340 = vmatprep.subr.bf16.mxu0 %v6984_v22 }
0x2293   : > { %6341 = vmatpush3.bf16.msra.mxu0 %v6550_v4  ;;  %v6636_v4 = vld [vmem:[%s7513_s18] sm:$0x7] }
0x2294   : > { %6342 = vmatprep.subr.bf16.mxu0 %v6984_v22 }
0x2297   : > { %6343 = vmatpush3.bf16.msra.mxu0 %v6551_v42  ;;  %v5343_v42 = vrot.slane %v6636_v4, %v7624_v58 }
0x233a   : > { %v4989_v53 = vpop.f32.mrf.mxu0 }
0x233b   : > { %v4993_v37 = vpack.c.bf16 %v4989_v53, %v4989_v53 }
0x233c   : > { %v6321_v35 = vpop.f32.mrf.mxu0 }
0x233d   : > { %6325 = vmatmul.mubr.msk.bf16.vlgmr.msra.gmra.mxu1 %vm1268_vm1, %v4993_v37 }
0x233e   : > { %6364 = vmatprep.mubr.msk.bf16.mxu1 %vm6985_vm0, %v6984_v22  ;;  %6349 = vmatpush3.bf16.msra.mxu1 %v6552_v17 }
0x233f   : > { %6350 = vmatprep.subr.bf16.mxu1 %v6984_v22 }
0x2342   : > { %6351 = vmatpush3.bf16.msra.mxu1 %v6553_v61  ;;  %v6637_v61 = vld [vmem:[%s7518_s13] sm:$0x7] }
0x2343   : > { %6352 = vmatprep.subr.bf16.mxu1 %v6984_v22 }
0x2346   : > { %6353 = vmatpush3.bf16.msra.mxu1 %v6554_v3  ;;  %v5349_v3 = vrot.slane %v6637_v61, %v7624_v58 }
0x2347   : > { %6354 = vmatprep.subr.bf16.mxu1 %v6984_v22 }
0x234a   : > { %6355 = vmatpush3.bf16.msra.mxu1 %v6555_v5 }
0x234b   : > { %6356 = vmatprep.subr.bf16.mxu1 %v6984_v22 }
0x234e   : > { %6357 = vmatpush3.bf16.msra.mxu1 %v6556_v16 }
0x234f   : > { %6358 = vmatprep.subr.bf16.mxu1 %v6984_v22 }
0x2352   : > { %6359 = vmatpush3.bf16.msra.mxu1 %v6557_v40 }
0x2353   : > { %6360 = vmatprep.subr.bf16.mxu1 %v6984_v22 }
0x2356   : > { %6361 = vmatpush3.bf16.msra.mxu1 %v6558_v46 }
0x2357   : > { %6362 = vmatprep.subr.bf16.mxu1 %v6984_v22  ;;  %v5840_v22 = vld [vmem:[%s974_s8] ss:$0 sm:$0xff] }
0x235a   : > { %6363 = vmatpush3.bf16.msra.mxu1 %v6559_v13 }
0x23fd   : > { %v5031_v32 = vpop.f32.mrf.mxu1 }
0x23fe   : > { %v5037_v34 = vadd.f32 %v5031_v32, %v4819_v29 }
0x23ff   : > { %v6326_v38 = vpop.f32.mrf.mxu1 }
0x2400   : > { %v5045_v44 = vadd.f32 %v5822_v43, %v5037_v34 }
0x2401   : > { %v5034_v45 = vpop.f32.mrf.mxu1 }
0x2402   : > { %v5047_v47 = vadd.f32 %v5045_v44, %v7886_v28 }
0x2403   : > { %v6327_v49 = vpop.f32.mrf.mxu1 }
0x2404   : > { %5050 = vadd.xlane.f32.xlu0 %v5047_v47 }
0x2408   : > { %5060 = vadd.xlane.f32.xlu0 %v5058_v54 }
0x248d   : > { %v5051_v14 = vpop.xlane.xlu0 %5050 }
0x248e   : > { %v5053_v28 = vmul.f32 0.03125, %v5051_v14 }
0x2490   : > { %v5055_v1 = vsub.f32 %v5047_v47, %v5053_v28 }
0x2491   : > { %v5061_v30 = vpop.xlane.xlu0 %5060 }
0x2492   : > { %v5057_v56 = vmul.f32 %v7811_v12, %v5055_v1  ;;  %v5064_v63 = vmul.f32 0.03125, %v5061_v30 }
0x2494   : > { %v5059_v57 = vmul.f32 %v5057_v56, %v5057_v56  ;;  %v5066_v0 = vadd.f32 1e-05, %v5064_v63 }
0x2496   : > { %5062 = vadd.xlane.f32.xlu1 %v5059_v57  ;;  %6628 = vrsqrt.f32 %v5066_v0 }
0x24a3   : > { %v6629_v8 = vpop.eup %6628 }
0x24a4   : > { %v5070_v43 = vmul.f32 %v6629_v8, %v5056_v48 }
0x24a6   : > { %v5076_v15 = vmul.f32 %v5075_v9, %v5070_v43 }
0x24a8   : > { %v5082_v26 = vadd.f32 %v5081_v23, %v5076_v15 }
0x251f   : > { %v5063_v39 = vpop.xlane.xlu1 %5062 }
0x2520   : > { %v5065_v2 = vmul.f32 0.03125, %v5063_v39 }
0x2522   : > { %v5067_v6 = vadd.f32 1e-05, %v5065_v2 }
0x2524   : > { %6630 = vrsqrt.f32 %v5067_v6 }
0x2531   : > { %v6631_v11 = vpop.eup %6630 }
0x2532   : > { %v5071_v51 = vmul.f32 %v6631_v11, %v5057_v56 }
0x2534   : > { %v5077_v24 = vmul.f32 %v5075_v9, %v5071_v51 }
0x2536   : > { %v5083_v55 = vadd.f32 %v5081_v23, %v5077_v24 }
0x2538   : > { %v5100_v29 = vpack.c.bf16 %v5083_v55, %v5082_v26 }
0x253a   : > { %6345 = vmatmul.mubr.bf16.vlgmr.msra.gmra.mxu0 %v5100_v29 }
0x25fa   : > { %v5190_v18 = vpop.f32.mrf.mxu0 }
0x25fb   : > { %v5191_v27 = vadd.f32 %v5823_v25, %v5190_v18 }
0x25fc   : > { %v6346_v7 = vpop.f32.mrf.mxu0 }
0x25fd   : > { %v5197_v36 = vmax.f32 %v5191_v27, 0.0 }
0x25fe   : > { %v5193_v62 = vpop.f32.mrf.mxu0 }
0x25ff   : > { %v5194_v19 = vadd.f32 %v5823_v25, %v5193_v62 }
0x2600   : > { %v6347_v31 = vpop.f32.mrf.mxu0 }
0x2601   : > { %v5198_v53 = vmax.f32 %v5194_v19, 0.0 }
0x2603   : > { %v5215_v37 = vpack.c.bf16 %v5198_v53, %v5197_v36 }
0x2605   : > { %6365 = vmatmul.mubr.bf16.vlgmr.msra.gmra.mxu1 %v5215_v37 }
0x26c5   : > { %v5298_v35 = vpop.f32.mrf.mxu1 }
0x26c6   : > { %v5305_v20 = vadd.f32 %v5298_v35, %v5082_v26 }
0x26c7   : > { %v6366_v21 = vpop.f32.mrf.mxu1 }
0x26c8   : > { %v5314_v32 = vadd.f32 %v5840_v22, %v5305_v20 }
0x26c9   : > { %v5301_v41 = vpop.f32.mrf.mxu1 }
0x26ca   : > { %v5306_v34 = vadd.f32 %v5301_v41, %v5083_v55  ;;  %5316 = vadd.xlane.f32.xlu0 %v5314_v32 }
0x26cb   : > { %v6367_v38 = vpop.f32.mrf.mxu1 }
0x26cc   : > { %v5315_v44 = vadd.f32 %v5840_v22, %v5306_v34 }
0x26ce   : > { %5318 = vadd.xlane.f32.xlu1 %v5315_v44 }
0x2753   : > { %v5317_v45 = vpop.xlane.xlu0 %5316 }
0x2754   : > { %v5320_v47 = vmul.f32 0.03125, %v5317_v45 }
0x2756   : > { %v5322_v48 = vsub.f32 %v5314_v32, %v5320_v47 }
0x2757   : > { %v5319_v49 = vpop.xlane.xlu1 %5318 }
0x2758   : > { %v5321_v54 = vmul.f32 0.03125, %v5319_v49  ;;  %v5324_v52 = vmul.f32 %v7811_v12, %v5322_v48 }
0x275a   : > { %v5323_v10 = vsub.f32 %v5315_v44, %v5321_v54  ;;  %v5326_v14 = vmul.f32 %v5324_v52, %v5324_v52 }
0x275c   : > { %5328 = vadd.xlane.f32.xlu0 %v5326_v14  ;;  %v5325_v28 = vmul.f32 %v7811_v12, %v5323_v10 }
0x275e   : > { %v5327_v1 = vmul.f32 %v5325_v28, %v5325_v28 }
0x2760   : > { %5330 = vadd.xlane.f32.xlu1 %v5327_v1 }
0x27e5   : > { %v5329_v56 = vpop.xlane.xlu0 %5328 }
0x27e6   : > { %v5332_v57 = vmul.f32 0.03125, %v5329_v56 }
0x27e8   : > { %v5334_v33 = vadd.f32 1e-05, %v5332_v57 }
0x27e9   : > { %v5331_v50 = vpop.xlane.xlu1 %5330 }
0x27ea   : > { %6632 = vrsqrt.f32 %v5334_v33  ;;  %v5333_v59 = vmul.f32 0.03125, %v5331_v50 }
0x27ec   : > { %v5335_v60 = vadd.f32 1e-05, %v5333_v59 }
0x27ee   : > { %6634 = vrsqrt.f32 %v5335_v60 }
0x27f7   : > { %v6633_v17 = vpop.eup %6632 }
0x27f8   : > { %v5338_v5 = vmul.f32 %v6633_v17, %v5324_v52 }
0x27fa   : > { %v5344_v16 = vmul.f32 %v5343_v42, %v5338_v5 }
0x27fb   : > { %v6635_v12 = vpop.eup %6634 }
0x27fc   : > { %v5350_v30 = vadd.f32 %v5349_v3, %v5344_v16  ;;  %v5339_v63 = vmul.f32 %v6635_v12, %v5325_v28 }
0x27fe   : > { %5352 = vst [vmem:[#allocation2] sm:$0xff] %v5350_v30  ;;  %v5345_v0 = vmul.f32 %v5343_v42, %v5339_v63  ;;  %5357 = sbr.rel (%p5841_p3) target bundleno = 10244 (0x2804), region = 136 }
0x2800   : > { %v5351_v39 = vadd.f32 %v5349_v3, %v5345_v0 }
0x2802   : > { %5353 = vst [vmem:[#allocation2 + $0x8] sm:$0xff] %v5351_v39 }
0x2803   : > { %5358 = vst [vmem:[#allocation18] sm:$0xff] %v5350_v30  ;;  %5359 = vst [vmem:[#allocation18 + $0x8] sm:$0xff] %v5351_v39 }
0x2804 PF: > { %p6428_p4 = scmp.eq.s32.totalorder %s7277_s6, 1  ;;  %s6989_s8 = smov [#allocation18]  }
0x2805   : > { %s5366_s1 = sshll.u32 %s6989_s8, 4  ;;  %s5367_s1 = int_to_ptr.vmem [resolvable:$true] %s5366_s1 }
0x2806   : > { %s6888_s22 = scalar_lea.vmem %s5367_s1, 256  ;;  %p6895_p2 = scmp.lt.s32.totalorder %s5367_s1, %s5367_s1 }
0x2807   : > { %p6889_p10 = scmp.ne.s32.totalorder %s5367_s1, %s6888_s22  ;;  %p6896_p8 = scmp.lt.s32.totalorder %s6888_s22, %s6888_s22 }
0x2809   : > { %p6890_p12 = pnand %p6889_p10, %p6428_p4  ;;  %p6897_p0 = por %p6896_p8, %p6895_p2 }
0x280b   : > { %p6891_p13 = pneg %p6890_p12 }
0x280d   : > { %p6898_p7 = pnand %p6897_p0, %p6891_p13 }
0x280f   : > { %6901 = shalt.err (!%p6898_p7)
}
0x2810   : > { %s6990_s18 = smov 128   ;;  %s6991_s13 = smov 8  }
0x2811   : > { %s8374_s19 = sld [smem:[#allocation48_spill]] }
0x2817   : > { %6393 = dma.vmem_to_hbm [thread:$0]  (%p6428_p4), %s5367_s1, 256, %s8374_s19, [#allocation5], %s6990_s18, %s6990_s18, %s6991_s13  }
0x2818   : > { %6949 = dma.done.wait (%p6428_p4), [#allocation5], 256  }
0x2819   : > { %6951 = vsyncadd (%p6428_p4), [#allocation5], 4294967040 }
0x281a PF: > { %s8375_s30 = sld [smem:[#allocation27_spill]] }
0x281b   : > { %s8376_s27 = sld [smem:[#allocation25_spill]] }
0x281c   : > { %s8377_s28 = sld [smem:[#allocation26_spill]] }
0x281d   : > { %s8378_s29 = sld [smem:[#allocation28_spill]] }
0x2820   : > { %p39_p1 = scmp.ge.s32.totalorder %s8375_s30, 4  }
0x2822   :  { %41 = sbr.rel (!%p39_p1) target bundleno = 30 (0x1e), region = 249 }
0x2827   :  { %5382 = vsyncpa [#allocation4], 1 }
0x2828   :  { %5384 = vsyncpa [#allocation4 + $0x1], 1 }
0x2829   :  { %5385 = vsyncpa [#allocation7], 1 }
0x282a   :  { %5387 = vsyncpa [#allocation7 + $0x1], 1 }
0x282b   :  { %5388 = vsyncpa [#allocation10], 1 }
0x282c   :  { %5390 = vsyncpa [#allocation10 + $0x1], 1 }
0x282d   :  { %5391 = vsyncpa [#allocation13], 1 }
0x282e   :  { %5393 = vsyncpa [#allocation13 + $0x1], 1 }
0x282f   :  { %5394 = vsyncpa [#allocation16], 1 }
0x2830   :  { %5396 = vsyncpa [#allocation16 + $0x1], 1 }
0x2831   :  { %5397 = vsyncpa [#allocation5], 1 }
0x2832   :  { %5399 = vsyncpa [#allocation5 + $0x1], 1 }

</bundles_post_ra>
